<compile_context>
chip_gen: v7x
topology: tpu7x:2x2x1
jax: 0.10.0
libtpu: 0.0.40
codegen_flags: <defaults>
</compile_context>

<pallas_src>
import functools

import jax
import jax.numpy as jnp
from jax.experimental import pallas as pl
from jax.experimental.pallas import tpu as pltpu


def sata_kernel(feat_ref, z0_ref, adj_ref, adjt_ref, ea_ref, eat_ref, w1_ref,
                b2_ref, w2_hbm_ref, out_ref, w2_vmem, w2_sem, *,
                nlayer, lambda_1, lambda_2, n_real, nfeat):
    f32 = jnp.float32
    bf16 = jnp.bfloat16

    # MXU matmuls: bf16 operands, f32 accumulation.
    def mm(a_bf, b_bf):       # a @ b
        return jax.lax.dot_general(a_bf, b_bf, (((1,), (0,)), ((), ())),
                                   preferred_element_type=f32)

    def mm_nt(a_bf, b_bf):    # a @ b.T (contract last dims -> no transpose)
        return jax.lax.dot_general(a_bf, b_bf, (((1,), (1,)), ((), ())),
                                   preferred_element_type=f32)

    # Start the classifier-weight DMA now; it completes behind the layer loop.
    w2_copy = pltpu.make_async_copy(w2_hbm_ref, w2_vmem, w2_sem)
    w2_copy.start()

    feat = feat_ref[...]            # f32 (NPAD, FPAD)
    adj = adj_ref[...]              # f32 (NPAD, NPAD)
    adj_t = adjt_ref[...]
    ea_m = ea_ref[...]              # alpha * EA * w22 (fused on host)
    ea_t = eat_ref[...]
    w1_bf = w1_ref[...]             # bf16 (MXU-only operand, loaded once)

    npad, fpad = feat.shape

    # Hoisted mask (built once, reused every layer): padded node ROWS and
    # padded feature LANES must stay exactly 0 through the recurrence.
    row_ok = jax.lax.broadcasted_iota(jnp.int32, (npad, fpad), 0) < n_real
    col_ok = jax.lax.broadcasted_iota(jnp.int32, (npad, fpad), 1) < nfeat
    ymask = jnp.where(row_ok & col_ok, 1.0, 0.0).astype(f32)

    half_l2 = lambda_2 * 0.5
    c_m = lambda_1 * 0.5 / lambda_2       # folds (lambda_2*(...)-m)/lambda_2

    def layer_step(carry):
        y, z, EP, EP_T = carry
        y_bf = y.astype(bf16)             # cast once per layer (hoisted)
        z_bf = z.astype(bf16)

        gram = mm_nt(y_bf, y_bf)                      # y @ y.T   (NPAD, NPAD)
        a_eff = adj * EP + ea_m                       # adj*EP + alpha*EA*w22
        prop = EP_T + a_eff - gram                    # EP.T + A_eff - y@y.T

        # Single fused propagation matmul: (EP.T + A_eff - y@y.T) @ y
        temp = mm(prop.astype(bf16), y_bf)
        temp = mm(w1_bf, temp.astype(bf16))
        # F.dropout(feat) == feat in eval mode.
        y_n = half_l2 * (jax.nn.sigmoid(temp) * ymask) + feat

        # z_n = (I - A_eff) @ z without materializing the identity.
        z_n = z - mm(a_eff.astype(bf16), z_bf)

        # ans(z, adj): ||z_i - z_j||_2 * adj[i,j] (dense).  Keep this gram in
        # f32 -- bf16 cancellation makes sqrt(d2) noisy for nearby nodes.
        sq = jnp.sum(z * z, axis=1, keepdims=True)    # (NPAD, 1)
        zg = jax.lax.dot_general(z, z, (((1,), (1,)), ((), ())),
                                 preferred_element_type=f32)
        dist = jnp.sqrt(jnp.maximum(sq + sq.T - 2.0 * zg, 0.0))
        cd = c_m * dist                               # symmetric

        # Maintain EP and EP.T together (gram and dist are symmetric) --
        # removes the per-layer XLU transpose without assuming EA symmetric.
        EP_n = gram - ea_m - cd * adj
        EP_Tn = gram - ea_t - cd * adj_t
        return y_n, z_n, EP_n, EP_Tn

    carry = (feat, z0_ref[...],
             jnp.ones((npad, npad), f32),             # EP_0   = ones
             jnp.ones((npad, npad), f32))             # EP_0.T = ones
    if nlayer <= 3:
        for _ in range(nlayer):                       # small static trip count
            carry = layer_step(carry)
    else:
        carry = jax.lax.fori_loop(0, nlayer, lambda _, c: layer_step(c), carry)
    y, z, _, _ = carry

    # F.normalize(p=2, dim=1), eps = 1e-12  ->  rsqrt on the EUP slot.
    y = y * jax.lax.rsqrt(jnp.maximum(jnp.sum(y * y, axis=1, keepdims=True), 1e-24))
    z = z * jax.lax.rsqrt(jnp.maximum(jnp.sum(z * z, axis=1, keepdims=True), 1e-24))

    # Classifier: p = cat([z, y], dim=1); Linear as two matmuls against the
    # split, lane-padded bf16 weight that arrived via the async copy started
    # at kernel entry.  Padded class lanes carry a -1e30 bias so they vanish
    # from the log-softmax reduction; the caller slices them off.
    w2_copy.wait()
    w2z = w2_vmem[0]                                  # (CPAD, FPAD) bf16
    w2y = w2_vmem[1]
    logits = (mm_nt(z.astype(bf16), w2z) + mm_nt(y.astype(bf16), w2y)
              + b2_ref[...])
    mx = jnp.max(logits, axis=1, keepdims=True)
    sh = logits - mx
    lse = jnp.log(jnp.sum(jnp.exp(sh), axis=1, keepdims=True))
    out_ref[...] = (sh - lse).astype(out_ref.dtype)


def _round_up(x, m):
    return ((x + m - 1) // m) * m


def _vmem_budget_bytes():
    # Per-generation ceiling: ~85% of physical VMEM (headroom for compiler
    # scratch).  v5e/v6e: ~109 MiB of 128 MiB; v7x: ~54 MiB of 64 MiB.
    cap = None
    try:
        info = pltpu.get_tpu_info()
        cap = getattr(info, "vmem_capacity_bytes", None)
    except Exception:
        cap = None
    if not cap:
        cap = 64 * 1024 * 1024          # conservative fallback (fits all gens)
    return int(cap * 0.85)


def sata_forward(feat, adj, w1, EA, w22, z0, w2_weight, w2_bias,
                 *, nlayer, lambda_1, lambda_2, alpha):
    n, nfeat = feat.shape
    nclass = w2_weight.shape[0]

    LANE = 128
    npad = _round_up(max(n, LANE), LANE)       # lane-dense node axis
    fpad = _round_up(max(nfeat, LANE), LANE)   # MXU-friendly contraction width
    cpad = _round_up(max(nclass, LANE), LANE)  # lane-dense output block

    def pad2(x, rows, cols):
        x = x.astype(jnp.float32)
        return jnp.pad(x, ((0, rows - x.shape[0]), (0, cols - x.shape[1])))

    feat_p = pad2(feat, npad, fpad)
    z0_p = pad2(z0, npad, fpad)
    adj_p = pad2(adj, npad, npad)
    adj_t = adj_p.T                                    # transposed once (host)
    ea_m = pad2(alpha * EA * w22, npad, npad)          # fused alpha*EA*w22
    ea_t = ea_m.T
    w1_bf = pad2(w1, npad, npad).astype(jnp.bfloat16)  # MXU-only -> bf16 DMA

    # Split Linear weight into z-half / y-half of the concatenation; zero-pad
    # both axes, ship bf16, keep it in HBM and DMA it inside the kernel.
    w2z = pad2(w2_weight[:, :nfeat], cpad, fpad)
    w2y = pad2(w2_weight[:, nfeat:], cpad, fpad)
    w2zy = jnp.stack([w2z, w2y], axis=0).astype(jnp.bfloat16)   # (2,CPAD,FPAD)

    b2 = jnp.full((1, cpad), -1e30, jnp.float32)
    b2 = b2.at[0, :nclass].set(w2_bias.astype(jnp.float32))

    kernel = functools.partial(
        sata_kernel, nlayer=int(nlayer), lambda_1=float(lambda_1),
        lambda_2=float(lambda_2), n_real=int(n), nfeat=int(nfeat))

    # Rough live-buffer estimate (f32 n^2 intermediates dominate).
    est_bytes = (4 * (12 * npad * npad + 9 * npad * fpad + 2 * cpad)
                 + 2 * (4 * npad * npad + 4 * npad * fpad + 2 * cpad * fpad))
    vmem_limit = int(min(_vmem_budget_bytes(),
                         max(32 * 1024 * 1024, 2 * est_bytes)))

    vmem_spec = pl.BlockSpec(memory_space=pltpu.MemorySpace.VMEM)
    any_spec = pl.BlockSpec(memory_space=pl.ANY)       # classifier weight: HBM

    # No grid: single invocation, no pipeline machinery -> every VMEM input is
    # single-buffered (no wasted double-buffer windows).
    out_padded = pl.pallas_call(
        kernel,
        out_shape=jax.ShapeDtypeStruct((npad, cpad), jnp.float32),
        in_specs=[vmem_spec, vmem_spec, vmem_spec, vmem_spec, vmem_spec,
                  vmem_spec, vmem_spec, vmem_spec, any_spec],
        out_specs=vmem_spec,
        scratch_shapes=[pltpu.VMEM((2, cpad, fpad), jnp.bfloat16),
                        pltpu.SemaphoreType.DMA],
        compiler_params=pltpu.CompilerParams(vmem_limit_bytes=vmem_limit),
    )(feat_p, z0_p, adj_p, adj_t, ea_m, ea_t, w1_bf, b2, w2zy)

    return out_padded[:n, :nclass]


if __name__ == "__main__":
    # Hyperparameters (small, consistent with the module's constructor)
    n, nfeat, nclass, nlayer = 8, 16, 4, 2
    lambda_1, lambda_2, alpha = 1.0, 1.0, 0.5

    key = jax.random.PRNGKey(0)
    k_feat, k_adj, k_w1, k_ea, k_z, k_w2, k_b2 = jax.random.split(key, 7)

    feat = jax.random.normal(k_feat, (n, nfeat), dtype=jnp.float32)

    # Synthetic symmetric adjacency (dense view of the sparse `adj` argument)
    a = jax.random.uniform(k_adj, (n, n), dtype=jnp.float32)
    a = (a + a.T) * 0.5
    adj = jnp.where(a > 0.6, a, 0.0)
    adj = adj * (1.0 - jnp.eye(n, dtype=jnp.float32))  # no self loops

    # Parameters (deterministic init mimicking __init__ / reset_parameter)
    w1 = jax.random.uniform(k_w1, (n, n), dtype=jnp.float32)          # U(0,1)
    EA = jax.random.uniform(k_ea, (n, n), dtype=jnp.float32)          # U(0,1)
    w22 = jnp.where(adj != 0.0, 0.0, 1.0).astype(jnp.float32)         # ones, 0 at edges
    # z = torch.rand(n, nfeat) each forward -> generated deterministically here
    z0 = jax.random.uniform(k_z, (n, nfeat), dtype=jnp.float32)
    # Linear(2*nfeat, nclass)
    bound = 1.0 / jnp.sqrt(2.0 * nfeat)
    w2_weight = jax.random.uniform(k_w2, (nclass, 2 * nfeat),
                                   minval=-bound, maxval=bound, dtype=jnp.float32)
    w2_bias = jax.random.uniform(k_b2, (nclass,),
                                 minval=-bound, maxval=bound, dtype=jnp.float32)

    out = sata_forward(feat, adj, w1, EA, w22, z0, w2_weight, w2_bias,
                       nlayer=nlayer, lambda_1=lambda_1,
                       lambda_2=lambda_2, alpha=alpha)
    out = jax.block_until_ready(out)
    assert out.shape == (n, nclass)
    assert bool(jnp.all(jnp.isfinite(out)))
    print("KERNEL_OK")
</pallas_src>

<mosaic_0001>
module attributes {stable_mosaic.version = 11 : i64} {
  func.func @sata_kernel(%arg0: memref<128x128xf32, #tpu.memory_space<vmem>>, %arg1: memref<128x128xf32, #tpu.memory_space<vmem>>, %arg2: memref<128x128xf32, #tpu.memory_space<vmem>>, %arg3: memref<128x128xf32, #tpu.memory_space<vmem>>, %arg4: memref<128x128xf32, #tpu.memory_space<vmem>>, %arg5: memref<128x128xf32, #tpu.memory_space<vmem>>, %arg6: memref<128x128xbf16, #tpu.memory_space<vmem>>, %arg7: memref<1x128xf32, #tpu.memory_space<vmem>>, %arg8: memref<2x128x128xbf16, #tpu.memory_space<any>>, %arg9: memref<128x128xf32, #tpu.memory_space<vmem>>, %arg10: memref<2x128x128xbf16, #tpu.memory_space<vmem>>, %arg11: memref<!tpu.dma_semaphore, #tpu.memory_space<semaphore_mem>>) attributes {dimension_semantics = [], scalar_prefetch = 0 : i64, scratch_operands = 2 : i64, tpu.core_type = #tpu.core_type<tc>} {
    tpu.enqueue_dma source(%arg8 : memref<2x128x128xbf16, #tpu.memory_space<any>>) target(%arg10 : memref<2x128x128xbf16, #tpu.memory_space<vmem>>) target_semaphore(%arg11 : memref<!tpu.dma_semaphore, #tpu.memory_space<semaphore_mem>>)
    %c0 = arith.constant 0 : index
    %c0_0 = arith.constant 0 : index
    %0 = vector.load %arg0[%c0, %c0_0] : memref<128x128xf32, #tpu.memory_space<vmem>>, vector<128x128xf32>
    %c0_1 = arith.constant 0 : index
    %c0_2 = arith.constant 0 : index
    %1 = vector.load %arg2[%c0_1, %c0_2] : memref<128x128xf32, #tpu.memory_space<vmem>>, vector<128x128xf32>
    %c0_3 = arith.constant 0 : index
    %c0_4 = arith.constant 0 : index
    %2 = vector.load %arg3[%c0_3, %c0_4] : memref<128x128xf32, #tpu.memory_space<vmem>>, vector<128x128xf32>
    %c0_5 = arith.constant 0 : index
    %c0_6 = arith.constant 0 : index
    %3 = vector.load %arg4[%c0_5, %c0_6] : memref<128x128xf32, #tpu.memory_space<vmem>>, vector<128x128xf32>
    %c0_7 = arith.constant 0 : index
    %c0_8 = arith.constant 0 : index
    %4 = vector.load %arg5[%c0_7, %c0_8] : memref<128x128xf32, #tpu.memory_space<vmem>>, vector<128x128xf32>
    %c0_9 = arith.constant 0 : index
    %c0_10 = arith.constant 0 : index
    %5 = vector.load %arg6[%c0_9, %c0_10] : memref<128x128xbf16, #tpu.memory_space<vmem>>, vector<128x128xbf16>
    %6 = tpu.iota {dimensions = array<i32: 0>} : vector<128x128xi32>
    %c8_i32 = arith.constant 8 : i32
    %7 = vector.broadcast %c8_i32 : i32 to vector<128x128xi32>
    %8 = arith.cmpi slt, %6, %7 : vector<128x128xi32>
    %9 = tpu.iota {dimensions = array<i32: 1>} : vector<128x128xi32>
    %c16_i32 = arith.constant 16 : i32
    %10 = vector.broadcast %c16_i32 : i32 to vector<128x128xi32>
    %11 = arith.cmpi slt, %9, %10 : vector<128x128xi32>
    %12 = arith.andi %8, %11 : vector<128x128xi1>
    %cst = arith.constant 1.000000e+00 : f32
    %cst_11 = arith.constant 0.000000e+00 : f32
    %13 = vector.broadcast %cst : f32 to vector<128x128xf32>
    %14 = vector.broadcast %cst_11 : f32 to vector<128x128xf32>
    %15 = arith.select %12, %13, %14 : vector<128x128xi1>, vector<128x128xf32>
    %c0_12 = arith.constant 0 : index
    %c0_13 = arith.constant 0 : index
    %16 = vector.load %arg1[%c0_12, %c0_13] : memref<128x128xf32, #tpu.memory_space<vmem>>, vector<128x128xf32>
    %cst_14 = arith.constant 1.000000e+00 : f32
    %17 = vector.broadcast %cst_14 : f32 to vector<128x128xf32>
    %cst_15 = arith.constant 1.000000e+00 : f32
    %18 = vector.broadcast %cst_15 : f32 to vector<128x128xf32>
    %19 = arith.truncf %0 : vector<128x128xf32> to vector<128x128xbf16>
    %20 = arith.truncf %16 : vector<128x128xf32> to vector<128x128xbf16>
    %cst_16 = arith.constant dense<0.000000e+00> : vector<128x128xf32>
    %21 = tpu.matmul %19, %19, %cst_16 {dimension_numbers = #tpu.dot_dimension_numbers<[1], [1], [0], [0], [0, 0, 1, 0], [], []>} : vector<128x128xbf16>, vector<128x128xbf16>, vector<128x128xf32> -> vector<128x128xf32>
    %22 = arith.mulf %1, %17 : vector<128x128xf32>
    %23 = arith.addf %22, %3 : vector<128x128xf32>
    %24 = arith.addf %18, %23 : vector<128x128xf32>
    %25 = arith.subf %24, %21 : vector<128x128xf32>
    %26 = arith.truncf %25 : vector<128x128xf32> to vector<128x128xbf16>
    %cst_17 = arith.constant dense<0.000000e+00> : vector<128x128xf32>
    %27 = tpu.matmul %26, %19, %cst_17 {dimension_numbers = #tpu.dot_dimension_numbers<[1], [0], [0], [1], [0, 0, 1, 1], [], []>} : vector<128x128xbf16>, vector<128x128xbf16>, vector<128x128xf32> -> vector<128x128xf32>
    %28 = arith.truncf %27 : vector<128x128xf32> to vector<128x128xbf16>
    %cst_18 = arith.constant dense<0.000000e+00> : vector<128x128xf32>
    %29 = tpu.matmul %5, %28, %cst_18 {dimension_numbers = #tpu.dot_dimension_numbers<[1], [0], [0], [1], [0, 0, 1, 1], [], []>} : vector<128x128xbf16>, vector<128x128xbf16>, vector<128x128xf32> -> vector<128x128xf32>
    %30 = arith.negf %29 : vector<128x128xf32>
    %31 = math.exp %30 : vector<128x128xf32>
    %cst_19 = arith.constant 1.000000e+00 : f32
    %32 = vector.broadcast %cst_19 : f32 to vector<128x128xf32>
    %33 = arith.addf %32, %31 : vector<128x128xf32>
    %34 = arith.divf %32, %33 : vector<128x128xf32>
    %35 = arith.mulf %34, %15 : vector<128x128xf32>
    %cst_20 = arith.constant 5.000000e-01 : f32
    %36 = vector.broadcast %cst_20 : f32 to vector<128x128xf32>
    %37 = arith.mulf %36, %35 : vector<128x128xf32>
    %38 = arith.addf %37, %0 : vector<128x128xf32>
    %39 = arith.truncf %23 : vector<128x128xf32> to vector<128x128xbf16>
    %cst_21 = arith.constant dense<0.000000e+00> : vector<128x128xf32>
    %40 = tpu.matmul %39, %20, %cst_21 {dimension_numbers = #tpu.dot_dimension_numbers<[1], [0], [0], [1], [0, 0, 1, 1], [], []>} : vector<128x128xbf16>, vector<128x128xbf16>, vector<128x128xf32> -> vector<128x128xf32>
    %41 = arith.subf %16, %40 : vector<128x128xf32>
    %42 = arith.mulf %16, %16 : vector<128x128xf32>
    %cst_22 = arith.constant dense<0.000000e+00> : vector<128xf32>
    %43 = vector.multi_reduction <add>, %42, %cst_22 [1] : vector<128x128xf32> to vector<128xf32>
    %44 = vector.shape_cast %43 : vector<128xf32> to vector<128x1xf32>
    %cst_23 = arith.constant dense<0.000000e+00> : vector<128x128xf32>
    %45 = tpu.matmul %16, %16, %cst_23 {dimension_numbers = #tpu.dot_dimension_numbers<[1], [1], [0], [0], [0, 0, 1, 0], [], []>} : vector<128x128xf32>, vector<128x128xf32>, vector<128x128xf32> -> vector<128x128xf32>
    %46 = tpu.transpose %44, [1, 0] : vector<128x1xf32> -> vector<1x128xf32>
    %47 = vector.broadcast %44 : vector<128x1xf32> to vector<128x128xf32>
    %48 = vector.broadcast %46 : vector<1x128xf32> to vector<128x128xf32>
    %49 = arith.addf %47, %48 : vector<128x128xf32>
    %cst_24 = arith.constant 2.000000e+00 : f32
    %50 = vector.broadcast %cst_24 : f32 to vector<128x128xf32>
    %51 = arith.mulf %50, %45 : vector<128x128xf32>
    %52 = arith.subf %49, %51 : vector<128x128xf32>
    %cst_25 = arith.constant 0.000000e+00 : f32
    %53 = vector.broadcast %cst_25 : f32 to vector<128x128xf32>
    %54 = arith.maximumf %52, %53 : vector<128x128xf32>
    %55 = math.sqrt %54 : vector<128x128xf32>
    %cst_26 = arith.constant 5.000000e-01 : f32
    %56 = vector.broadcast %cst_26 : f32 to vector<128x128xf32>
    %57 = arith.mulf %56, %55 : vector<128x128xf32>
    %58 = arith.subf %21, %3 : vector<128x128xf32>
    %59 = arith.mulf %57, %1 : vector<128x128xf32>
    %60 = arith.subf %58, %59 : vector<128x128xf32>
    %61 = arith.subf %21, %4 : vector<128x128xf32>
    %62 = arith.mulf %57, %2 : vector<128x128xf32>
    %63 = arith.subf %61, %62 : vector<128x128xf32>
    %64 = arith.truncf %38 : vector<128x128xf32> to vector<128x128xbf16>
    %65 = arith.truncf %41 : vector<128x128xf32> to vector<128x128xbf16>
    %cst_27 = arith.constant dense<0.000000e+00> : vector<128x128xf32>
    %66 = tpu.matmul %64, %64, %cst_27 {dimension_numbers = #tpu.dot_dimension_numbers<[1], [1], [0], [0], [0, 0, 1, 0], [], []>} : vector<128x128xbf16>, vector<128x128xbf16>, vector<128x128xf32> -> vector<128x128xf32>
    %67 = arith.mulf %1, %60 : vector<128x128xf32>
    %68 = arith.addf %67, %3 : vector<128x128xf32>
    %69 = arith.addf %63, %68 : vector<128x128xf32>
    %70 = arith.subf %69, %66 : vector<128x128xf32>
    %71 = arith.truncf %70 : vector<128x128xf32> to vector<128x128xbf16>
    %cst_28 = arith.constant dense<0.000000e+00> : vector<128x128xf32>
    %72 = tpu.matmul %71, %64, %cst_28 {dimension_numbers = #tpu.dot_dimension_numbers<[1], [0], [0], [1], [0, 0, 1, 1], [], []>} : vector<128x128xbf16>, vector<128x128xbf16>, vector<128x128xf32> -> vector<128x128xf32>
    %73 = arith.truncf %72 : vector<128x128xf32> to vector<128x128xbf16>
    %cst_29 = arith.constant dense<0.000000e+00> : vector<128x128xf32>
    %74 = tpu.matmul %5, %73, %cst_29 {dimension_numbers = #tpu.dot_dimension_numbers<[1], [0], [0], [1], [0, 0, 1, 1], [], []>} : vector<128x128xbf16>, vector<128x128xbf16>, vector<128x128xf32> -> vector<128x128xf32>
    %75 = arith.negf %74 : vector<128x128xf32>
    %76 = math.exp %75 : vector<128x128xf32>
    %cst_30 = arith.constant 1.000000e+00 : f32
    %77 = vector.broadcast %cst_30 : f32 to vector<128x128xf32>
    %78 = arith.addf %77, %76 : vector<128x128xf32>
    %79 = arith.divf %77, %78 : vector<128x128xf32>
    %80 = arith.mulf %79, %15 : vector<128x128xf32>
    %cst_31 = arith.constant 5.000000e-01 : f32
    %81 = vector.broadcast %cst_31 : f32 to vector<128x128xf32>
    %82 = arith.mulf %81, %80 : vector<128x128xf32>
    %83 = arith.addf %82, %0 : vector<128x128xf32>
    %84 = arith.truncf %68 : vector<128x128xf32> to vector<128x128xbf16>
    %cst_32 = arith.constant dense<0.000000e+00> : vector<128x128xf32>
    %85 = tpu.matmul %84, %65, %cst_32 {dimension_numbers = #tpu.dot_dimension_numbers<[1], [0], [0], [1], [0, 0, 1, 1], [], []>} : vector<128x128xbf16>, vector<128x128xbf16>, vector<128x128xf32> -> vector<128x128xf32>
    %86 = arith.subf %41, %85 : vector<128x128xf32>
    %87 = arith.mulf %83, %83 : vector<128x128xf32>
    %cst_33 = arith.constant dense<0.000000e+00> : vector<128xf32>
    %88 = vector.multi_reduction <add>, %87, %cst_33 [1] : vector<128x128xf32> to vector<128xf32>
    %89 = vector.shape_cast %88 : vector<128xf32> to vector<128x1xf32>
    %cst_34 = arith.constant 1.000000e-24 : f32
    %90 = vector.broadcast %cst_34 : f32 to vector<128x1xf32>
    %91 = arith.maximumf %89, %90 : vector<128x1xf32>
    %92 = math.rsqrt %91 : vector<128x1xf32>
    %93 = vector.broadcast %92 : vector<128x1xf32> to vector<128x128xf32>
    %94 = arith.mulf %83, %93 : vector<128x128xf32>
    %95 = arith.mulf %86, %86 : vector<128x128xf32>
    %cst_35 = arith.constant dense<0.000000e+00> : vector<128xf32>
    %96 = vector.multi_reduction <add>, %95, %cst_35 [1] : vector<128x128xf32> to vector<128xf32>
    %97 = vector.shape_cast %96 : vector<128xf32> to vector<128x1xf32>
    %cst_36 = arith.constant 1.000000e-24 : f32
    %98 = vector.broadcast %cst_36 : f32 to vector<128x1xf32>
    %99 = arith.maximumf %97, %98 : vector<128x1xf32>
    %100 = math.rsqrt %99 : vector<128x1xf32>
    %101 = vector.broadcast %100 : vector<128x1xf32> to vector<128x128xf32>
    %102 = arith.mulf %86, %101 : vector<128x128xf32>
    tpu.wait_dma2 semaphore(%arg11 : memref<!tpu.dma_semaphore, #tpu.memory_space<semaphore_mem>>) src(%arg8 : memref<2x128x128xbf16, #tpu.memory_space<any>>) dst(%arg10 : memref<2x128x128xbf16, #tpu.memory_space<vmem>>)
    %c0_37 = arith.constant 0 : index
    %c0_38 = arith.constant 0 : index
    %c0_39 = arith.constant 0 : index
    %103 = vector.load %arg10[%c0_37, %c0_38, %c0_39] : memref<2x128x128xbf16, #tpu.memory_space<vmem>>, vector<1x128x128xbf16>
    %104 = vector.shape_cast %103 : vector<1x128x128xbf16> to vector<128x128xbf16>
    %c1 = arith.constant 1 : index
    %c0_40 = arith.constant 0 : index
    %c0_41 = arith.constant 0 : index
    %105 = vector.load %arg10[%c1, %c0_40, %c0_41] : memref<2x128x128xbf16, #tpu.memory_space<vmem>>, vector<1x128x128xbf16>
    %106 = vector.shape_cast %105 : vector<1x128x128xbf16> to vector<128x128xbf16>
    %107 = arith.truncf %102 : vector<128x128xf32> to vector<128x128xbf16>
    %cst_42 = arith.constant dense<0.000000e+00> : vector<128x128xf32>
    %108 = tpu.matmul %107, %104, %cst_42 {dimension_numbers = #tpu.dot_dimension_numbers<[1], [1], [0], [0], [0, 0, 1, 0], [], []>} : vector<128x128xbf16>, vector<128x128xbf16>, vector<128x128xf32> -> vector<128x128xf32>
    %109 = arith.truncf %94 : vector<128x128xf32> to vector<128x128xbf16>
    %cst_43 = arith.constant dense<0.000000e+00> : vector<128x128xf32>
    %110 = tpu.matmul %109, %106, %cst_43 {dimension_numbers = #tpu.dot_dimension_numbers<[1], [1], [0], [0], [0, 0, 1, 0], [], []>} : vector<128x128xbf16>, vector<128x128xbf16>, vector<128x128xf32> -> vector<128x128xf32>
    %111 = arith.addf %108, %110 : vector<128x128xf32>
    %c0_44 = arith.constant 0 : index
    %c0_45 = arith.constant 0 : index
    %112 = vector.load %arg7[%c0_44, %c0_45] : memref<1x128xf32, #tpu.memory_space<vmem>>, vector<1x128xf32>
    %113 = vector.broadcast %112 : vector<1x128xf32> to vector<128x128xf32>
    %114 = arith.addf %111, %113 : vector<128x128xf32>
    %cst_46 = arith.constant dense<0xFF800000> : vector<128xf32>
    %115 = vector.multi_reduction <maximumf>, %114, %cst_46 [1] : vector<128x128xf32> to vector<128xf32>
    %116 = vector.shape_cast %115 : vector<128xf32> to vector<128x1xf32>
    %117 = vector.broadcast %116 : vector<128x1xf32> to vector<128x128xf32>
    %118 = arith.subf %114, %117 : vector<128x128xf32>
    %119 = math.exp %118 : vector<128x128xf32>
    %cst_47 = arith.constant dense<0.000000e+00> : vector<128xf32>
    %120 = vector.multi_reduction <add>, %119, %cst_47 [1] : vector<128x128xf32> to vector<128xf32>
    %121 = vector.shape_cast %120 : vector<128xf32> to vector<128x1xf32>
    %122 = math.log %121 : vector<128x1xf32>
    %123 = vector.broadcast %122 : vector<128x1xf32> to vector<128x128xf32>
    %124 = arith.subf %118, %123 : vector<128x128xf32>
    %c0_48 = arith.constant 0 : index
    %c0_49 = arith.constant 0 : index
    %125 = vector.load %arg9[%c0_48, %c0_49] : memref<128x128xf32, #tpu.memory_space<vmem>>, vector<128x128xf32>
    tpu.vector_store %arg9[%c0_48, %c0_49], %124 {strides = array<i32>} : memref<128x128xf32, #tpu.memory_space<vmem>>, vector<128x128xf32>,
    return
  }
}

</mosaic_0001>

<bundles_post_ra>
// kernel: tpu_custom_call.1
= control target key start
LH: loop header
LB: loop body
LE: loop exit
PB: predicated region body
PF: predicated region fallthrough
CT: control target
= control target key end

     0   :  { %14 = vsyncpa [#allocation5], 0  ;;  %s5773_s0 = inlined_call_operand.hbm [shape: f32[128,128], index: 0, kind: input, shape index: {}]   ;;  %s5774_s1 = inlined_call_operand.hbm [shape: f32[128,128], index: 1, kind: input, shape index: {}]   ;;  %s5775_s2 = inlined_call_operand.hbm [shape: f32[128,128], index: 2, kind: input, shape index: {}]   ;;  %s5776_s3 = inlined_call_operand.hbm [shape: f32[128,128], index: 3, kind: input, shape index: {}]   ;;  %s5777_s4 = inlined_call_operand.hbm [shape: f32[128,128], index: 4, kind: input, shape index: {}]   ;;  %s5778_s5 = inlined_call_operand.hbm [shape: f32[128,128], index: 5, kind: input, shape index: {}]   ;;  %s5779_s6 = inlined_call_operand.hbm [shape: bf16[128,128], index: 6, kind: input, shape index: {}]   ;;  %s5780_s7 = inlined_call_operand.vmem [shape: f32[1,128], index: 7, kind: input, shape index: {}]   ;;  %s5781_s8 = inlined_call_operand.hbm [shape: bf16[2,128,128], index: 8, kind: input, shape index: {}]   ;;  %s5782_s9 = inlined_call_operand.hbm [shape: f32[128,128], index: 9, kind: output, shape index: {}]  }
   0x1   :  { %15 = vsyncpa [#allocation8], 0 }
   0x2   :  { %16 = vsyncpa [#allocation11], 0 }
   0x3   :  { %17 = vsyncpa [#allocation14], 0 }
   0x4   :  { %18 = vsyncpa [#allocation6], 0  ;;  %s4080_s30 = smov [#allocation7]   ;;  %s4081_s11 = smov [#allocation10]  }
   0x5   :  { %s36_s10 = sshll.u32 %s4080_s30, 4  ;;  %s60_s12 = sshll.u32 %s4081_s11, 4  ;;  %s37_s10 = int_to_ptr.vmem [resolvable:$true] %s36_s10  ;;  %s4144_s12 = int_to_ptr.vmem [resolvable:$true] %s60_s12 }
   0x6   :  { %s3870_s15 = scalar_lea.hbm %s5774_s1, 2048 }
   0x7   :  { %p3871_p0 = scmp.ne.s32.totalorder %s5774_s1, %s3870_s15  ;;  %p3874_p1 = scmp.lt.u32.totalorder %s3870_s15, %s5774_s1 }
   0x9   :  { %p3876_p2 = pnand %p3874_p1, %p3871_p0 }
   0xb   :  { %3879 = shalt.err (!%p3876_p2)
}
   0xc   :  { %s3880_s20 = scalar_lea.vmem %s37_s10, 2048  ;;  %p3885_p4 = scmp.lt.s32.totalorder %s37_s10, %s37_s10 }
   0xd   :  { %p3881_p3 = scmp.ne.s32.totalorder %s37_s10, %s3880_s20  ;;  %p3886_p5 = scmp.lt.s32.totalorder %s3880_s20, %s3880_s20 }
   0xf   :  { %p3887_p6 = por %p3886_p5, %p3885_p4 }
  0x11   :  { %p3888_p7 = pnand %p3887_p6, %p3881_p3 }
  0x13   :  { %3891 = shalt.err (!%p3888_p7)
}
  0x14   :  { %s4082_s21 = smov 128   ;;  %s4083_s22 = smov 8  }
  0x15   :  { %42 = dma.hbm_to_vmem [thread:$0]  %s5774_s1, 2048, %s37_s10, [#allocation8], %s4082_s21, %s4082_s21, %s4083_s22  }
  0x16   :  { %s3892_s27 = scalar_lea.hbm %s5776_s3, 2048 }
  0x17   :  { %p3893_p8 = scmp.ne.s32.totalorder %s5776_s3, %s3892_s27  ;;  %p3896_p9 = scmp.lt.u32.totalorder %s3892_s27, %s5776_s3 }
  0x19   :  { %p3898_p10 = pnand %p3896_p9, %p3893_p8 }
  0x1b   :  { %3901 = shalt.err (!%p3898_p10)
}
  0x1c   :  { %s3902_s13 = scalar_lea.vmem %s4144_s12, 2048  ;;  %p3907_p12 = scmp.lt.s32.totalorder %s4144_s12, %s4144_s12 }
  0x1d   :  { %p3903_p11 = scmp.ne.s32.totalorder %s4144_s12, %s3902_s13  ;;  %p3908_p13 = scmp.lt.s32.totalorder %s3902_s13, %s3902_s13 }
  0x1f   :  { %p3909_p0 = por %p3908_p13, %p3907_p12 }
  0x21   :  { %p3910_p1 = pnand %p3909_p0, %p3903_p11 }
  0x23   :  { %3913 = shalt.err (!%p3910_p1)
}
  0x24   :  { %66 = dma.hbm_to_vmem [thread:$0]  %s5776_s3, 2048, %s4144_s12, [#allocation11], %s4082_s21, %s4082_s21, %s4083_s22  }
  0x25   :  { %s4084_s14 = smov [#allocation13]   ;;  %s4085_s16 = smov [#allocation4]  }
  0x26   :  { %s84_s15 = sshll.u32 %s4084_s14, 4  ;;  %s24_s17 = sshll.u32 %s4085_s16, 4  ;;  %s85_s15 = int_to_ptr.vmem [resolvable:$true] %s84_s15  ;;  %s4181_s17 = int_to_ptr.vmem [resolvable:$true] %s24_s17 }
  0x27   :  { %s3914_s20 = scalar_lea.hbm %s5778_s5, 2048 }
  0x28   :  { %p3915_p2 = scmp.ne.s32.totalorder %s5778_s5, %s3914_s20  ;;  %p3918_p3 = scmp.lt.u32.totalorder %s3914_s20, %s5778_s5 }
  0x2a   :  { %p3920_p4 = pnand %p3918_p3, %p3915_p2 }
  0x2c   :  { %3923 = shalt.err (!%p3920_p4)
}
  0x2d   :  { %s3924_s3 = scalar_lea.vmem %s85_s15, 2048  ;;  %p3929_p6 = scmp.lt.s32.totalorder %s85_s15, %s85_s15 }
  0x2e   :  { %p3925_p5 = scmp.ne.s32.totalorder %s85_s15, %s3924_s3  ;;  %p3930_p7 = scmp.lt.s32.totalorder %s3924_s3, %s3924_s3 }
  0x30   :  { %p3931_p8 = por %p3930_p7, %p3929_p6 }
  0x32   :  { %p3932_p9 = pnand %p3931_p8, %p3925_p5 }
  0x34   :  { %3935 = shalt.err (!%p3932_p9)
}
  0x35   :  { %90 = dma.hbm_to_vmem [thread:$0]  %s5778_s5, 2048, %s85_s15, [#allocation14], %s4082_s21, %s4082_s21, %s4083_s22  }
  0x36   :  { %s3936_s30 = scalar_lea.hbm %s5773_s0, 2048 }
  0x37   :  { %p3937_p10 = scmp.ne.s32.totalorder %s5773_s0, %s3936_s30  ;;  %p3940_p11 = scmp.lt.u32.totalorder %s3936_s30, %s5773_s0 }
  0x39   :  { %p3942_p12 = pnand %p3940_p11, %p3937_p10 }
  0x3b   :  { %3945 = shalt.err (!%p3942_p12)
}
  0x3c   :  { %s3946_s14 = scalar_lea.vmem %s4181_s17, 2048  ;;  %p3951_p0 = scmp.lt.s32.totalorder %s4181_s17, %s4181_s17 }
  0x3d   :  { %p3947_p13 = scmp.ne.s32.totalorder %s4181_s17, %s3946_s14  ;;  %p3952_p1 = scmp.lt.s32.totalorder %s3946_s14, %s3946_s14 }
  0x3f   :  { %p3953_p2 = por %p3952_p1, %p3951_p0 }
  0x41   :  { %p3954_p3 = pnand %p3953_p2, %p3947_p13 }
  0x43   :  { %3957 = shalt.err (!%p3954_p3)
}
  0x44   :  { %30 = dma.hbm_to_vmem [thread:$0]  %s5773_s0, 2048, %s4181_s17, [#allocation5], %s4082_s21, %s4082_s21, %s4083_s22  }
  0x45   :  { %s4086_s16 = smov [#allocation9]   ;;  %s4087_s19 = smov [#allocation12]  }
  0x46   :  { %s48_s18 = sshll.u32 %s4086_s16, 4  ;;  %s72_s20 = sshll.u32 %s4087_s19, 4  ;;  %s49_s18 = int_to_ptr.vmem [resolvable:$true] %s48_s18  ;;  %s4218_s20 = int_to_ptr.vmem [resolvable:$true] %s72_s20 }
  0x47   :  { %s3958_s25 = scalar_lea.hbm %s5775_s2, 2048 }
  0x48   :  { %p3959_p4 = scmp.ne.s32.totalorder %s5775_s2, %s3958_s25  ;;  %p3962_p5 = scmp.lt.u32.totalorder %s3958_s25, %s5775_s2 }
  0x4a   :  { %p3964_p6 = pnand %p3962_p5, %p3959_p4 }
  0x4c   :  { %3967 = shalt.err (!%p3964_p6)
}
  0x4d   :  { %s3968_s0 = scalar_lea.vmem %s49_s18, 2048  ;;  %p3973_p8 = scmp.lt.s32.totalorder %s49_s18, %s49_s18 }
  0x4e   :  { %p3969_p7 = scmp.ne.s32.totalorder %s49_s18, %s3968_s0  ;;  %p3974_p9 = scmp.lt.s32.totalorder %s3968_s0, %s3968_s0 }
  0x50   :  { %p3975_p10 = por %p3974_p9, %p3973_p8 }
  0x52   :  { %p3976_p11 = pnand %p3975_p10, %p3969_p7 }
  0x54   :  { %3979 = shalt.err (!%p3976_p11)
}
  0x55   :  { %54 = dma.hbm_to_vmem [thread:$0]  %s5775_s2, 2048, %s49_s18, [#allocation8], %s4082_s21, %s4082_s21, %s4083_s22  }
  0x56   :  { %s3980_s11 = scalar_lea.hbm %s5777_s4, 2048 }
  0x57   :  { %p3981_p12 = scmp.ne.s32.totalorder %s5777_s4, %s3980_s11  ;;  %p3984_p13 = scmp.lt.u32.totalorder %s3980_s11, %s5777_s4 }
  0x59   :  { %p3986_p0 = pnand %p3984_p13, %p3981_p12 }
  0x5b   :  { %3989 = shalt.err (!%p3986_p0)
}
  0x5c   :  { %s3990_s5 = scalar_lea.vmem %s4218_s20, 2048  ;;  %p3995_p2 = scmp.lt.s32.totalorder %s4218_s20, %s4218_s20 }
  0x5d   :  { %p3991_p1 = scmp.ne.s32.totalorder %s4218_s20, %s3990_s5  ;;  %p3996_p3 = scmp.lt.s32.totalorder %s3990_s5, %s3990_s5 }
  0x5f   :  { %p3997_p4 = por %p3996_p3, %p3995_p2 }
  0x61   :  { %p3998_p5 = pnand %p3997_p4, %p3991_p1 }
  0x63   :  { %4001 = shalt.err (!%p3998_p5)
}
  0x64   :  { %78 = dma.hbm_to_vmem [thread:$0]  %s5777_s4, 2048, %s4218_s20, [#allocation11], %s4082_s21, %s4082_s21, %s4083_s22  }
  0x65   :  { %s4088_s16 = smov [#allocation15]   ;;  %s4002_s24 = scalar_lea.hbm %s5779_s6, 1024 }
  0x66   :  { %s96_s18 = sshll.u32 %s4088_s16, 4  ;;  %p4003_p6 = scmp.ne.s32.totalorder %s5779_s6, %s4002_s24  ;;  %s97_s18 = int_to_ptr.vmem [resolvable:$true] %s96_s18 }
  0x67   :  { %p4006_p7 = scmp.lt.u32.totalorder %s4002_s24, %s5779_s6 }
  0x69   :  { %p4008_p8 = pnand %p4006_p7, %p4003_p6 }
  0x6b   :  { %4011 = shalt.err (!%p4008_p8)
}
  0x6c   :  { %s4012_s27 = scalar_lea.vmem %s97_s18, 1024  ;;  %p4017_p10 = scmp.lt.s32.totalorder %s97_s18, %s97_s18 }
  0x6d   :  { %p4013_p9 = scmp.ne.s32.totalorder %s97_s18, %s4012_s27  ;;  %p4018_p11 = scmp.lt.s32.totalorder %s4012_s27, %s4012_s27 }
  0x6f   :  { %p4019_p12 = por %p4018_p11, %p4017_p10 }
  0x71   :  { %p4020_p13 = pnand %p4019_p12, %p4013_p9 }
  0x73   :  { %4023 = shalt.err (!%p4020_p13)
}
  0x74   :  { %s4089_s4 = smov 64   ;;  %s4090_s20 = smov 4  }
  0x75   :  { %102 = dma.hbm_to_vmem [thread:$0]  %s5779_s6, 1024, %s97_s18, [#allocation14], %s4089_s4, %s4089_s4, %s4090_s20  }
  0x76   :  { %4068 = dma.done.wait [#allocation5], 2048  }
  0x77   :  { %4069 = vsyncadd [#allocation5], 4294965248 }
  0x78   :  { %4070 = dma.done.wait [#allocation8], 4096  }
  0x79   :  { %4071 = vsyncadd [#allocation8], 4294963200 }
  0x7a   :  { %4072 = dma.done.wait [#allocation11], 4096  }
  0x7b   :  { %4073 = vsyncadd [#allocation11], 4294963200 }
  0x7c   :  { %4074 = dma.done.wait [#allocation14], 3072  }
  0x7d   :  { %4075 = vsyncadd [#allocation14], 4294964224  ;;  %v4267_v0 = vld [vmem:[#allocation4] sm:$0xff]  ;;  %v4269_v1 = vld [vmem:[#allocation4 + $0x8] sm:$0xff]  ;;  %s4092_s6 = smov [#allocation2]   ;;  %s4024_s11 = scalar_lea.hbm %s5781_s8, 2048 }
  0x7e   :  { %v4271_v2 = vld [vmem:[#allocation4 + $0x10] sm:$0xff]  ;;  %v318_v3 = vpack.c.bf16 %v4269_v1, %v4267_v0  ;;  %v4275_v4 = vld [vmem:[#allocation4 + $0x18] sm:$0xff]  ;;  %v142_v6 = vld [vmem:[#allocation4 + $0x20] sm:$0xff]  ;;  %s134_s28 = sshll.u32 %s4092_s6, 4  ;;  %p4025_p0 = scmp.ne.s32.totalorder %s5781_s8, %s4024_s11  ;;  %s135_s28 = int_to_ptr.vmem [resolvable:$true] %s134_s28 }
  0x7f   :  { %v319_v5 = vpack.c.bf16 %v4275_v4, %v4271_v2  ;;  %v143_v7 = vld [vmem:[#allocation4 + $0x28] sm:$0xff]  ;;  %v4279_v9 = vld [vmem:[#allocation4 + $0x30] sm:$0xff]  ;;  %v4281_v10 = vld [vmem:[#allocation4 + $0x38] sm:$0xff]  ;;  %p4028_p1 = scmp.lt.u32.totalorder %s4024_s11, %s5781_s8 }
  0x80   :  { %3054 = vmatprep.subr.bf16.mxu1 %v318_v3  ;;  %3070 = vmatprep.mubr.bf16.mxu1 %v318_v3  ;;  %v320_v8 = vpack.c.bf16 %v143_v7, %v142_v6  ;;  %v321_v11 = vpack.c.bf16 %v4281_v10, %v4279_v9  ;;  %v146_v12 = vld [vmem:[#allocation4 + $0x40] sm:$0xff]  ;;  %v147_v13 = vld [vmem:[#allocation4 + $0x48] sm:$0xff]  ;;  %v148_v15 = vld [vmem:[#allocation4 + $0x50] sm:$0xff] }
  0x81   :  { %3055 = vmatpush3.bf16.xpose.msra.mxu1 %v318_v3  ;;  %v322_v14 = vpack.c.bf16 %v147_v13, %v146_v12  ;;  %v149_v16 = vld [vmem:[#allocation4 + $0x58] sm:$0xff]  ;;  %v150_v18 = vld [vmem:[#allocation4 + $0x60] sm:$0xff]  ;;  %v151_v19 = vld [vmem:[#allocation4 + $0x68] sm:$0xff]  ;;  %p4030_p2 = pnand %p4028_p1, %p4025_p0 }
  0x82   :  { %3056 = vmatprep.subr.bf16.mxu1 %v319_v5  ;;  %v323_v17 = vpack.c.bf16 %v149_v16, %v148_v15  ;;  %v324_v20 = vpack.c.bf16 %v151_v19, %v150_v18  ;;  %v152_v21 = vld [vmem:[#allocation4 + $0x70] sm:$0xff]  ;;  %v153_v22 = vld [vmem:[#allocation4 + $0x78] sm:$0xff]  ;;  %v154_v26 = vld [vmem:[#allocation9] sm:$0xff] }
  0x83   :  { %v325_v23 = vpack.c.bf16 %v153_v22, %v152_v21  ;;  %v156_v24 = vld [vmem:[#allocation9 + $0x10] sm:$0xff]  ;;  %v157_v27 = vld [vmem:[#allocation9 + $0x18] sm:$0xff]  ;;  %v186_v29 = vld [vmem:[#allocation12] sm:$0xff] }
  0x84   :  { %v188_v25 = vld [vmem:[#allocation12 + $0x10] sm:$0xff]  ;;  %v189_v28 = vld [vmem:[#allocation12 + $0x18] sm:$0xff]  ;;  %v155_v30 = vld [vmem:[#allocation9 + $0x8] sm:$0xff]  ;;  %v4289_v34 = vadd.f32 %v186_v29, %v154_v26 }
  0x85   :  { %v187_v31 = vld [vmem:[#allocation12 + $0x8] sm:$0xff]  ;;  %v4285_v32 = vadd.f32 %v188_v25, %v156_v24  ;;  %v4287_v33 = vadd.f32 %v189_v28, %v157_v27  ;;  %v160_v38 = vld [vmem:[#allocation9 + $0x30] sm:$0xff]  ;;  %v158_v43 = vld [vmem:[#allocation9 + $0x20] sm:$0xff] }
  0x86   :  { %v4291_v35 = vadd.f32 %v187_v31, %v155_v30  ;;  %v192_v39 = vld [vmem:[#allocation12 + $0x30] sm:$0xff]  ;;  %v447_v41 = vadd.f32 1.0, %v4289_v34  ;;  %v161_v44 = vld [vmem:[#allocation9 + $0x38] sm:$0xff]  ;;  %v190_v47 = vld [vmem:[#allocation12 + $0x20] sm:$0xff] }
  0x87   :  { %v449_v36 = vadd.f32 1.0, %v4285_v32  ;;  %v450_v37 = vadd.f32 1.0, %v4287_v33  ;;  %v193_v45 = vld [vmem:[#allocation12 + $0x38] sm:$0xff]  ;;  %v159_v48 = vld [vmem:[#allocation9 + $0x28] sm:$0xff]  ;;  %v4307_v54 = vadd.f32 %v192_v39, %v160_v38  ;;  %v4313_v58 = vadd.f32 %v190_v47, %v158_v43  ;;  %v194_v15 = vld [vmem:[#allocation12 + $0x40] sm:$0xff] }
  0x88   :  { %v448_v42 = vadd.f32 1.0, %v4291_v35  ;;  %v191_v49 = vld [vmem:[#allocation12 + $0x28] sm:$0xff]  ;;  %v4309_v55 = vadd.f32 %v193_v45, %v161_v44  ;;  %v165_v12 = vld [vmem:[#allocation9 + $0x58] sm:$0xff]  ;;  %v198_v47 = vld [vmem:[#allocation12 + $0x60] sm:$0xff] }
  0x89   :  { %3057 = vmatpush3.bf16.xpose.msra.mxu1 %v319_v5  ;;  %v4315_v59 = vadd.f32 %v191_v49, %v159_v48  ;;  %v453_v62 = vadd.f32 1.0, %v4307_v54  ;;  %v451_v7 = vadd.f32 1.0, %v4313_v58  ;;  %v197_v13 = vld [vmem:[#allocation12 + $0x58] sm:$0xff]  ;;  %v163_v16 = vld [vmem:[#allocation9 + $0x48] sm:$0xff] }
  0x8a   :  { %3058 = vmatprep.subr.bf16.mxu1 %v320_v8  ;;  %v454_v63 = vadd.f32 1.0, %v4309_v55  ;;  %v169_v43 = vld [vmem:[#allocation9 + $0x78] sm:$0xff]  ;;  %v167_v48 = vld [vmem:[#allocation9 + $0x68] sm:$0xff] }
  0x8b   :  { %v201_v44 = vld [vmem:[#allocation12 + $0x78] sm:$0xff]  ;;  %v199_v49 = vld [vmem:[#allocation12 + $0x68] sm:$0xff] }
  0x91   :  { %3059 = vmatpush3.bf16.xpose.msra.mxu1 %v320_v8 }
  0x92   :  { %3060 = vmatprep.subr.bf16.mxu1 %v321_v11 }
  0x99   :  { %3061 = vmatpush3.bf16.xpose.msra.mxu1 %v321_v11 }
  0x9a   :  { %3062 = vmatprep.subr.bf16.mxu1 %v322_v14 }
  0xa1   :  { %3063 = vmatpush3.bf16.xpose.msra.mxu1 %v322_v14 }
  0xa2   :  { %3064 = vmatprep.subr.bf16.mxu1 %v323_v17 }
  0xa9   :  { %3065 = vmatpush3.bf16.xpose.msra.mxu1 %v323_v17 }
  0xaa   :  { %3066 = vmatprep.subr.bf16.mxu1 %v324_v20 }
  0xb1   :  { %3067 = vmatpush3.bf16.xpose.msra.mxu1 %v324_v20 }
  0xb2   :  { %3068 = vmatprep.subr.bf16.mxu1 %v325_v23 }
  0xb9   :  { %3069 = vmatpush3.bf16.xpose.msra.mxu1 %v325_v23 }
  0xba   :  { %3086 = vmatprep.subr.bf16.mxu1 %v318_v3 }
  0xc0   :  { %3071 = vmatmul.mubr.bf16.vlgmr.msra.gmra.mrb[0].mxu1 %v319_v5 }
  0xc1   :  { %3074 = vmatprep.mubr.bf16.mxu1 %v320_v8  ;;  %3087 = vmatpush3.bf16.msra.mxu1 %v318_v3  ;;  %v164_v3 = vld [vmem:[#allocation9 + $0x50] sm:$0xff] }
  0xc2   :  { %3088 = vmatprep.subr.bf16.mxu1 %v319_v5 }
  0xc5   :  { %3089 = vmatpush3.bf16.msra.mxu1 %v319_v5  ;;  %v196_v5 = vld [vmem:[#allocation12 + $0x50] sm:$0xff] }
  0xc6   :  { %3090 = vmatprep.subr.bf16.mxu1 %v320_v8  ;;  %v4331_v22 = vadd.f32 %v196_v5, %v164_v3  ;;  %v4363_v5 = vadd.f32 %v199_v49, %v167_v48 }
  0xc8   :  { %3075 = vmatmul.mubr.bf16.gmra.mrb[4].mxu1 %v321_v11  ;;  %v457_v30 = vadd.f32 1.0, %v4331_v22 }
  0xc9   :  { %3078 = vmatprep.mubr.bf16.mxu1 %v322_v14  ;;  %3091 = vmatpush3.bf16.msra.mxu1 %v320_v8  ;;  %v452_v8 = vadd.f32 1.0, %v4315_v59 }
  0xca   :  { %3092 = vmatprep.subr.bf16.mxu1 %v321_v11 }
  0xcd   :  { %3093 = vmatpush3.bf16.msra.mxu1 %v321_v11  ;;  %v162_v11 = vld [vmem:[#allocation9 + $0x40] sm:$0xff] }
  0xce   :  { %3094 = vmatprep.subr.bf16.mxu1 %v322_v14  ;;  %v4337_v26 = vadd.f32 %v194_v15, %v162_v11 }
  0xd0   :  { %3079 = vmatmul.mubr.bf16.gmra.mrb[8].mxu1 %v323_v17  ;;  %v455_v39 = vadd.f32 1.0, %v4337_v26 }
  0xd1   :  { %3082 = vmatprep.mubr.bf16.mxu1 %v324_v20  ;;  %3095 = vmatpush3.bf16.msra.mxu1 %v322_v14 }
  0xd2   :  { %3096 = vmatprep.subr.bf16.mxu1 %v323_v17 }
  0xd5   :  { %3097 = vmatpush3.bf16.msra.mxu1 %v323_v17  ;;  %v195_v17 = vld [vmem:[#allocation12 + $0x48] sm:$0xff] }
  0xd6   :  { %3098 = vmatprep.subr.bf16.mxu1 %v324_v20  ;;  %v4339_v27 = vadd.f32 %v195_v17, %v163_v16  ;;  %v460_v16 = vadd.f32 1.0, %v4363_v5 }
  0xd8   :  { %3083 = vmatmul.mubr.bf16.gmra.mrb[12].mxu1 %v325_v23 }
  0xd9   :  { %3099 = vmatpush3.bf16.msra.mxu1 %v324_v20 }
  0xda   :  { %3100 = vmatprep.subr.bf16.mxu1 %v325_v23 }
  0xdd   :  { %3101 = vmatpush3.bf16.msra.mxu1 %v325_v23  ;;  %v4333_v23 = vadd.f32 %v197_v13, %v165_v12 }
  0xdf   :  { %v458_v31 = vadd.f32 1.0, %v4333_v23 }
 0x193   :  { %v4295_v40 = vpop.f32.mrb[0].mxu1 }
 0x194   :  { %v4299_v46 = vpop.f32.mrb[1].mxu1  ;;  %v465_v51 = vsub.f32 %v449_v36, %v4295_v40  ;;  %v168_v36 = vld [vmem:[#allocation9 + $0x70] sm:$0xff] }
 0x195   :  { %v4301_v50 = vpop.f32.mrb[2].mxu1  ;;  %v463_v56 = vsub.f32 %v447_v41, %v4299_v46  ;;  %v456_v41 = vadd.f32 1.0, %v4339_v27 }
 0x196   :  { %5849 = vst [vmem:[#allocation27_spill] sm:$0xff] %v4301_v50  ;;  %v466_v52 = vsub.f32 %v450_v37, %v4301_v50  ;;  %v4305_v53 = vpop.f32.mrb[3].mxu1  ;;  %v200_v37 = vld [vmem:[#allocation12 + $0x70] sm:$0xff] }
 0x197   :  { %5850 = vst [vmem:[#allocation28_spill] sm:$0xff] %v4305_v53  ;;  %v464_v57 = vsub.f32 %v448_v42, %v4305_v53  ;;  %v166_v42 = vld [vmem:[#allocation9 + $0x60] sm:$0xff] }
 0x198   :  { %v480_v60 = vpack.c.bf16 %v466_v52, %v465_v51  ;;  %v4361_v3 = vadd.f32 %v198_v47, %v166_v42  ;;  %v4397_v47 = vld [vmem:[#allocation7 + $0x18] sm:$0xff] }
 0x199   :  { %v479_v61 = vpack.c.bf16 %v464_v57, %v463_v56 }
 0x19a   :  { %v459_v15 = vadd.f32 1.0, %v4361_v3 }
 0x19b   :  { %v4319_v6 = vpop.f32.mrb[4].mxu1  ;;  %3102 = vmatprep.mubr.bf16.mxu1 %v479_v61  ;;  %v4357_v61 = vadd.f32 %v201_v44, %v169_v43  ;;  %v4395_v44 = vld [vmem:[#allocation7 + $0x10] sm:$0xff] }
 0x19c   :  { %5851 = vst [vmem:[#allocation29_spill] sm:$0xff] %v4319_v6  ;;  %v4323_v14 = vpop.f32.mrb[5].mxu1  ;;  %3103 = vmatmul.mubr.bf16.vlgmr.msra.gmra.mrb[16].mxu1 %v480_v60  ;;  %v469_v19 = vsub.f32 %v453_v62, %v4319_v6  ;;  %v4355_v60 = vadd.f32 %v200_v37, %v168_v36  ;;  %v3492_v36 = vld [vmem:[#allocation15] sm:$0xff]   ;;  %v4401_v48 = vpack.c.bf16 %v4397_v47, %v4395_v44 }
 0x19d   :  { %5852 = vst [vmem:[#allocation30_spill] sm:$0xff] %v4323_v14  ;;  %v4325_v18 = vpop.f32.mrb[6].mxu1  ;;  %v467_v24 = vsub.f32 %v451_v7, %v4323_v14  ;;  %v462_v12 = vadd.f32 1.0, %v4357_v61  ;;  %v4381_v37 = vld [vmem:[#allocation7] sm:$0xff]  ;;  %v1004_v49 = vmul.f32 %v4395_v44, %v4395_v44 }
 0x19e   :  { %5853 = vst [vmem:[#allocation31_spill] sm:$0xff] %v4325_v18  ;;  %v470_v20 = vsub.f32 %v454_v63, %v4325_v18  ;;  %v4329_v21 = vpop.f32.mrb[7].mxu1  ;;  %v461_v11 = vadd.f32 1.0, %v4355_v60  ;;  %v1002_v42 = vmul.f32 %v4381_v37, %v4381_v37 }
 0x19f   :  { %5854 = vst [vmem:[#allocation32_spill] sm:$0xff] %v4329_v21  ;;  %v468_v25 = vsub.f32 %v452_v8, %v4329_v21  ;;  %1022 = vadd.xlane.f32.xlu1 %v1004_v49 }
 0x1a0   :  { %v482_v28 = vpack.c.bf16 %v470_v20, %v469_v19  ;;  %1018 = vadd.xlane.f32.xlu0 %v1002_v42  ;;  %v4453_v42 = vld [vmem:[#allocation7 + $0x58] sm:$0xff] }
 0x1a1   :  { %v481_v29 = vpack.c.bf16 %v468_v25, %v467_v24 }
 0x1a3   :  { %v4343_v38 = vpop.f32.mrb[8].mxu1  ;;  %3106 = vmatprep.mubr.bf16.mxu1 %v481_v29 }
 0x1a4   :  { %5855 = vst [vmem:[#allocation33_spill] sm:$0xff] %v4343_v38  ;;  %v4347_v45 = vpop.f32.mrb[9].mxu1  ;;  %3107 = vmatmul.mubr.bf16.gmra.mrb[20].mxu1 %v482_v28  ;;  %v473_v52 = vsub.f32 %v457_v30, %v4343_v38 }
 0x1a5   :  { %5856 = vst [vmem:[#allocation34_spill] sm:$0xff] %v4347_v45  ;;  %v4349_v51 = vpop.f32.mrb[10].mxu1  ;;  %v471_v62 = vsub.f32 %v455_v39, %v4347_v45  ;;  %v4383_v39 = vld [vmem:[#allocation7 + $0x8] sm:$0xff] }
 0x1a6   :  { %5857 = vst [vmem:[#allocation35_spill] sm:$0xff] %v4349_v51  ;;  %v474_v56 = vsub.f32 %v458_v31, %v4349_v51  ;;  %v4353_v57 = vpop.f32.mrb[11].mxu1  ;;  %v1003_v43 = vmul.f32 %v4383_v39, %v4383_v39 }
 0x1a7   :  { %5858 = vst [vmem:[#allocation36_spill] sm:$0xff] %v4353_v57  ;;  %v472_v63 = vsub.f32 %v456_v41, %v4353_v57  ;;  %v4387_v41 = vpack.c.bf16 %v4383_v39, %v4381_v37 }
 0x1a8   :  { %v484_v7 = vpack.c.bf16 %v474_v56, %v473_v52  ;;  %1020 = vadd.xlane.f32.xlu0 %v1003_v43  ;;  %v4407_v52 = vld [vmem:[#allocation7 + $0x20] sm:$0xff]  ;;  %v4409_v56 = vld [vmem:[#allocation7 + $0x28] sm:$0xff] }
 0x1a9   :  { %v483_v8 = vpack.c.bf16 %v472_v63, %v471_v62  ;;  %3150 = vmatprep.subr.bf16.mxu0 %v4387_v41  ;;  %v4413_v62 = vpack.c.bf16 %v4409_v56, %v4407_v52  ;;  %v1005_v63 = vmul.f32 %v4397_v47, %v4397_v47 }
 0x1aa   :  { %3151 = vmatpush3.bf16.msra.mxu0 %v4387_v41 }
 0x1ab   :  { %v4367_v13 = vpop.f32.mrb[12].mxu1  ;;  %3110 = vmatprep.mubr.bf16.mxu1 %v483_v8  ;;  %3152 = vmatprep.subr.bf16.mxu0 %v4401_v48  ;;  %v1007_v8 = vmul.f32 %v4409_v56, %v4409_v56 }
 0x1ac   :  { %5859 = vst [vmem:[#allocation37_spill] sm:$0xff] %v4367_v13  ;;  %v4371_v17 = vpop.f32.mrb[13].mxu1  ;;  %3111 = vmatmul.mubr.bf16.gmra.mrb[24].mxu1 %v484_v7  ;;  %v477_v20 = vsub.f32 %v461_v11, %v4367_v13  ;;  %1024 = vadd.xlane.f32.xlu1 %v1005_v63  ;;  %v1006_v7 = vmul.f32 %v4407_v52, %v4407_v52  ;;  %v4423_v11 = vld [vmem:[#allocation7 + $0x30] sm:$0xff] }
 0x1ad   :  { %5860 = vst [vmem:[#allocation38_spill] sm:$0xff] %v4371_v17  ;;  %v4373_v19 = vpop.f32.mrb[14].mxu1  ;;  %v475_v28 = vsub.f32 %v459_v15, %v4371_v17  ;;  %v1013_v63 = vmul.f32 %v4453_v42, %v4453_v42 }
 0x1ae   :  { %5861 = vst [vmem:[#allocation39_spill] sm:$0xff] %v4373_v19  ;;  %v478_v24 = vsub.f32 %v462_v12, %v4373_v19  ;;  %v4377_v25 = vpop.f32.mrb[15].mxu1  ;;  %3153 = vmatpush3.bf16.msra.mxu0 %v4401_v48  ;;  %v4425_v12 = vld [vmem:[#allocation7 + $0x38] sm:$0xff]  ;;  %1026 = vadd.xlane.f32.xlu0 %v1006_v7  ;;  %v4465_v7 = vld [vmem:[#allocation7 + $0x60] sm:$0xff] }
 0x1af   :  { %5862 = vst [vmem:[#allocation40_spill] sm:$0xff] %v4377_v25  ;;  %v476_v29 = vsub.f32 %v460_v16, %v4377_v25  ;;  %3154 = vmatprep.subr.bf16.mxu0 %v4413_v62  ;;  %v4429_v15 = vpack.c.bf16 %v4425_v12, %v4423_v11  ;;  %v1008_v16 = vmul.f32 %v4423_v11, %v4423_v11  ;;  %v4481_v25 = vld [vmem:[#allocation7 + $0x78] sm:$0xff] }
 0x1b0   :  { %v486_v30 = vpack.c.bf16 %v478_v24, %v477_v20  ;;  %1028 = vadd.xlane.f32.xlu1 %v1007_v8  ;;  %v1009_v20 = vmul.f32 %v4425_v12, %v4425_v12  ;;  %v4437_v24 = vld [vmem:[#allocation7 + $0x40] sm:$0xff]  ;;  %v4467_v8 = vld [vmem:[#allocation7 + $0x68] sm:$0xff] }
 0x1b1   :  { %v485_v31 = vpack.c.bf16 %v476_v29, %v475_v28  ;;  %v4439_v28 = vld [vmem:[#allocation7 + $0x48] sm:$0xff] }
 0x1b2   :  { %3155 = vmatpush3.bf16.msra.mxu0 %v4413_v62  ;;  %v4443_v29 = vpack.c.bf16 %v4439_v28, %v4437_v24  ;;  %1030 = vadd.xlane.f32.xlu0 %v1008_v16  ;;  %v4471_v16 = vpack.c.bf16 %v4467_v8, %v4465_v7 }
 0x1b3   :  { %3114 = vmatprep.mubr.bf16.mxu1 %v485_v31  ;;  %3156 = vmatprep.subr.bf16.mxu0 %v4429_v15  ;;  %v1011_v31 = vmul.f32 %v4439_v28, %v4439_v28 }
 0x1b4   :  { %3115 = vmatmul.mubr.bf16.gmra.mrb[28].mxu1 %v486_v30  ;;  %1032 = vadd.xlane.f32.xlu1 %v1009_v20  ;;  %v1010_v30 = vmul.f32 %v4437_v24, %v4437_v24  ;;  %v1014_v20 = vmul.f32 %v4465_v7, %v4465_v7 }
 0x1b5   :  { %3134 = vmatprep.mubr.bf16.mxu1 %v3492_v36  ;;  %v4451_v36 = vld [vmem:[#allocation7 + $0x50] sm:$0xff] }
 0x1b6   :  { %3157 = vmatpush3.bf16.msra.mxu0 %v4429_v15  ;;  %v4457_v43 = vpack.c.bf16 %v4453_v42, %v4451_v36  ;;  %1034 = vadd.xlane.f32.xlu0 %v1010_v30  ;;  %v1012_v49 = vmul.f32 %v4451_v36, %v4451_v36  ;;  %v1015_v30 = vmul.f32 %v4467_v8, %v4467_v8 }
 0x1b7   :  { %3158 = vmatprep.subr.bf16.mxu0 %v4443_v29 }
 0x1b8   :  { %1036 = vadd.xlane.f32.xlu1 %v1011_v31  ;;  %v4479_v31 = vld [vmem:[#allocation7 + $0x70] sm:$0xff] }
 0x1b9   :  { %v4485_v19 = vpack.c.bf16 %v4481_v25, %v4479_v31 }
 0x1ba   :  { %3159 = vmatpush3.bf16.msra.mxu0 %v4443_v29  ;;  %1038 = vadd.xlane.f32.xlu0 %v1012_v49  ;;  %v1016_v49 = vmul.f32 %v4479_v31, %v4479_v31 }
 0x1bb   :  { %3160 = vmatprep.subr.bf16.mxu0 %v4457_v43 }
 0x1bc   :  { %1040 = vadd.xlane.f32.xlu1 %v1013_v63  ;;  %v1017_v63 = vmul.f32 %v4481_v25, %v4481_v25 }
 0x1be   :  { %3161 = vmatpush3.bf16.msra.mxu0 %v4457_v43  ;;  %1042 = vadd.xlane.f32.xlu0 %v1014_v20 }
 0x1bf   :  { %3162 = vmatprep.subr.bf16.mxu0 %v4471_v16 }
 0x1c0   :  { %1044 = vadd.xlane.f32.xlu1 %v1015_v30 }
 0x1c2   :  { %3163 = vmatpush3.bf16.msra.mxu0 %v4471_v16  ;;  %1046 = vadd.xlane.f32.xlu0 %v1016_v49 }
 0x1c3   :  { %3164 = vmatprep.subr.bf16.mxu0 %v4485_v19 }
 0x1c4   :  { %1048 = vadd.xlane.f32.xlu1 %v1017_v63 }
 0x1c6   :  { %3165 = vmatpush3.bf16.msra.mxu0 %v4485_v19 }
 0x26f   :  { %v3104_v17 = vpop.f32.mrb[16].mxu1 }
 0x270   :  { %v521_v13 = vpop.f32.mrb[17].mxu1 }
 0x271   :  { %v3105_v57 = vpop.f32.mrb[18].mxu1 }
 0x272   :  { %v585_v51 = vpack.c.bf16 %v3105_v57, %v3104_v17  ;;  %v524_v45 = vpop.f32.mrb[19].mxu1 }
 0x273   :  { %v584_v38 = vpack.c.bf16 %v524_v45, %v521_v13 }
 0x275   :  { %3118 = vmatprep.subr.bf16.mxu1 %v584_v38 }
 0x276   :  { %3119 = vmatpush3.bf16.msra.mxu1 %v584_v38 }
 0x277   :  { %v3108_v20 = vpop.f32.mrb[20].mxu1  ;;  %3120 = vmatprep.subr.bf16.mxu1 %v585_v51 }
 0x278   :  { %v537_v30 = vpop.f32.mrb[21].mxu1 }
 0x279   :  { %v3109_v21 = vpop.f32.mrb[22].mxu1 }
 0x27a   :  { %v587_v18 = vpack.c.bf16 %v3109_v21, %v3108_v20  ;;  %v540_v14 = vpop.f32.mrb[23].mxu1  ;;  %3121 = vmatpush3.bf16.msra.mxu1 %v585_v51  ;;  %v3494_v51 = vld [vmem:[#allocation15 + $0x10] sm:$0xff]  }
 0x27b   :  { %v586_v6 = vpack.c.bf16 %v540_v14, %v537_v30  ;;  %v3498_v30 = vld [vmem:[#allocation15 + $0x30] sm:$0xff]  }
 0x27d   :  { %3122 = vmatprep.subr.bf16.mxu1 %v586_v6 }
 0x27e   :  { %3123 = vmatpush3.bf16.msra.mxu1 %v586_v6  ;;  %v3493_v6 = vld [vmem:[#allocation15 + $0x8] sm:$0xff]  }
 0x27f   :  { %v3112_v49 = vpop.f32.mrb[24].mxu1  ;;  %3124 = vmatprep.subr.bf16.mxu1 %v587_v18 }
 0x280   :  { %v553_v63 = vpop.f32.mrb[25].mxu1 }
 0x281   :  { %v3113_v53 = vpop.f32.mrb[26].mxu1 }
 0x282   :  { %v589_v50 = vpack.c.bf16 %v3113_v53, %v3112_v49  ;;  %v556_v57 = vpop.f32.mrb[27].mxu1  ;;  %3125 = vmatpush3.bf16.msra.mxu1 %v587_v18  ;;  %v3495_v53 = vld [vmem:[#allocation15 + $0x18] sm:$0xff]   ;;  %v3496_v18 = vld [vmem:[#allocation15 + $0x20] sm:$0xff]  }
 0x283   :  { %v588_v45 = vpack.c.bf16 %v556_v57, %v553_v63  ;;  %v3499_v49 = vld [vmem:[#allocation15 + $0x38] sm:$0xff]   ;;  %v4498_v63 = vpop.xlane.xlu0 %1018 }
 0x284   :  { %1195 = vxpose.xlu0.b32.start [1/16] (narrow) %v4498_v63, 8 }
 0x285   :  { %3126 = vmatprep.subr.bf16.mxu1 %v588_v45 }
 0x286   :  { %3127 = vmatpush3.bf16.msra.mxu1 %v588_v45 }
 0x287   :  { %v3116_v38 = vpop.f32.mrb[28].mxu1  ;;  %3128 = vmatprep.subr.bf16.mxu1 %v589_v50 }
 0x288   :  { %v569_v13 = vpop.f32.mrb[29].mxu1 }
 0x289   :  { %v3117_v17 = vpop.f32.mrb[30].mxu1 }
 0x28a   :  { %v591_v21 = vpack.c.bf16 %v3117_v17, %v3116_v38  ;;  %v572_v20 = vpop.f32.mrb[31].mxu1  ;;  %3129 = vmatpush3.bf16.msra.mxu1 %v589_v50  ;;  %v3497_v50 = vld [vmem:[#allocation15 + $0x28] sm:$0xff]  }
 0x28b   :  { %v590_v14 = vpack.c.bf16 %v572_v20, %v569_v13 }
 0x28d   :  { %3130 = vmatprep.subr.bf16.mxu1 %v590_v14 }
 0x28e   :  { %3131 = vmatpush3.bf16.msra.mxu1 %v590_v14 }
 0x28f   :  { %3132 = vmatprep.subr.bf16.mxu1 %v591_v21 }
 0x292   :  { %3133 = vmatpush3.bf16.msra.mxu1 %v591_v21 }
 0x293   :  { %3431 = vmatprep.subr.bf16.mxu1 %v4387_v41 }
 0x295   :  { %3135 = vmatmul.mubr.bf16.vlgmr.msra.gmra.mrb[32].mxu1 %v3493_v6 }
 0x296   :  { %3138 = vmatprep.mubr.bf16.mxu1 %v3494_v51 }
 0x29b   :  { %3433 = vmatpush3.bf16.xpose.msra.mxu1 %v4387_v41  ;;  %v4504_v41 = vpop.xlane.xlu0 %1020 }
 0x29c   :  { %3435 = vmatprep.subr.bf16.mxu1 %v4401_v48  ;;  %1196 = vxpose.xlu0.b32.cont [2/16] (narrow) %v4504_v41, 8 }
 0x29d   :  { %3139 = vmatmul.mubr.bf16.gmra.mrb[36].mxu1 %v3495_v53 }
 0x29e   :  { %3142 = vmatprep.mubr.bf16.mxu1 %v3496_v18 }
 0x29f   :  { %v4515_v57 = vpop.xlane.xlu0 %1026 }
 0x2a3   :  { %3437 = vmatpush3.bf16.xpose.msra.mxu1 %v4401_v48  ;;  %v4507_v48 = vpop.xlane.xlu1 %1022 }
 0x2a4   :  { %3439 = vmatprep.subr.bf16.mxu1 %v4413_v62  ;;  %1197 = vxpose.xlu0.b32.cont [3/16] (narrow) %v4507_v48, 8 }
 0x2a5   :  { %3143 = vmatmul.mubr.bf16.gmra.mrb[40].mxu1 %v3497_v50 }
 0x2a6   :  { %3146 = vmatprep.mubr.bf16.mxu1 %v3498_v30 }
 0x2ab   :  { %3441 = vmatpush3.bf16.xpose.msra.mxu1 %v4413_v62  ;;  %v4512_v62 = vpop.xlane.xlu1 %1024 }
 0x2ac   :  { %3443 = vmatprep.subr.bf16.mxu1 %v4429_v15  ;;  %1198 = vxpose.xlu0.b32.cont [4/16] (narrow) %v4512_v62, 8 }
 0x2ad   :  { %3147 = vmatmul.mubr.bf16.gmra.mrb[44].mxu1 %v3499_v49 }
 0x2ae   :  { %3214 = vmatprep.mubr.f32.mxu1 %v4381_v37 }
 0x2af   :  { %v4520_v37 = vpop.xlane.xlu1 %1028 }
 0x2b0   :  { %1199 = vxpose.xlu0.b32.cont [5/16] (narrow) %v4515_v57, 8 }
 0x2b3   :  { %3445 = vmatpush3.bf16.xpose.msra.mxu1 %v4429_v15  ;;  %v4523_v15 = vpop.xlane.xlu0 %1030  ;;  %v4528_v45 = vpop.xlane.xlu1 %1032 }
 0x2b4   :  { %3447 = vmatprep.subr.bf16.mxu1 %v4443_v29  ;;  %1200 = vxpose.xlu0.b32.cont [6/16] (narrow) %v4520_v37, 8 }
 0x2b7   :  { %v4536_v38 = vpop.xlane.xlu1 %1036 }
 0x2b8   :  { %1201 = vxpose.xlu0.b32.cont [7/16] (narrow) %v4523_v15, 8 }
 0x2bb   :  { %3449 = vmatpush3.bf16.xpose.msra.mxu1 %v4443_v29  ;;  %v4531_v29 = vpop.xlane.xlu0 %1034  ;;  %v4543_v13 = vpop.xlane.xlu1 %1040 }
 0x2bc   :  { %3451 = vmatprep.subr.bf16.mxu1 %v4457_v43  ;;  %1202 = vxpose.xlu0.b32.cont [8/16] (narrow) %v4528_v45, 8 }
 0x2bf   :  { %v4551_v17 = vpop.xlane.xlu1 %1044 }
 0x2c0   :  { %1203 = vxpose.xlu0.b32.cont [9/16] (narrow) %v4531_v29, 8 }
 0x2c3   :  { %3453 = vmatpush3.bf16.xpose.msra.mxu1 %v4457_v43  ;;  %v4539_v43 = vpop.xlane.xlu0 %1038 }
 0x2c4   :  { %3455 = vmatprep.subr.bf16.mxu1 %v4471_v16  ;;  %1204 = vxpose.xlu0.b32.cont [10/16] (narrow) %v4536_v38, 8 }
 0x2c8   :  { %1205 = vxpose.xlu0.b32.cont [11/16] (narrow) %v4539_v43, 8 }
 0x2cb   :  { %3457 = vmatpush3.bf16.xpose.msra.mxu1 %v4471_v16  ;;  %v4547_v16 = vpop.xlane.xlu0 %1042 }
 0x2cc   :  { %3459 = vmatprep.subr.bf16.mxu1 %v4485_v19  ;;  %1206 = vxpose.xlu0.b32.cont [12/16] (narrow) %v4543_v13, 8 }
 0x2d0   :  { %1207 = vxpose.xlu0.b32.cont [13/16] (narrow) %v4547_v16, 8 }
 0x2d3   :  { %3461 = vmatpush3.bf16.xpose.msra.mxu1 %v4485_v19  ;;  %v4557_v19 = vpop.xlane.xlu0 %1046 }
 0x2d4   :  { %1208 = vxpose.xlu0.b32.cont [14/16] (narrow) %v4551_v17, 8 }
 0x2d8   :  { %1209 = vxpose.xlu0.b32.cont [15/16] (narrow) %v4557_v19, 8 }
 0x2da   :  { %3215 = vmatmul.mubr.f32.vlgmr.msra.gmra.mrb[48].mxu1 %v4383_v39  ;;  %v4561_v39 = vpop.xlane.xlu1 %1048 }
 0x2db   :  { %3217 = vmatprep.mubr.f32.mxu1 %v4395_v44  ;;  %v881_v44 = vpack.c.bf16 %v4291_v35, %v4289_v34  ;;  %v885_v34 = vpack.c.bf16 %v4339_v27, %v4337_v26  ;;  %v886_v35 = vpack.c.bf16 %v4333_v23, %v4331_v22 }
 0x2dc   :  { %1210 = vxpose.xlu0.b32.end [16/16] (narrow) %v4561_v39, 8 }
 0x2dd   :  { %3166 = vmatprep.mubr.bf16.mxu0 %v881_v44 }
 0x2de   :  { %3218 = vmatmul.mubr.f32.gmra.mrb[50].mxu1 %v4397_v47  ;;  %v882_v47 = vpack.c.bf16 %v4287_v33, %v4285_v32  ;;  %v887_v32 = vpack.c.bf16 %v4363_v5, %v4361_v3  ;;  %v888_v33 = vpack.c.bf16 %v4357_v61, %v4355_v60 }
 0x2df   :  { %3220 = vmatprep.mubr.f32.mxu1 %v4407_v52  ;;  %v883_v52 = vpack.c.bf16 %v4315_v59, %v4313_v58 }
 0x2e0   :  { %3167 = vmatmul.mubr.bf16.vlgmr.msra.gmra.mrb[0].mxu0 %v882_v47 }
 0x2e1   :  { %3170 = vmatprep.mubr.bf16.mxu0 %v883_v52 }
 0x2e2   :  { %3221 = vmatmul.mubr.f32.gmra.mrb[52].mxu1 %v4409_v56  ;;  %v884_v56 = vpack.c.bf16 %v4309_v55, %v4307_v54 }
 0x2e3   :  { %3223 = vmatprep.mubr.f32.mxu1 %v4423_v11 }
 0x2e6   :  { %3224 = vmatmul.mubr.f32.gmra.mrb[54].mxu1 %v4425_v12 }
 0x2e7   :  { %3226 = vmatprep.mubr.f32.mxu1 %v4437_v24 }
 0x2e8   :  { %3171 = vmatmul.mubr.bf16.gmra.mrb[4].mxu0 %v884_v56 }
 0x2e9   :  { %3174 = vmatprep.mubr.bf16.mxu0 %v885_v34 }
 0x2ea   :  { %3227 = vmatmul.mubr.f32.gmra.mrb[56].mxu1 %v4439_v28 }
 0x2eb   :  { %3229 = vmatprep.mubr.f32.mxu1 %v4451_v36 }
 0x2ee   :  { %3230 = vmatmul.mubr.f32.gmra.mrb[58].mxu1 %v4453_v42 }
 0x2ef   :  { %3232 = vmatprep.mubr.f32.mxu1 %v4465_v7  ;;  %v267_v7 = vlaneseq }
 0x2f0   :  { %3175 = vmatmul.mubr.bf16.gmra.mrb[8].mxu0 %v886_v35 }
 0x2f1   :  { %3178 = vmatprep.mubr.bf16.mxu0 %v887_v32  ;;  %v268_v18 = vand.u32 127, %v267_v7 }
 0x2f2   :  { %3233 = vmatmul.mubr.f32.gmra.mrb[60].mxu1 %v4467_v8 }
 0x2f3   :  { %3235 = vmatprep.mubr.f32.mxu1 %v4479_v31  ;;  %vm269_vm0 = vcmp.lt.s32.totalorder %v268_v18, 16 }
 0x2f6   :  { %3236 = vmatmul.mubr.f32.gmra.mrb[62].mxu1 %v4481_v25 }
 0x2f8   :  { %3179 = vmatmul.mubr.bf16.gmra.mrb[12].mxu0 %v888_v33 }
 0x368   :  { %v3136_v58 = vpop.f32.mrb[32].mxu1 }
 0x369   :  { %v2830_v54 = vmul.f32 -1.442695, %v3136_v58  ;;  %v674_v55 = vpop.f32.mrb[33].mxu1 }
 0x36a   :  { %v2828_v59 = vmul.f32 -1.442695, %v674_v55  ;;  %v3137_v25 = vpop.f32.mrb[34].mxu1  ;;  %v4091_v55 = vmov 0.0  }
 0x36b   :  { %3500 = vpow2.f32 %v2830_v54  ;;  %v2831_v26 = vmul.f32 -1.442695, %v3137_v25  ;;  %v677_v27 = vpop.f32.mrb[35].mxu1 }
 0x36c   :  { %3502 = vpow2.f32 %v2828_v59  ;;  %v2829_v22 = vmul.f32 -1.442695, %v677_v27  ;;  %v4590_v59 = vsel %vm269_vm0, 1.0, %v4091_v55 }
 0x36d   :  { %3504 = vpow2.f32 %v2831_v26  ;;  %5863 = vst [vmem:[#allocation41_spill] sm:$0xff] %v4590_v59 }
 0x36e   :  { %3506 = vpow2.f32 %v2829_v22 }
 0x370   :  { %v3140_v23 = vpop.f32.mrb[36].mxu1 }
 0x371   :  { %v2834_v11 = vmul.f32 -1.442695, %v3140_v23  ;;  %v690_v3 = vpop.f32.mrb[37].mxu1 }
 0x372   :  { %v2832_v5 = vmul.f32 -1.442695, %v690_v3  ;;  %v3141_v12 = vpop.f32.mrb[38].mxu1 }
 0x373   :  { %3508 = vpow2.f32 %v2834_v11  ;;  %v2835_v60 = vmul.f32 -1.442695, %v3141_v12  ;;  %v693_v61 = vpop.f32.mrb[39].mxu1 }
 0x374   :  { %3510 = vpow2.f32 %v2832_v5  ;;  %v2833_v24 = vmul.f32 -1.442695, %v693_v61 }
 0x375   :  { %v3501_v28 = vpop.eup %3500  ;;  %3512 = vpow2.f32 %v2835_v60 }
 0x376   :  { %v3503_v36 = vpop.eup %3502  ;;  %v787_v42 = vadd.f32 1.0, %v3501_v28  ;;  %3514 = vpow2.f32 %v2833_v24 }
 0x377   :  { %v3505_v8 = vpop.eup %3504  ;;  %v785_v31 = vadd.f32 1.0, %v3503_v36 }
 0x378   :  { %v3507_v21 = vpop.eup %3506  ;;  %3516 = vrcp.f32 %v787_v42  ;;  %v788_v20 = vadd.f32 1.0, %v3505_v8  ;;  %v3144_v14 = vpop.f32.mrb[40].mxu1 }
 0x379   :  { %3518 = vrcp.f32 %v785_v31  ;;  %v786_v6 = vadd.f32 1.0, %v3507_v21  ;;  %v2838_v51 = vmul.f32 -1.442695, %v3144_v14  ;;  %v706_v53 = vpop.f32.mrb[41].mxu1 }
 0x37a   :  { %3520 = vrcp.f32 %v788_v20  ;;  %v2836_v50 = vmul.f32 -1.442695, %v706_v53  ;;  %v3145_v30 = vpop.f32.mrb[42].mxu1 }
 0x37b   :  { %3522 = vrcp.f32 %v786_v6  ;;  %v2839_v49 = vmul.f32 -1.442695, %v3145_v30  ;;  %v709_v44 = vpop.f32.mrb[43].mxu1 }
 0x37c   :  { %3524 = vpow2.f32 %v2838_v51  ;;  %v2837_v47 = vmul.f32 -1.442695, %v709_v44 }
 0x37d   :  { %v3509_v52 = vpop.eup %3508  ;;  %3526 = vpow2.f32 %v2836_v50 }
 0x37e   :  { %v3511_v56 = vpop.eup %3510  ;;  %v791_v34 = vadd.f32 1.0, %v3509_v52  ;;  %3528 = vpow2.f32 %v2839_v49 }
 0x37f   :  { %v3513_v35 = vpop.eup %3512  ;;  %v789_v32 = vadd.f32 1.0, %v3511_v56  ;;  %3530 = vpow2.f32 %v2837_v47 }
 0x380   :  { %v3515_v33 = vpop.eup %3514  ;;  %3532 = vrcp.f32 %v791_v34  ;;  %v792_v58 = vadd.f32 1.0, %v3513_v35  ;;  %v3148_v54 = vpop.f32.mrb[44].mxu1 }
 0x381   :  { %3534 = vrcp.f32 %v789_v32  ;;  %v790_v25 = vadd.f32 1.0, %v3515_v33  ;;  %v2842_v26 = vmul.f32 -1.442695, %v3148_v54  ;;  %v722_v27 = vpop.f32.mrb[45].mxu1 }
 0x382   :  { %v3517_v22 = vpop.eup %3516  ;;  %3536 = vrcp.f32 %v792_v58  ;;  %v2840_v23 = vmul.f32 -1.442695, %v722_v27  ;;  %v3149_v11 = vpop.f32.mrb[46].mxu1 }
 0x383   :  { %v3519_v3 = vpop.eup %3518  ;;  %v835_v5 = vmul.f32 0.0, %v3517_v22  ;;  %3538 = vrcp.f32 %v790_v25  ;;  %v2843_v12 = vmul.f32 -1.442695, %v3149_v11  ;;  %v725_v60 = vpop.f32.mrb[47].mxu1 }
 0x384   :  { %v3521_v61 = vpop.eup %3520  ;;  %v833_v24 = vmul.f32 %v3519_v3, %v4590_v59  ;;  %3540 = vpow2.f32 %v2842_v26  ;;  %v2841_v28 = vmul.f32 -1.442695, %v725_v60 }
 0x385   :  { %v3523_v36 = vpop.eup %3522  ;;  %v851_v42 = vmul.f32 0.5, %v835_v5  ;;  %v836_v8 = vmul.f32 0.0, %v3521_v61  ;;  %3542 = vpow2.f32 %v2840_v23 }
 0x386   :  { %v3525_v31 = vpop.eup %3524  ;;  %v834_v21 = vmul.f32 0.0, %v3523_v36  ;;  %v849_v20 = vmul.f32 0.5, %v833_v24  ;;  %3544 = vpow2.f32 %v2843_v12  ;;  %v3724_v12 = vld [vmem:[#allocation4 + $0x20] sm:$0xff] }
 0x387   :  { %v3527_v14 = vpop.eup %3526  ;;  %v852_v6 = vmul.f32 0.5, %v836_v8  ;;  %v795_v51 = vadd.f32 1.0, %v3525_v31  ;;  %3546 = vpow2.f32 %v2841_v28  ;;  %v867_v49 = vadd.f32 %v851_v42, %v4271_v2 }
 0x388   :  { %v3529_v53 = vpop.eup %3528  ;;  %v850_v18 = vmul.f32 0.5, %v834_v21  ;;  %v793_v50 = vadd.f32 1.0, %v3527_v14  ;;  %v865_v56 = vadd.f32 %v849_v20, %v4267_v0 }
 0x389   :  { %v3531_v30 = vpop.eup %3530  ;;  %v868_v44 = vadd.f32 %v852_v6, %v4275_v4  ;;  %3548 = vrcp.f32 %v795_v51  ;;  %v796_v47 = vadd.f32 1.0, %v3529_v53 }
 0x38a   :  { %v3533_v52 = vpop.eup %3532  ;;  %v866_v34 = vadd.f32 %v850_v18, %v4269_v1  ;;  %3550 = vrcp.f32 %v793_v50  ;;  %v794_v35 = vadd.f32 1.0, %v3531_v30 }
 0x38b   :  { %v3535_v32 = vpop.eup %3534  ;;  %v4597_v33 = vpack.c.bf16 %v868_v44, %v867_v49  ;;  %v839_v58 = vmul.f32 0.0, %v3533_v52  ;;  %3552 = vrcp.f32 %v796_v47  ;;  %v3726_v47 = vld [vmem:[#allocation4 + $0x50] sm:$0xff] }
 0x38c   :  { %v3537_v54 = vpop.eup %3536  ;;  %v1519_v55 = vpack.c.bf16 %v866_v34, %v865_v56  ;;  %v837_v25 = vmul.f32 0.0, %v3535_v32  ;;  %3554 = vrcp.f32 %v794_v35  ;;  %v3727_v34 = vld [vmem:[#allocation4 + $0x40] sm:$0xff] }
 0x38d   :  { %v3539_v2 = vpop.eup %3538  ;;  %v855_v4 = vmul.f32 0.5, %v839_v58  ;;  %v840_v26 = vmul.f32 0.0, %v3537_v54  ;;  %v3728_v58 = vld [vmem:[#allocation4 + $0x58] sm:$0xff] }
 0x38e   :  { %v3541_v27 = vpop.eup %3540  ;;  %v853_v22 = vmul.f32 0.5, %v837_v25  ;;  %v838_v23 = vmul.f32 0.0, %v3539_v2  ;;  %3238 = vmatprep.subr.bf16.mxu0 %v1519_v55  ;;  %3254 = vmatprep.mubr.bf16.mxu0 %v1519_v55  ;;  %v3729_v25 = vld [vmem:[#allocation4 + $0x48] sm:$0xff] }
 0x38f   :  { %v3543_v0 = vpop.eup %3542  ;;  %v871_v1 = vadd.f32 %v855_v4, %v4279_v9  ;;  %v856_v11 = vmul.f32 0.5, %v840_v26  ;;  %3270 = vmatprep.subr.bf16.mxu1 %v1519_v55  ;;  %3239 = vmatpush3.bf16.xpose.msra.mxu0 %v1519_v55  ;;  %v799_v3 = vadd.f32 1.0, %v3541_v27  ;;  %v3725_v9 = vld [vmem:[#allocation4 + $0x28] sm:$0xff] }
 0x390   :  { %v3545_v5 = vpop.eup %3544  ;;  %v869_v60 = vadd.f32 %v3724_v12, %v853_v22  ;;  %v854_v61 = vmul.f32 0.5, %v838_v23  ;;  %3271 = vmatpush3.bf16.msra.mxu1 %v1519_v55  ;;  %3240 = vmatprep.subr.bf16.mxu0 %v4597_v33  ;;  %v797_v24 = vadd.f32 1.0, %v3543_v0 }
 0x391   :  { %v3547_v28 = vpop.eup %3546  ;;  %v872_v36 = vadd.f32 %v856_v11, %v4281_v10  ;;  %3556 = vrcp.f32 %v799_v3  ;;  %3272 = vmatprep.subr.bf16.mxu1 %v4597_v33  ;;  %v800_v42 = vadd.f32 1.0, %v3545_v5 }
 0x392   :  { %v870_v8 = vadd.f32 %v3725_v9, %v854_v61  ;;  %3558 = vrcp.f32 %v797_v24  ;;  %v798_v31 = vadd.f32 1.0, %v3547_v28  ;;  %v3730_v61 = vld [vmem:[#allocation4 + $0x70] sm:$0xff] }
 0x393   :  { %v3549_v21 = vpop.eup %3548  ;;  %v4603_v20 = vpack.c.bf16 %v872_v36, %v871_v1  ;;  %3560 = vrcp.f32 %v800_v42  ;;  %v3731_v36 = vld [vmem:[#allocation4 + $0x60] sm:$0xff] }
 0x394   :  { %v3551_v14 = vpop.eup %3550  ;;  %v4605_v6 = vpack.c.bf16 %v870_v8, %v869_v60  ;;  %v843_v51 = vmul.f32 0.0, %v3549_v21  ;;  %3562 = vrcp.f32 %v798_v31  ;;  %3273 = vmatpush3.bf16.msra.mxu1 %v4597_v33  ;;  %v1228_v60 = vshrl.u32 %v267_v7, 7  ;;  %v3732_v8 = vld [vmem:[#allocation4 + $0x78] sm:$0xff]  ;;  %v3733_v21 = vld [vmem:[#allocation4 + $0x68] sm:$0xff] }
 0x395   :  { %v3553_v10 = vpop.eup %3552  ;;  %v841_v53 = vmul.f32 0.0, %v3551_v14 }
 0x396   :  { %v3555_v18 = vpop.eup %3554  ;;  %v859_v50 = vmul.f32 0.5, %v843_v51  ;;  %v844_v30 = vmul.f32 0.0, %v3553_v10  ;;  %3274 = vmatprep.subr.bf16.mxu1 %v4605_v6  ;;  %v1229_v51 = vsub.s32 0, %v1228_v60 }
 0x397   :  { %v857_v49 = vmul.f32 0.5, %v841_v53  ;;  %v842_v44 = vmul.f32 0.0, %v3555_v18  ;;  %3241 = vmatpush3.bf16.xpose.msra.mxu0 %v4597_v33  ;;  %v1211_v53 = vpop.trf.xlu0 }
 0x398   :  { %v875_v52 = vadd.f32 %v3726_v47, %v859_v50  ;;  %v860_v56 = vmul.f32 0.5, %v844_v30  ;;  %3275 = vmatpush3.bf16.msra.mxu1 %v4605_v6  ;;  %3242 = vmatprep.subr.bf16.mxu0 %v4605_v6  ;;  %v4631_v18 = vrot.slane %v1211_v53, %v1229_v51  ;;  %v4636_v50 = vld [vmem:[#allocation13 + $0x10] sm:$0xff]  ;;  %v4638_v30 = vld [vmem:[#allocation13] sm:$0xff]  ;;  %v4716_v51 = vld [vmem:[#allocation12 + $0x28] sm:$0xff] }
 0x399   :  { %v873_v35 = vadd.f32 %v3727_v34, %v857_v49  ;;  %v858_v32 = vmul.f32 0.5, %v842_v44  ;;  %3276 = vmatprep.subr.bf16.mxu1 %v4603_v20  ;;  %v4643_v44 = vld [vmem:[#allocation13 + $0x18] sm:$0xff]  ;;  %5874 = vst [vmem:[#allocation43_spill] sm:$0xff] %v4716_v51  ;;  %v4788_v51 = vld [vmem:[#allocation12 + $0x60] sm:$0xff] }
 0x39a   :  { %v876_v54 = vadd.f32 %v3728_v58, %v860_v56  ;;  %v1232_v49 = vadd.f32 %v4631_v18, %v4504_v41  ;;  %v4647_v56 = vld [vmem:[#allocation12 + $0x10] sm:$0xff]  ;;  %v1234_v60 = vadd.f32 %v4631_v18, %v4512_v62  ;;  %v5869_v62 = vld [vmem:[#allocation30_spill] sm:$0xff]  ;;  %5891 = vst [vmem:[#allocation54_spill] sm:$0xff] %v4788_v51 }
 0x39b   :  { %v3557_v55 = vpop.eup %3556  ;;  %v874_v2 = vadd.f32 %v3729_v25, %v858_v32  ;;  %v4653_v32 = vld [vmem:[#allocation13 + $0x8] sm:$0xff]  ;;  %v4661_v25 = vld [vmem:[#allocation12 + $0x18] sm:$0xff] }
 0x39c   :  { %v3559_v4 = vpop.eup %3558  ;;  %v4613_v26 = vpack.c.bf16 %v876_v54, %v875_v52  ;;  %v847_v27 = vmul.f32 0.0, %v3557_v55  ;;  %3277 = vmatpush3.bf16.msra.mxu1 %v4603_v20  ;;  %v1231_v52 = vadd.f32 %v4631_v18, %v4498_v63  ;;  %v4655_v54 = vld [vmem:[#allocation12] sm:$0xff]  ;;  %v4743_v55 = vld [vmem:[#allocation13 + $0x48] sm:$0xff] }
 0x39d   :  { %v3561_v22 = vpop.eup %3560  ;;  %v4616_v23 = vpack.c.bf16 %v874_v2, %v873_v35  ;;  %v845_v0 = vmul.f32 0.0, %v3559_v4  ;;  %v5865_v2 = vld [vmem:[#allocation27_spill] sm:$0xff]  ;;  %v4735_v35 = vld [vmem:[#allocation13 + $0x58] sm:$0xff]  ;;  %5882 = vst [vmem:[#allocation48_spill] sm:$0xff] %v4743_v55 }
 0x39e   :  { %v3563_v1 = vpop.eup %3562  ;;  %v863_v11 = vmul.f32 0.5, %v847_v27  ;;  %v848_v3 = vmul.f32 0.0, %v3561_v22  ;;  %v4665_v27 = vld [vmem:[#allocation13 + $0x30] sm:$0xff]  ;;  %5879 = vst [vmem:[#allocation46_spill] sm:$0xff] %v4735_v35  ;;  %v4754_v4 = vld [vmem:[#allocation12 + $0x58] sm:$0xff]  ;;  %v170_v35 = vld [vmem:[#allocation10] sm:$0xff] }
 0x39f   :  { %v861_v5 = vmul.f32 0.5, %v845_v0  ;;  %v846_v12 = vmul.f32 0.0, %v3563_v1  ;;  %3243 = vmatpush3.bf16.xpose.msra.mxu0 %v4605_v6  ;;  %3278 = vmatprep.subr.bf16.mxu1 %v4616_v23  ;;  %v4670_v1 = vld [vmem:[#allocation12 + $0x8] sm:$0xff]  ;;  %5883 = vst [vmem:[#allocation49_spill] sm:$0xff] %v4754_v4 }
 0x3a0   :  { %v879_v24 = vadd.f32 %v3730_v61, %v863_v11  ;;  %v864_v28 = vmul.f32 0.5, %v848_v3  ;;  %3244 = vmatprep.subr.bf16.mxu0 %v4603_v20  ;;  %3279 = vmatpush3.bf16.msra.mxu1 %v4616_v23  ;;  %v5866_v11 = vld [vmem:[#allocation28_spill] sm:$0xff]  ;;  %v4720_v61 = vld [vmem:[#allocation13 + $0x40] sm:$0xff] }
 0x3a1   :  { %v877_v42 = vadd.f32 %v3731_v36, %v861_v5  ;;  %v862_v9 = vmul.f32 0.5, %v846_v12  ;;  %3280 = vmatprep.subr.bf16.mxu1 %v4613_v26  ;;  %v4674_v5 = vld [vmem:[#allocation13 + $0x20] sm:$0xff]  ;;  %5876 = vst [vmem:[#allocation44_spill] sm:$0xff] %v4720_v61  ;;  %v4776_v4 = vld [vmem:[#allocation12 + $0x48] sm:$0xff] }
 0x3a2   :  { %v880_v31 = vadd.f32 %v3732_v8, %v864_v28  ;;  %v5867_v28 = vld [vmem:[#allocation29_spill] sm:$0xff]  ;;  %5887 = vst [vmem:[#allocation52_spill] sm:$0xff] %v4776_v4 }
 0x3a3   :  { %v878_v14 = vadd.f32 %v3733_v21, %v862_v9  ;;  %v4705_v21 = vld [vmem:[#allocation13 + $0x50] sm:$0xff] }
 0x3a4   :  { %v4624_v10 = vpack.c.bf16 %v880_v31, %v879_v24  ;;  %3281 = vmatpush3.bf16.msra.mxu1 %v4613_v26  ;;  %v4681_v24 = vld [vmem:[#allocation12 + $0x30] sm:$0xff]  ;;  %v1233_v31 = vadd.f32 %v4631_v18, %v4507_v48  ;;  %5873 = vst [vmem:[#allocation30_spill] sm:$0xff] %v4705_v21  ;;  %v4806_v48 = vadd.f32 %v4631_v18, %v4543_v13 }
 0x3a5   :  { %v4627_v7 = vpack.c.bf16 %v878_v14, %v877_v42  ;;  %v4685_v42 = vld [vmem:[#allocation13 + $0x38] sm:$0xff]  ;;  %v4691_v14 = vld [vmem:[#allocation12 + $0x20] sm:$0xff]  ;;  %v4824_v13 = vadd.f32 %v4631_v18, %v4561_v39 }
 0x3a6   :  { %5864 = vst [vmem:[#allocation42_spill] sm:$0xff] %v4624_v10  ;;  %5868 = vst [vmem:[#allocation27_spill] sm:$0xff] %v4685_v42 }
 0x3a7   :  { %3245 = vmatpush3.bf16.xpose.msra.mxu0 %v4603_v20  ;;  %3282 = vmatprep.subr.bf16.mxu1 %v4627_v7 }
 0x3a8   :  { %3246 = vmatprep.subr.bf16.mxu0 %v4616_v23  ;;  %3283 = vmatpush3.bf16.msra.mxu1 %v4627_v7 }
 0x3a9   :  { %3284 = vmatprep.subr.bf16.mxu1 %v4624_v10 }
 0x3ac   :  { %3285 = vmatpush3.bf16.msra.mxu1 %v4624_v10 }
 0x3ad   :  { %v3216_v47 = vpop.f32.mrb[48].mxu1 }
 0x3ae   :  { %v1248_v58 = vmul.f32 2.0, %v3216_v47  ;;  %v1116_v41 = vpop.f32.mrb[49].mxu1 }
 0x3af   :  { %v1247_v22 = vmul.f32 2.0, %v1116_v41  ;;  %3247 = vmatpush3.bf16.xpose.msra.mxu0 %v4616_v23  ;;  %v171_v41 = vld [vmem:[#allocation10 + $0x8] sm:$0xff] }
 0x3b0   :  { %v1264_v12 = vsub.f32 %v1232_v49, %v1248_v58  ;;  %3248 = vmatprep.subr.bf16.mxu0 %v4613_v26  ;;  %v4714_v58 = vadd.f32 %v4631_v18, %v4520_v37  ;;  %v4729_v37 = vld [vmem:[#allocation12 + $0x50] sm:$0xff] }
 0x3b1   :  { %v1263_v9 = vsub.f32 %v1231_v52, %v1247_v22  ;;  %v3219_v8 = vpop.f32.mrb[50].mxu1  ;;  %v4699_v52 = vld [vmem:[#allocation12 + $0x38] sm:$0xff]  ;;  %v4703_v22 = vld [vmem:[#allocation13 + $0x28] sm:$0xff]  ;;  %5877 = vst [vmem:[#allocation45_spill] sm:$0xff] %v4729_v37  ;;  %v4802_v37 = vadd.f32 %v4631_v18, %v4531_v29  ;;  %v4820_v29 = vadd.f32 %v4631_v18, %v4547_v16 }
 0x3b2   :  { %v4695_v53 = vmax.f32 %v1264_v12, 0.0  ;;  %v1250_v49 = vmul.f32 2.0, %v3219_v8  ;;  %v1126_v47 = vpop.f32.mrb[51].mxu1  ;;  %5870 = vst [vmem:[#allocation28_spill] sm:$0xff] %v4699_v52  ;;  %5872 = vst [vmem:[#allocation29_spill] sm:$0xff] %v4703_v22  ;;  %v4725_v12 = vadd.f32 %v4631_v18, %v4515_v57 }
 0x3b3   :  { %v4707_v36 = vmax.f32 %v1263_v9, 0.0  ;;  %v1249_v0 = vmul.f32 2.0, %v1126_v47 }
 0x3b4   :  { %3564 = vrsqrt.f32 %v4695_v53  ;;  %v1266_v8 = vsub.f32 %v1234_v60, %v1250_v49  ;;  %v4758_v49 = vld [vmem:[#allocation13 + $0x70] sm:$0xff]  ;;  %vm1304_vm2 = vcmp.eq.f32.partialorder %v4695_v53, inf  ;;  %vm1306_vm5 = vcmp.eq.f32.partialorder %v4695_v53, 0.0 }
 0x3b5   :  { %3566 = vrsqrt.f32 %v4707_v36  ;;  %v1265_v9 = vsub.f32 %v1233_v31, %v1249_v0  ;;  %v3222_v47 = vpop.f32.mrb[52].mxu1  ;;  %v4739_v31 = vld [vmem:[#allocation12 + $0x40] sm:$0xff]  ;;  %5885 = vst [vmem:[#allocation50_spill] sm:$0xff] %v4758_v49  ;;  %vm1297_vm1 = vcmp.eq.f32.partialorder %v4707_v36, inf  ;;  %vm1299_vm3 = vcmp.eq.f32.partialorder %v4707_v36, 0.0 }
 0x3b6   :  { %v4737_v34 = vmul.f32 2.0, %v3222_v47  ;;  %v1136_v0 = vpop.f32.mrb[53].mxu1  ;;  %5880 = vst [vmem:[#allocation47_spill] sm:$0xff] %v4739_v31  ;;  %v4745_v60 = vmax.f32 %v1266_v8, 0.0  ;;  %v4769_v47 = vld [vmem:[#allocation13 + $0x60] sm:$0xff]  ;;  %v1237_v8 = vadd.f32 %v4631_v18, %v4523_v15 }
 0x3b7   :  { %v4747_v59 = vmax.f32 %v1265_v9, 0.0  ;;  %v4749_v3 = vmul.f32 2.0, %v1136_v0  ;;  %3249 = vmatpush3.bf16.xpose.msra.mxu0 %v4613_v26  ;;  %v4764_v9 = vadd.f32 %v4631_v18, %v4528_v45  ;;  %5886 = vst [vmem:[#allocation51_spill] sm:$0xff] %v4769_v47  ;;  %v4782_v0 = vld [vmem:[#allocation12 + $0x70] sm:$0xff] }
 0x3b8   :  { %3250 = vmatprep.subr.bf16.mxu0 %v4627_v7  ;;  %5889 = vst [vmem:[#allocation53_spill] sm:$0xff] %v4782_v0  ;;  %vm1318_vm4 = vcmp.eq.f32.partialorder %v4745_v60, inf  ;;  %vm1320_vm8 = vcmp.eq.f32.partialorder %v4745_v60, 0.0  ;;  %v5893_v45 = vsub.f32 %v4714_v58, %v4737_v34  ;;  %v3748_v58 = vld [vmem:[#allocation9] sm:$0xff] }
 0x3b9   :  { %3568 = vrsqrt.f32 %v4747_v59  ;;  %v3225_v63 = vpop.f32.mrb[54].mxu1  ;;  %vm1311_vm6 = vcmp.eq.f32.partialorder %v4747_v59, inf  ;;  %vm1313_vm7 = vcmp.eq.f32.partialorder %v4747_v59, 0.0  ;;  %v1314_v15 = vand.u32 2147483648, %v4747_v59 }
 0x3ba   :  { %v1254_v57 = vmul.f32 2.0, %v3225_v63  ;;  %v1146_v22 = vpop.f32.mrb[55].mxu1  ;;  %3570 = vrsqrt.f32 %v4745_v60  ;;  %v4798_v63 = vadd.f32 %v4631_v18, %v4536_v38  ;;  %v4871_v42 = vmax.f32 %v5893_v45, 0.0 }
 0x3bb   :  { %v1253_v61 = vmul.f32 2.0, %v1146_v22  ;;  %v4810_v22 = vadd.f32 %v4631_v18, %v4539_v43  ;;  %v4828_v43 = vadd.f32 %v4631_v18, %v4557_v19 }
 0x3bc   :  { %v1270_v55 = vsub.f32 %v4764_v9, %v1254_v57  ;;  %v4814_v57 = vadd.f32 %v4631_v18, %v4551_v17  ;;  %v1300_v17 = vand.u32 2147483648, %v4707_v36  ;;  %vm1332_vm12 = vcmp.eq.f32.partialorder %v4871_v42, inf }
 0x3bd   :  { %v1269_v21 = vsub.f32 %v1237_v8, %v1253_v61  ;;  %v3228_v49 = vpop.f32.mrb[56].mxu1  ;;  %vm1334_vm13 = vcmp.eq.f32.partialorder %v4871_v42, 0.0 }
 0x3be   :  { %v3565_v38 = vpop.eup %3564  ;;  %v4816_v9 = vmul.f32 2.0, %v3228_v49  ;;  %v1156_v31 = vpop.f32.mrb[57].mxu1 }
 0x3bf   :  { %v3567_v61 = vpop.eup %3566  ;;  %v4830_v8 = vmul.f32 2.0, %v1156_v31  ;;  %3251 = vmatpush3.bf16.xpose.msra.mxu0 %v4627_v7  ;;  %v1303_v19 = vmul.f32 %v3565_v38, %v4695_v53  ;;  %v1307_v31 = vand.u32 2147483648, %v4695_v53  ;;  %v4847_v47 = vmax.f32 %v1269_v21, 0.0 }
 0x3c0   :  { %3252 = vmatprep.subr.bf16.mxu0 %v4624_v10  ;;  %v1296_v39 = vmul.f32 %v3567_v61, %v4707_v36 }
 0x3c1   :  { %v3231_v49 = vpop.f32.mrb[58].mxu1  ;;  %3572 = vrsqrt.f32 %v4847_v47  ;;  %vm1339_vm11 = vcmp.eq.f32.partialorder %v4847_v47, inf  ;;  %vm1341_vm14 = vcmp.eq.f32.partialorder %v4847_v47, 0.0 }
 0x3c2   :  { %v4849_v16 = vmul.f32 2.0, %v3231_v49  ;;  %v1166_v51 = vpop.f32.mrb[59].mxu1  ;;  %v1298_v38 = vsel %vm1297_vm1, %v4707_v36, %v1296_v39  ;;  %v5894_v36 = vsub.f32 %v4725_v12, %v4749_v3 }
 0x3c3   :  { %v3569_v61 = vpop.eup %3568  ;;  %v4855_v18 = vmul.f32 2.0, %v1166_v51  ;;  %v1301_v21 = vsel %vm1299_vm3, %v1300_v17, %v1298_v38  ;;  %v1305_v51 = vsel %vm1304_vm2, %v4695_v53, %v1303_v19  ;;  %v4878_v38 = vmax.f32 %v1270_v55, 0.0 }
 0x3c4   :  { %v1310_v0 = vmul.f32 %v3569_v61, %v4747_v59  ;;  %v1407_v4 = vmul.f32 0.5, %v1301_v21  ;;  %v3571_v39 = vpop.eup %3570  ;;  %v4876_v17 = vmax.f32 %v5894_v36, 0.0  ;;  %v4897_v36 = vpop.f32.mrb[0].mxu0  ;;  %v5897_v53 = vsub.f32 %v4299_v46, %v4638_v30 }
 0x3c5   :  { %v1273_v61 = vsub.f32 %v4810_v22, %v4855_v18  ;;  %v3234_v21 = vpop.f32.mrb[60].mxu1  ;;  %v1308_v22 = vsel %vm1306_vm5, %v1307_v31, %v1305_v51  ;;  %5895 = vst [vmem:[#allocation55_spill] sm:$0xff] %v4897_v36  ;;  %v1321_v31 = vand.u32 2147483648, %v4745_v60  ;;  %vm1346_vm15 = vcmp.eq.f32.partialorder %v4878_v38, inf }
 0x3c6   :  { %v4883_v19 = vmul.f32 2.0, %v3234_v21  ;;  %v1176_v49 = vpop.f32.mrb[61].mxu1  ;;  %v1312_v34 = vsel %vm1311_vm6, %v4747_v59, %v1310_v0  ;;  %v1439_v45 = vmul.f32 %v3748_v58, %v1407_v4  ;;  %v1487_v12 = vmul.f32 %v1407_v4, %v170_v35  ;;  %v172_v21 = vld [vmem:[#allocation10 + $0x10] sm:$0xff]  ;;  %v923_v4 = vpop.f32.mrb[1].mxu0 }
 0x3c7   :  { %v4888_v3 = vmul.f32 2.0, %v1176_v49  ;;  %3253 = vmatpush3.bf16.xpose.msra.mxu0 %v4624_v10  ;;  %v1315_v55 = vsel %vm1313_vm7, %v1314_v15, %v1312_v34  ;;  %v5896_v49 = vsub.f32 %v4299_v46, %v4655_v54  ;;  %v1317_v10 = vmul.f32 %v3571_v39, %v4745_v60 }
 0x3c8   :  { %v1409_v0 = vmul.f32 0.5, %v1315_v55  ;;  %3574 = vrsqrt.f32 %v4876_v17  ;;  %v1503_v15 = vsub.f32 %v5897_v53, %v1487_v12  ;;  %v4915_v55 = vpop.f32.mrb[2].mxu0  ;;  %v1408_v12 = vmul.f32 0.5, %v1308_v22 }
 0x3c9   :  { %v1455_v52 = vsub.f32 %v5896_v49, %v1439_v45  ;;  %v3237_v35 = vpop.f32.mrb[62].mxu1  ;;  %3576 = vrsqrt.f32 %v4878_v38  ;;  %v3749_v45 = vld [vmem:[#allocation7] sm:$0xff]  ;;  %5899 = vst [vmem:[#allocation57_spill] sm:$0xff] %v4915_v55  ;;  %v3750_v49 = vld [vmem:[#allocation9 + $0x10] sm:$0xff]  ;;  %v926_v46 = vpop.f32.mrb[3].mxu0  ;;  %v1319_v55 = vsel %vm1318_vm4, %v4745_v60, %v1317_v10  ;;  %vm1325_vm9 = vcmp.eq.f32.partialorder %v4876_v17, inf }
 0x3ca   :  { %v4911_v51 = vmul.f32 2.0, %v3237_v35  ;;  %v1186_v34 = vpop.f32.mrb[63].mxu1  ;;  %v4913_v39 = vsub.f32 %v3749_v45, %v923_v4  ;;  %v1441_v59 = vmul.f32 %v3750_v49, %v1409_v0  ;;  %3578 = vrsqrt.f32 %v4871_v42  ;;  %v3751_v35 = vld [vmem:[#allocation7 + $0x8] sm:$0xff] }
 0x3cb   :  { %v4918_v18 = vmul.f32 2.0, %v1186_v34  ;;  %v1489_v30 = vmul.f32 %v1409_v0, %v172_v21  ;;  %v4922_v36 = vsub.f32 %v3751_v35, %v926_v46  ;;  %v5901_v4 = vsub.f32 %v4295_v40, %v4647_v56  ;;  %v4930_v34 = vld [vmem:[#allocation12 + $0x78] sm:$0xff]  ;;  %v5902_v21 = vld [vmem:[#allocation39_spill] sm:$0xff]  ;;  %v3573_v53 = vpop.eup %3572  ;;  %v176_v0 = vld [vmem:[#allocation10 + $0x30] sm:$0xff] }
 0x3cc   :  { %5898 = vst [vmem:[#allocation56_spill] sm:$0xff] %v4913_v39  ;;  %v5903_v46 = vsub.f32 %v4295_v40, %v4636_v50  ;;  %vm1327_vm10 = vcmp.eq.f32.partialorder %v4876_v17, 0.0  ;;  %v4946_v22 = vmax.f32 %v1273_v61, 0.0  ;;  %v1322_v40 = vsel %vm1320_vm8, %v1321_v31, %v1319_v55  ;;  %v3753_v50 = vld [vmem:[#allocation9 + $0x8] sm:$0xff]  ;;  %v173_v61 = vld [vmem:[#allocation10 + $0x18] sm:$0xff] }
 0x3cd   :  { %5900 = vst [vmem:[#allocation58_spill] sm:$0xff] %v4922_v36  ;;  %v1457_v45 = vsub.f32 %v5901_v4, %v1441_v59  ;;  %v4943_v10 = vpack.c.bf16 %v4922_v36, %v4913_v39  ;;  %v1632_v4 = vmul.f32 %v3748_v58, %v1455_v52  ;;  %v1410_v58 = vmul.f32 0.5, %v1322_v40  ;;  %v179_v36 = vld [vmem:[#allocation10 + $0x48] sm:$0xff] }
 0x3ce   :  { %v1505_v35 = vsub.f32 %v5903_v46, %v1489_v30  ;;  %3255 = vmatmul.mubr.bf16.vlgmr.msra.gmra.mrb[16].mxu0 %v4597_v33  ;;  %v1440_v30 = vmul.f32 %v3753_v50, %v1408_v12  ;;  %v1488_v46 = vmul.f32 %v1408_v12, %v171_v41  ;;  %v4952_v33 = vpop.f32.mrb[4].mxu0  ;;  %v5905_v41 = vsub.f32 %v5866_v11, %v4670_v1 }
 0x3cf   :  { %v1634_v59 = vmul.f32 %v3750_v49, %v1457_v45  ;;  %3258 = vmatprep.mubr.bf16.mxu0 %v4605_v6  ;;  %3334 = vmatprep.subr.bf16.mxu1 %v4943_v10  ;;  %v4958_v52 = vadd.f32 %v4655_v54, %v1632_v4  ;;  %v1328_v6 = vand.u32 2147483648, %v4876_v17  ;;  %v4961_v60 = vpop.f32.mrb[5].mxu0  ;;  %v5906_v55 = vsub.f32 %v5866_v11, %v4653_v32 }
 0x3d0   :  { %v1456_v31 = vsub.f32 %v5905_v41, %v1440_v30  ;;  %v5907_v54 = vsub.f32 %v4802_v37, %v4830_v8  ;;  %v3754_v30 = vld [vmem:[#allocation9 + $0x18] sm:$0xff]  ;;  %3580 = vrsqrt.f32 %v4946_v22  ;;  %v1490_v37 = vmul.f32 %v1410_v58, %v173_v61 }
 0x3d1   :  { %v4955_v49 = vadd.f32 %v4647_v56, %v1634_v59  ;;  %v1504_v12 = vsub.f32 %v5906_v55, %v1488_v46  ;;  %v4976_v59 = vpop.f32.mrb[6].mxu0  ;;  %v4982_v40 = vadd.f32 %v4958_v52, %v1503_v15  ;;  %v1442_v32 = vmul.f32 %v3754_v30, %v1410_v58 }
 0x3d2   :  { %v4974_v45 = vmax.f32 %v5907_v54, 0.0  ;;  %v3575_v11 = vpop.eup %3574  ;;  %v4986_v46 = vpop.f32.mrb[7].mxu0  ;;  %v1633_v8 = vmul.f32 %v3753_v50, %v1456_v31  ;;  %v1338_v41 = vmul.f32 %v3573_v53, %v4847_v47  ;;  %v5908_v15 = vsub.f32 %v5865_v2, %v4661_v25 }
 0x3d3   :  { %5904 = vst [vmem:[#allocation39_spill] sm:$0xff] %v4955_v49  ;;  %v4979_v4 = vadd.f32 %v4955_v49, %v1505_v35  ;;  %v3577_v35 = vpop.eup %3576  ;;  %v1342_v54 = vand.u32 2147483648, %v4847_v47  ;;  %v5909_v61 = vsub.f32 %v4798_v63, %v4816_v9  ;;  %v5910_v53 = vsub.f32 %v5865_v2, %v4643_v44 }
 0x3d4   :  { %v1458_v55 = vsub.f32 %v5908_v15, %v1442_v32  ;;  %v3579_v56 = vpop.eup %3578  ;;  %v5005_v31 = vadd.f32 %v4670_v1, %v1633_v8  ;;  %v1340_v32 = vsel %vm1339_vm11, %v4847_v47, %v1338_v41  ;;  %3582 = vrsqrt.f32 %v4974_v45  ;;  %v5023_v8 = vpop.f32.mrb[8].mxu0  ;;  %v174_v41 = vld [vmem:[#allocation10 + $0x20] sm:$0xff] }
 0x3d5   :  { %v4999_v50 = vmax.f32 %v5909_v61, 0.0  ;;  %v1506_v58 = vsub.f32 %v5910_v53, %v1490_v37  ;;  %v1343_v63 = vsel %vm1341_vm14, %v1342_v54, %v1340_v32  ;;  %v1324_v9 = vmul.f32 %v3575_v11, %v4876_v17 }
 0x3d6   :  { %3259 = vmatmul.mubr.bf16.gmra.mrb[20].mxu0 %v4603_v20  ;;  %v1635_v15 = vmul.f32 %v3754_v30, %v1458_v55  ;;  %v5911_v44 = vsub.f32 %v4806_v48, %v4849_v16  ;;  %v5020_v1 = vadd.f32 %v5005_v31, %v1504_v12  ;;  %v1413_v47 = vmul.f32 0.5, %v1343_v63  ;;  %v3755_v16 = vld [vmem:[#allocation9 + $0x30] sm:$0xff] }
 0x3d7   :  { %3262 = vmatprep.mubr.bf16.mxu0 %v4616_v23  ;;  %v1345_v37 = vmul.f32 %v3577_v35, %v4878_v38  ;;  %v1326_v30 = vsel %vm1325_vm9, %v4876_v17, %v1324_v9  ;;  %vm1348_vm0 = vcmp.eq.f32.partialorder %v4878_v38, 0.0  ;;  %v1349_v48 = vand.u32 2147483648, %v4878_v38  ;;  %v5033_v23 = vpop.f32.mrb[9].mxu0  ;;  %v3756_v9 = vld [vmem:[#allocation9 + $0x20] sm:$0xff] }
 0x3d8   :  { %v5016_v2 = vmax.f32 %v5911_v44, 0.0  ;;  %v5026_v20 = vadd.f32 %v4661_v25, %v1635_v15  ;;  %v1445_v12 = vmul.f32 %v3755_v16, %v1413_v47  ;;  %v1493_v11 = vmul.f32 %v1413_v47, %v176_v0  ;;  %v5039_v55 = vpop.f32.mrb[10].mxu0 }
 0x3d9   :  { %v1329_v35 = vsel %vm1327_vm10, %v1328_v6, %v1326_v30  ;;  %v1331_v25 = vmul.f32 %v3579_v56, %v4871_v42  ;;  %3584 = vrsqrt.f32 %v4999_v50  ;;  %v5047_v0 = vpop.f32.mrb[11].mxu0  ;;  %v5913_v17 = vsub.f32 %v5867_v28, %v4681_v24  ;;  %v177_v30 = vld [vmem:[#allocation10 + $0x38] sm:$0xff] }
 0x3da   :  { %5912 = vst [vmem:[#allocation59_spill] sm:$0xff] %v5026_v20  ;;  %v5042_v54 = vadd.f32 %v5026_v20, %v1506_v58  ;;  %v1411_v53 = vmul.f32 0.5, %v1329_v35  ;;  %3586 = vrsqrt.f32 %v5016_v2  ;;  %v5914_v56 = vsub.f32 %v5867_v28, %v4665_v27  ;;  %v3581_v35 = vpop.eup %3580 }
 0x3db   :  { %v1461_v6 = vsub.f32 %v5913_v17, %v1445_v12  ;;  %v1347_v58 = vsel %vm1346_vm15, %v4878_v38, %v1345_v37  ;;  %v5915_v15 = vsub.f32 %v4828_v43, %v4918_v18  ;;  %v5916_v27 = vsub.f32 %v4814_v57, %v4883_v19  ;;  %v175_v17 = vld [vmem:[#allocation10 + $0x28] sm:$0xff] }
 0x3dc   :  { %v1509_v32 = vsub.f32 %v5914_v56, %v1493_v11  ;;  %v1443_v44 = vmul.f32 %v3756_v9, %v1411_v53  ;;  %v1491_v47 = vmul.f32 %v1411_v53, %v174_v41  ;;  %v1350_v12 = vsel %vm1348_vm0, %v1349_v48, %v1347_v58  ;;  %v5093_v58 = vld [vmem:[#allocation13 + $0x78] sm:$0xff] }
 0x3dd   :  { %v5061_v63 = vmax.f32 %v5915_v15, 0.0  ;;  %v5068_v28 = vmax.f32 %v5916_v27, 0.0  ;;  %v1638_v11 = vmul.f32 %v3755_v16, %v1461_v6  ;;  %v1414_v37 = vmul.f32 0.5, %v1350_v12 }
 0x3de   :  { %v1333_v43 = vsel %vm1332_vm12, %v4871_v42, %v1331_v25  ;;  %v5917_v18 = vsub.f32 %v4820_v29, %v4888_v3  ;;  %3263 = vmatmul.mubr.bf16.gmra.mrb[24].mxu0 %v4613_v26  ;;  %v5918_v38 = vsub.f32 %v5869_v62, %v4691_v14  ;;  %v5919_v57 = vsub.f32 %v5869_v62, %v4674_v5  ;;  %v3757_v3 = vld [vmem:[#allocation9 + $0x38] sm:$0xff]  ;;  %v3583_v56 = vpop.eup %3582  ;;  %v5096_v5 = vpop.f32.mrb[12].mxu0 }
 0x3df   :  { %v5920_v16 = vand.u32 2147483648, %v4871_v42  ;;  %3266 = vmatprep.mubr.bf16.mxu0 %v4627_v7  ;;  %v5091_v29 = vadd.f32 %v4681_v24, %v1638_v11  ;;  %v1446_v26 = vmul.f32 %v3757_v3, %v1414_v37  ;;  %v1494_v53 = vmul.f32 %v1414_v37, %v177_v30  ;;  %v5105_v15 = vpop.f32.mrb[13].mxu0  ;;  %v5923_v30 = vld [vmem:[#allocation28_spill] sm:$0xff] }
 0x3e0   :  { %v5076_v41 = vmax.f32 %v5917_v18, 0.0  ;;  %v1459_v48 = vsub.f32 %v5918_v38, %v1443_v44  ;;  %v1507_v19 = vsub.f32 %v5919_v57, %v1491_v47  ;;  %3588 = vrsqrt.f32 %v5061_v63  ;;  %v5922_v47 = vld [vmem:[#allocation31_spill] sm:$0xff]  ;;  %v5116_v37 = vpop.f32.mrb[14].mxu0 }
 0x3e1   :  { %v1336_v25 = vsel %vm1334_vm13, %v5920_v16, %v1333_v43  ;;  %v1366_v42 = vmul.f32 %v3581_v35, %v4946_v22  ;;  %vm1367_vm1 = vcmp.eq.f32.partialorder %v4946_v22, inf  ;;  %v5921_v7 = vsub.f32 %v4824_v13, %v4911_v51  ;;  %v3758_v13 = vld [vmem:[#allocation9 + $0x28] sm:$0xff]  ;;  %v5124_v38 = vpop.f32.mrb[15].mxu0 }
 0x3e2   :  { %v1412_v6 = vmul.f32 0.5, %v1336_v25  ;;  %v1636_v62 = vmul.f32 %v3756_v9, %v1459_v48  ;;  %v5108_v44 = vadd.f32 %v5091_v29, %v1509_v32  ;;  %v5924_v12 = vsub.f32 %v5922_v47, %v5923_v30  ;;  %v5925_v9 = vld [vmem:[#allocation27_spill] sm:$0xff]  ;;  %v181_v32 = vld [vmem:[#allocation10 + $0x58] sm:$0xff] }
 0x3e3   :  { %v5103_v24 = vmax.f32 %v5921_v7, 0.0  ;;  %v5926_v11 = vsub.f32 %v5922_v47, %v5925_v9  ;;  %vm1369_vm2 = vcmp.eq.f32.partialorder %v4946_v22, 0.0  ;;  %v1368_v57 = vsel %vm1367_vm1, %v4946_v22, %v1366_v42  ;;  %v3585_v25 = vpop.eup %3584 }
 0x3e4   :  { %v1462_v27 = vsub.f32 %v5924_v12, %v1446_v26  ;;  %v5119_v43 = vadd.f32 %v4691_v14, %v1636_v62  ;;  %v1444_v51 = vmul.f32 %v3758_v13, %v1412_v6  ;;  %v1492_v18 = vmul.f32 %v1412_v6, %v175_v17  ;;  %v5927_v26 = vld [vmem:[#allocation32_spill] sm:$0xff]  ;;  %v5930_v62 = vld [vmem:[#allocation29_spill] sm:$0xff]  ;;  %v3587_v12 = vpop.eup %3586 }
 0x3e5   :  { %v1510_v35 = vsub.f32 %v5926_v11, %v1494_v53  ;;  %v1370_v16 = vand.u32 2147483648, %v4946_v22  ;;  %3590 = vrsqrt.f32 %v5076_v41  ;;  %v5928_v53 = vld [vmem:[#allocation43_spill] sm:$0xff]  ;;  %v5931_v7 = vsub.f32 %v5927_v26, %v5930_v62  ;;  %v180_v22 = vld [vmem:[#allocation10 + $0x50] sm:$0xff] }
 0x3e6   :  { %v1639_v48 = vmul.f32 %v3757_v3, %v1462_v27  ;;  %v5130_v14 = vadd.f32 %v5119_v43, %v1507_v19  ;;  %v5929_v17 = vsub.f32 %v5927_v26, %v5928_v53  ;;  %3592 = vrsqrt.f32 %v5068_v28  ;;  %v5932_v19 = vld [vmem:[#allocation42_spill] sm:$0xff] }
 0x3e7   :  { %v1508_v47 = vsub.f32 %v5931_v7, %v1492_v18  ;;  %v1371_v42 = vsel %vm1369_vm2, %v1370_v16, %v1368_v57  ;;  %v1352_v27 = vmul.f32 %v3583_v56, %v4974_v45  ;;  %3594 = vrsqrt.f32 %v5103_v24  ;;  %3267 = vmatmul.mubr.bf16.gmra.mrb[28].mxu0 %v5932_v19  ;;  %v3760_v57 = vld [vmem:[#allocation9 + $0x50] sm:$0xff] }
 0x3e8   :  { %v1460_v6 = vsub.f32 %v5929_v17, %v1444_v51  ;;  %v5140_v3 = vadd.f32 %v5923_v30, %v1639_v48  ;;  %v1417_v11 = vmul.f32 0.5, %v1371_v42  ;;  %vm1353_vm3 = vcmp.eq.f32.partialorder %v4974_v45, inf  ;;  %v3759_v48 = vld [vmem:[#allocation15] sm:$0xff]   ;;  %v5933_v7 = vld [vmem:[#allocation33_spill] sm:$0xff] }
 0x3e9   :  { %v1354_v18 = vsel %vm1353_vm3, %v4974_v45, %v1352_v27  ;;  %vm1355_vm4 = vcmp.eq.f32.partialorder %v4974_v45, 0.0  ;;  %v1356_v30 = vand.u32 2147483648, %v4974_v45  ;;  %3318 = vmatprep.mubr.bf16.mxu0 %v3759_v48  ;;  %v1373_v26 = vmul.f32 %v3587_v12, %v5016_v2  ;;  %v178_v17 = vld [vmem:[#allocation10 + $0x40] sm:$0xff] }
 0x3ea   :  { %v1637_v9 = vmul.f32 %v3758_v13, %v1460_v6  ;;  %v5147_v51 = vadd.f32 %v5140_v3, %v1510_v35  ;;  %v1449_v16 = vmul.f32 %v3760_v57, %v1417_v11  ;;  %v1497_v13 = vmul.f32 %v1417_v11, %v180_v22  ;;  %v3589_v62 = vpop.eup %3588  ;;  %v5936_v22 = vld [vmem:[#allocation30_spill] sm:$0xff] }
 0x3eb   :  { %v1357_v6 = vsel %vm1355_vm4, %v1356_v30, %v1354_v18  ;;  %vm1374_vm5 = vcmp.eq.f32.partialorder %v5016_v2, inf  ;;  %vm1376_vm6 = vcmp.eq.f32.partialorder %v5016_v2, 0.0  ;;  %v1377_v35 = vand.u32 2147483648, %v5016_v2 }
 0x3ec   :  { %v5153_v56 = vadd.f32 %v5928_v53, %v1637_v9  ;;  %v5934_v53 = vld [vmem:[#allocation45_spill] sm:$0xff]  ;;  %v5937_v19 = vsub.f32 %v5933_v7, %v5936_v22  ;;  %v1415_v9 = vmul.f32 0.5, %v1357_v6  ;;  %v1375_v11 = vsel %vm1374_vm5, %v5016_v2, %v1373_v26  ;;  %v5938_v22 = vld [vmem:[#allocation34_spill] sm:$0xff] }
 0x3ed   :  { %v5935_v42 = vsub.f32 %v5933_v7, %v5934_v53  ;;  %v1359_v18 = vmul.f32 %v3585_v25, %v4999_v50  ;;  %vm1360_vm7 = vcmp.eq.f32.partialorder %v4999_v50, inf  ;;  %vm1362_vm8 = vcmp.eq.f32.partialorder %v4999_v50, 0.0 }
 0x3ee   :  { %v5160_v45 = vadd.f32 %v5153_v56, %v1508_v47  ;;  %v1513_v12 = vsub.f32 %v5937_v19, %v1497_v13  ;;  %v3761_v47 = vld [vmem:[#allocation9 + $0x40] sm:$0xff]  ;;  %v1495_v61 = vmul.f32 %v1415_v9, %v178_v17  ;;  %v1363_v6 = vand.u32 2147483648, %v4999_v50  ;;  %v5941_v17 = vld [vmem:[#allocation44_spill] sm:$0xff] }
 0x3ef   :  { %v1465_v27 = vsub.f32 %v5935_v42, %v1449_v16  ;;  %v1447_v48 = vmul.f32 %v3761_v47, %v1415_v9  ;;  %v1378_v16 = vsel %vm1376_vm6, %v1377_v35, %v1375_v11  ;;  %v1361_v13 = vsel %vm1360_vm7, %v4999_v50, %v1359_v18  ;;  %v3591_v25 = vpop.eup %3590  ;;  %v3762_v11 = vld [vmem:[#allocation9 + $0x58] sm:$0xff] }
 0x3f0   :  { %v1418_v42 = vmul.f32 0.5, %v1378_v16  ;;  %v1394_v26 = vmul.f32 %v3589_v62, %v5061_v63  ;;  %v5942_v9 = vsub.f32 %v5938_v22, %v5941_v17  ;;  %vm1395_vm9 = vcmp.eq.f32.partialorder %v5061_v63, inf  ;;  %v3593_v35 = vpop.eup %3592 }
 0x3f1   :  { %v1642_v30 = vmul.f32 %v3760_v57, %v1465_v27  ;;  %v5939_v57 = vld [vmem:[#allocation47_spill] sm:$0xff]  ;;  %v1364_v62 = vsel %vm1362_vm8, %v1363_v6, %v1361_v13  ;;  %vm1397_vm10 = vcmp.eq.f32.partialorder %v5061_v63, 0.0  ;;  %v1398_v50 = vand.u32 2147483648, %v5061_v63 }
 0x3f2   :  { %v5940_v27 = vsub.f32 %v5938_v22, %v5939_v57  ;;  %v1511_v2 = vsub.f32 %v5942_v9, %v1495_v61  ;;  %v1450_v18 = vmul.f32 %v3762_v11, %v1418_v42  ;;  %v1498_v16 = vmul.f32 %v1418_v42, %v181_v32  ;;  %v5943_v61 = vld [vmem:[#allocation35_spill] sm:$0xff]  ;;  %v5944_v22 = vld [vmem:[#allocation49_spill] sm:$0xff]  ;;  %v5946_v32 = vld [vmem:[#allocation46_spill] sm:$0xff] }
 0x3f3   :  { %v5178_v7 = vadd.f32 %v5934_v53, %v1642_v30  ;;  %v1396_v53 = vsel %vm1395_vm9, %v5061_v63, %v1394_v26  ;;  %v3595_v30 = vpop.eup %3594  ;;  %v5945_v17 = vsub.f32 %v5943_v61, %v5944_v22  ;;  %v5947_v42 = vsub.f32 %v5943_v61, %v5946_v32  ;;  %v5948_v63 = vld [vmem:[#allocation36_spill] sm:$0xff]  ;;  %v3764_v32 = vld [vmem:[#allocation9 + $0x70] sm:$0xff] }
 0x3f4   :  { %v1463_v19 = vsub.f32 %v5940_v27, %v1447_v48  ;;  %v1416_v27 = vmul.f32 0.5, %v1364_v62  ;;  %v1380_v13 = vmul.f32 %v3591_v25, %v5076_v41  ;;  %vm1381_vm11 = vcmp.eq.f32.partialorder %v5076_v41, inf  ;;  %v184_v62 = vld [vmem:[#allocation10 + $0x70] sm:$0xff]  ;;  %v5949_v25 = vld [vmem:[#allocation52_spill] sm:$0xff] }
 0x3f5   :  { %v5191_v39 = vadd.f32 %v5178_v7, %v1513_v12  ;;  %v1466_v9 = vsub.f32 %v5945_v17, %v1450_v18  ;;  %v1514_v49 = vsub.f32 %v5947_v42, %v1498_v16  ;;  %v3763_v12 = vld [vmem:[#allocation9 + $0x48] sm:$0xff]  ;;  %v1399_v20 = vsel %vm1397_vm10, %v1398_v50, %v1396_v53 }
 0x3f6   :  { %v1640_v48 = vmul.f32 %v3761_v47, %v1463_v19  ;;  %v1448_v47 = vmul.f32 %v3763_v12, %v1416_v27  ;;  %v1496_v26 = vmul.f32 %v1416_v27, %v179_v36  ;;  %v1382_v18 = vsel %vm1381_vm11, %v5076_v41, %v1380_v13 }
 0x3f7   :  { %v1643_v19 = vmul.f32 %v3762_v11, %v1466_v9  ;;  %vm1383_vm12 = vcmp.eq.f32.partialorder %v5076_v41, 0.0  ;;  %v5950_v61 = vsub.f32 %v5948_v63, %v5949_v25  ;;  %v1421_v27 = vmul.f32 0.5, %v1399_v20 }
 0x3f8   :  { %v5203_v6 = vadd.f32 %v5939_v57, %v1640_v48  ;;  %v5951_v48 = vld [vmem:[#allocation48_spill] sm:$0xff]  ;;  %v1384_v53 = vand.u32 2147483648, %v5076_v41  ;;  %v1401_v9 = vmul.f32 %v3595_v30, %v5103_v24  ;;  %vm1402_vm13 = vcmp.eq.f32.partialorder %v5103_v24, inf }
 0x3f9   :  { %v1464_v57 = vsub.f32 %v5950_v61, %v1448_v47  ;;  %v5952_v17 = vsub.f32 %v5948_v63, %v5951_v48  ;;  %v5218_v11 = vadd.f32 %v5944_v22, %v1643_v19  ;;  %v1453_v42 = vmul.f32 %v3764_v32, %v1421_v27  ;;  %v182_v47 = vld [vmem:[#allocation10 + $0x60] sm:$0xff]  ;;  %v5954_v19 = vld [vmem:[#allocation53_spill] sm:$0xff]  ;;  %v5956_v61 = vld [vmem:[#allocation50_spill] sm:$0xff] }
 0x3fa   :  { %v5209_v16 = vadd.f32 %v5203_v6, %v1511_v2  ;;  %v1501_v50 = vmul.f32 %v1421_v27, %v184_v62  ;;  %vm1404_vm14 = vcmp.eq.f32.partialorder %v5103_v24, 0.0  ;;  %v1385_v20 = vsel %vm1383_vm12, %v1384_v53, %v1382_v18 }
 0x3fb   :  { %v1512_v36 = vsub.f32 %v5952_v17, %v1496_v26  ;;  %v1641_v2 = vmul.f32 %v3763_v12, %v1464_v57  ;;  %v5225_v13 = vadd.f32 %v5218_v11, %v1514_v49  ;;  %v1403_v22 = vsel %vm1402_vm13, %v5103_v24, %v1401_v9  ;;  %v5953_v12 = vld [vmem:[#allocation37_spill] sm:$0xff]  ;;  %v185_v9 = vld [vmem:[#allocation10 + $0x78] sm:$0xff] }
 0x3fc   :  { %v1405_v26 = vand.u32 2147483648, %v5103_v24  ;;  %v5955_v63 = vsub.f32 %v5953_v12, %v5954_v19  ;;  %v5957_v57 = vsub.f32 %v5953_v12, %v5956_v61  ;;  %v1419_v48 = vmul.f32 0.5, %v1385_v20  ;;  %v215_v61 = vld [vmem:[#allocation13 + $0x68] sm:$0xff] }
 0x3fd   :  { %v5232_v30 = vadd.f32 %v5949_v25, %v1641_v2  ;;  %v1387_v41 = vmul.f32 %v3593_v35, %v5068_v28  ;;  %vm1388_vm15 = vcmp.eq.f32.partialorder %v5068_v28, inf  ;;  %vm1390_vm0 = vcmp.eq.f32.partialorder %v5068_v28, 0.0  ;;  %v3765_v25 = vld [vmem:[#allocation9 + $0x60] sm:$0xff] }
 0x3fe   :  { %v1469_v62 = vsub.f32 %v5955_v63, %v1453_v42  ;;  %v1517_v49 = vsub.f32 %v5957_v57, %v1501_v50  ;;  %v1406_v17 = vsel %vm1404_vm14, %v1405_v26, %v1403_v22  ;;  %v1451_v27 = vmul.f32 %v3765_v25, %v1419_v48  ;;  %v5958_v22 = vld [vmem:[#allocation38_spill] sm:$0xff] }
 0x3ff   :  { %v5244_v24 = vadd.f32 %v5232_v30, %v1512_v36  ;;  %v1499_v53 = vmul.f32 %v1419_v48, %v182_v47  ;;  %v1422_v2 = vmul.f32 0.5, %v1406_v17  ;;  %v1389_v42 = vsel %vm1388_vm15, %v5068_v28, %v1387_v41  ;;  %v5959_v26 = vld [vmem:[#allocation54_spill] sm:$0xff]  ;;  %v183_v41 = vld [vmem:[#allocation10 + $0x68] sm:$0xff] }
 0x400   :  { %v1646_v18 = vmul.f32 %v3764_v32, %v1469_v62  ;;  %v1391_v50 = vand.u32 2147483648, %v5068_v28  ;;  %v5960_v36 = vsub.f32 %v5958_v22, %v5959_v26  ;;  %v5961_v32 = vld [vmem:[#allocation51_spill] sm:$0xff]  ;;  %v3766_v57 = vld [vmem:[#allocation9 + $0x78] sm:$0xff]  ;;  %v5965_v28 = vsub.f32 %v5902_v21, %v5093_v58 }
 0x401   :  { %v5962_v63 = vsub.f32 %v5958_v22, %v5961_v32  ;;  %v1454_v48 = vmul.f32 %v3766_v57, %v1422_v2  ;;  %v1502_v17 = vmul.f32 %v1422_v2, %v185_v9  ;;  %v3767_v32 = vld [vmem:[#allocation12 + $0x68] sm:$0xff]  ;;  %v5964_v9 = vsub.f32 %v5902_v21, %v4930_v34 }
 0x402   :  { %v5251_v20 = vadd.f32 %v5954_v19, %v1646_v18  ;;  %v1467_v12 = vsub.f32 %v5960_v36, %v1451_v27  ;;  %v1392_v19 = vsel %vm1390_vm0, %v1391_v50, %v1389_v42 }
 0x403   :  { %v1515_v47 = vsub.f32 %v5962_v63, %v1499_v53  ;;  %v1420_v22 = vmul.f32 0.5, %v1392_v19  ;;  %v5963_v63 = vld [vmem:[#allocation40_spill] sm:$0xff]  ;;  %v1470_v2 = vsub.f32 %v5964_v9, %v1454_v48  ;;  %v1518_v42 = vsub.f32 %v5965_v28, %v1502_v17 }
 0x404   :  { %v5266_v27 = vadd.f32 %v5251_v20, %v1517_v49  ;;  %v1644_v36 = vmul.f32 %v3765_v25, %v1467_v12  ;;  %v1436_v62 = vsub.f32 %v5963_v63, %v3767_v32  ;;  %v2055_v49 = vpack.c.bf16 %v5218_v11, %v5178_v7  ;;  %v3768_v12 = vld [vmem:[#allocation9 + $0x68] sm:$0xff] }
 0x405   :  { %v1484_v25 = vsub.f32 %v5963_v63, %v215_v61  ;;  %v1452_v19 = vmul.f32 %v3768_v12, %v1420_v22  ;;  %v1500_v53 = vmul.f32 %v1420_v22, %v183_v41  ;;  %v1647_v18 = vmul.f32 %v3766_v57, %v1470_v2  ;;  %v5966_v2 = vld [vmem:[#allocation55_spill] sm:$0xff] }
 0x406   :  { %v5281_v50 = vadd.f32 %v5959_v26, %v1644_v36 }
 0x407   :  { %v1468_v48 = vsub.f32 %v1436_v62, %v1452_v19  ;;  %v1516_v9 = vsub.f32 %v1484_v25, %v1500_v53  ;;  %v5287_v21 = vadd.f32 %v4930_v34, %v1647_v18  ;;  %v5967_v25 = vld [vmem:[#allocation57_spill] sm:$0xff] }
 0x408   :  { %v5284_v35 = vadd.f32 %v5281_v50, %v1515_v47 }
 0x409   :  { %v1645_v58 = vmul.f32 %v3768_v12, %v1468_v48  ;;  %v5290_v17 = vadd.f32 %v5287_v21, %v1518_v42  ;;  %v2057_v26 = vpack.c.bf16 %v5287_v21, %v5251_v20  ;;  %v3770_v42 = vld [vmem:[#allocation7 + $0x18] sm:$0xff] }
 0x40a   :  { %v5309_v12 = vsub.f32 %v3770_v42, %v5967_v25  ;;  %v3776_v42 = vld [vmem:[#allocation7 + $0x48] sm:$0xff] }
 0x40b   :  { %v5294_v61 = vadd.f32 %v3767_v32, %v1645_v58  ;;  %v3769_v32 = vld [vmem:[#allocation7 + $0x10] sm:$0xff] }
 0x40c   :  { %v5306_v28 = vsub.f32 %v3769_v32, %v5966_v2  ;;  %v3775_v2 = vld [vmem:[#allocation7 + $0x40] sm:$0xff] }
 0x40d   :  { %v5297_v41 = vadd.f32 %v5294_v61, %v1516_v9  ;;  %v2056_v47 = vpack.c.bf16 %v5294_v61, %v5281_v50  ;;  %v3771_v9 = vld [vmem:[#allocation7 + $0x20] sm:$0xff] }
 0x4a1   :  { %v3256_v62 = vpop.f32.mrb[16].mxu0 }
 0x4a2   :  { %v1682_v57 = vsub.f32 %v4979_v4, %v3256_v62  ;;  %v1569_v34 = vpop.f32.mrb[17].mxu0 }
 0x4a3   :  { %v1680_v18 = vsub.f32 %v4982_v40, %v1569_v34  ;;  %v3257_v36 = vpop.f32.mrb[18].mxu0  ;;  %v1528_v40 = vpack.c.bf16 %v5309_v12, %v5306_v28 }
 0x4a4   :  { %v1683_v22 = vsub.f32 %v5042_v54, %v3257_v36  ;;  %v1572_v53 = vpop.f32.mrb[19].mxu0  ;;  %v5314_v54 = vsub.f32 %v3771_v9, %v4961_v60 }
 0x4a5   :  { %v1681_v63 = vsub.f32 %v5020_v1, %v1572_v53  ;;  %v3772_v1 = vld [vmem:[#allocation7 + $0x28] sm:$0xff]  ;;  %v3773_v53 = vld [vmem:[#allocation7 + $0x30] sm:$0xff] }
 0x4a6   :  { %v1697_v19 = vpack.c.bf16 %v1683_v22, %v1682_v57  ;;  %v5317_v58 = vsub.f32 %v3772_v1, %v4986_v46  ;;  %v3774_v46 = vld [vmem:[#allocation7 + $0x38] sm:$0xff] }
 0x4a7   :  { %v1696_v48 = vpack.c.bf16 %v1681_v63, %v1680_v18  ;;  %v5325_v63 = vsub.f32 %v3773_v53, %v4952_v33  ;;  %v5335_v33 = vsub.f32 %v3775_v2, %v5033_v23  ;;  %v3777_v23 = vld [vmem:[#allocation7 + $0x50] sm:$0xff] }
 0x4a9   :  { %v3260_v4 = vpop.f32.mrb[20].mxu0  ;;  %3286 = vmatprep.mubr.bf16.mxu1 %v1696_v48 }
 0x4aa   :  { %v1686_v62 = vsub.f32 %v5108_v44, %v3260_v4  ;;  %v1585_v34 = vpop.f32.mrb[21].mxu0  ;;  %3287 = vmatmul.mubr.bf16.vlgmr.msra.gmra.mrb[64].mxu1 %v1697_v19  ;;  %v5328_v44 = vsub.f32 %v3774_v46, %v4976_v59  ;;  %v5338_v59 = vsub.f32 %v3776_v42, %v5047_v0  ;;  %v3778_v0 = vld [vmem:[#allocation7 + $0x58] sm:$0xff] }
 0x4ab   :  { %v1684_v57 = vsub.f32 %v5130_v14, %v1585_v34  ;;  %3335 = vmatpush3.bf16.msra.mxu1 %v4943_v10  ;;  %v3261_v18 = vpop.f32.mrb[22].mxu0  ;;  %v1529_v14 = vpack.c.bf16 %v5317_v58, %v5314_v54  ;;  %v5348_v34 = vsub.f32 %v3778_v0, %v5039_v55 }
 0x4ac   :  { %v1687_v36 = vsub.f32 %v5147_v51, %v3261_v18  ;;  %3336 = vmatprep.subr.bf16.mxu1 %v1528_v40  ;;  %v1588_v22 = vpop.f32.mrb[23].mxu0  ;;  %v3779_v18 = vld [vmem:[#allocation7 + $0x60] sm:$0xff] }
 0x4ad   :  { %v1685_v60 = vsub.f32 %v5160_v45, %v1588_v22  ;;  %v1530_v45 = vpack.c.bf16 %v5328_v44, %v5325_v63 }
 0x4ae   :  { %v1699_v32 = vpack.c.bf16 %v1687_v36, %v1686_v62  ;;  %v5345_v62 = vsub.f32 %v3777_v23, %v5023_v8  ;;  %v5355_v8 = vsub.f32 %v3779_v18, %v5105_v15  ;;  %v3780_v36 = vld [vmem:[#allocation7 + $0x68] sm:$0xff]  ;;  %v3781_v15 = vld [vmem:[#allocation7 + $0x70] sm:$0xff] }
 0x4af   :  { %v1698_v10 = vpack.c.bf16 %v1685_v60, %v1684_v57  ;;  %3337 = vmatpush3.bf16.msra.mxu1 %v1528_v40  ;;  %v5358_v55 = vsub.f32 %v3780_v36, %v5124_v38  ;;  %v3782_v38 = vld [vmem:[#allocation7 + $0x78] sm:$0xff]  ;;  %v5975_v18 = vld [vmem:[#allocation56_spill] sm:$0xff] }
 0x4b0   :  { %3338 = vmatprep.subr.bf16.mxu1 %v1529_v14 }
 0x4b1   :  { %v3264_v51 = vpop.f32.mrb[24].mxu0  ;;  %3290 = vmatprep.mubr.bf16.mxu1 %v1698_v10 }
 0x4b2   :  { %v1690_v25 = vsub.f32 %v5191_v39, %v3264_v51  ;;  %v1601_v19 = vpop.f32.mrb[25].mxu0  ;;  %3291 = vmatmul.mubr.bf16.gmra.mrb[68].mxu1 %v1699_v32  ;;  %v1531_v39 = vpack.c.bf16 %v5338_v59, %v5335_v33  ;;  %v5365_v51 = vsub.f32 %v3781_v15, %v5096_v5  ;;  %v5968_v5 = vpack.c.bf16 %v5005_v31, %v4958_v52 }
 0x4b3   :  { %v1688_v48 = vsub.f32 %v5209_v16, %v1601_v19  ;;  %3339 = vmatpush3.bf16.msra.mxu1 %v1529_v14  ;;  %v3265_v4 = vpop.f32.mrb[26].mxu0  ;;  %v5973_v19 = vpack.c.bf16 %v5140_v3, %v5091_v29 }
 0x4b4   :  { %v1691_v40 = vsub.f32 %v5225_v13, %v3265_v4  ;;  %3340 = vmatprep.subr.bf16.mxu1 %v1530_v45  ;;  %v1604_v9 = vpop.f32.mrb[27].mxu0 }
 0x4b5   :  { %v1689_v1 = vsub.f32 %v5244_v24, %v1604_v9  ;;  %v1532_v24 = vpack.c.bf16 %v5348_v34, %v5345_v62 }
 0x4b6   :  { %v1701_v16 = vpack.c.bf16 %v1691_v40, %v1690_v25  ;;  %v5972_v25 = vpack.c.bf16 %v5153_v56, %v5119_v43 }
 0x4b7   :  { %v1700_v57 = vpack.c.bf16 %v1689_v1, %v1688_v48  ;;  %3341 = vmatpush3.bf16.msra.mxu1 %v1530_v45  ;;  %v5368_v45 = vsub.f32 %v3782_v38, %v5116_v37  ;;  %v5969_v37 = vld [vmem:[#allocation59_spill] sm:$0xff]  ;;  %v5974_v48 = vpack.c.bf16 %v5232_v30, %v5203_v6  ;;  %v5976_v38 = vld [vmem:[#allocation58_spill] sm:$0xff] }
 0x4b8   :  { %3342 = vmatprep.subr.bf16.mxu1 %v1531_v39 }
 0x4b9   :  { %3294 = vmatprep.mubr.bf16.mxu1 %v1700_v57 }
 0x4ba   :  { %v3268_v13 = vpop.f32.mrb[28].mxu0  ;;  %3295 = vmatmul.mubr.bf16.gmra.mrb[72].mxu1 %v1701_v16 }
 0x4bb   :  { %v1694_v22 = vsub.f32 %v5266_v27, %v3268_v13  ;;  %v1617_v60 = vpop.f32.mrb[29].mxu0  ;;  %3343 = vmatpush3.bf16.msra.mxu1 %v1531_v39  ;;  %v1533_v27 = vpack.c.bf16 %v5358_v55, %v5355_v8 }
 0x4bc   :  { %v1692_v53 = vsub.f32 %v5284_v35, %v1617_v60  ;;  %v3269_v46 = vpop.f32.mrb[30].mxu0  ;;  %3344 = vmatprep.subr.bf16.mxu1 %v1532_v24 }
 0x4bd   :  { %v1695_v14 = vsub.f32 %v5290_v17, %v3269_v46  ;;  %v1620_v32 = vpop.f32.mrb[31].mxu0  ;;  %v1534_v17 = vpack.c.bf16 %v5368_v45, %v5365_v51 }
 0x4be   :  { %v1693_v10 = vsub.f32 %v5297_v41, %v1620_v32  ;;  %v5970_v41 = vld [vmem:[#allocation39_spill] sm:$0xff] }
 0x4bf   :  { %v1703_v35 = vpack.c.bf16 %v1695_v14, %v1694_v22  ;;  %3345 = vmatpush3.bf16.msra.mxu1 %v1532_v24  ;;  %v5971_v42 = vpack.c.bf16 %v5969_v37, %v5970_v41  ;;  %v3784_v14 = vld [vmem:[#allocation15 + $0x10] sm:$0xff]   ;;  %v3786_v37 = vld [vmem:[#allocation15 + $0x20] sm:$0xff]  }
 0x4c0   :  { %v1702_v2 = vpack.c.bf16 %v1693_v10, %v1692_v53  ;;  %3346 = vmatprep.subr.bf16.mxu1 %v1533_v27  ;;  %v3783_v53 = vld [vmem:[#allocation15 + $0x8] sm:$0xff]  }
 0x4c2   :  { %3298 = vmatprep.mubr.bf16.mxu1 %v1702_v2 }
 0x4c3   :  { %3299 = vmatmul.mubr.bf16.gmra.mrb[76].mxu1 %v1703_v35 }
 0x4c4   :  { %3347 = vmatpush3.bf16.msra.mxu1 %v1533_v27  ;;  %3350 = vmatprep.mubr.bf16.mxu1 %v5968_v5 }
 0x4c5   :  { %3348 = vmatprep.subr.bf16.mxu1 %v1534_v17 }
 0x4c8   :  { %3349 = vmatpush3.bf16.msra.mxu1 %v1534_v17  ;;  %v3785_v17 = vld [vmem:[#allocation15 + $0x18] sm:$0xff]  }
 0x4cb   :  { %3351 = vmatmul.mubr.bf16.vlgmr.msra.gmra.mrb[80].mxu1 %v5971_v42 }
 0x4cc   :  { %3354 = vmatprep.mubr.bf16.mxu1 %v5972_v25 }
 0x4d3   :  { %3355 = vmatmul.mubr.bf16.gmra.mrb[84].mxu1 %v5973_v19 }
 0x4d4   :  { %3358 = vmatprep.mubr.bf16.mxu1 %v5974_v48 }
 0x4db   :  { %3359 = vmatmul.mubr.bf16.gmra.mrb[88].mxu1 %v2055_v49 }
 0x4dc   :  { %3362 = vmatprep.mubr.bf16.mxu1 %v2056_v47 }
 0x4e3   :  { %3363 = vmatmul.mubr.bf16.gmra.mrb[92].mxu1 %v2057_v26 }
 0x57d   :  { %v3288_v52 = vpop.f32.mrb[64].mxu1 }
 0x57e   :  { %v1738_v31 = vpop.f32.mrb[65].mxu1 }
 0x57f   :  { %v3289_v29 = vpop.f32.mrb[66].mxu1 }
 0x580   :  { %v1802_v43 = vpack.c.bf16 %v3289_v29, %v3288_v52  ;;  %v1741_v3 = vpop.f32.mrb[67].mxu1  ;;  %v3787_v29 = vld [vmem:[#allocation15 + $0x28] sm:$0xff]  }
 0x581   :  { %v1801_v56 = vpack.c.bf16 %v1741_v3, %v1738_v31  ;;  %v3788_v3 = vld [vmem:[#allocation15 + $0x30] sm:$0xff]  }
 0x583   :  { %3302 = vmatprep.subr.bf16.mxu0 %v1801_v56 }
 0x584   :  { %3303 = vmatpush3.bf16.msra.mxu0 %v1801_v56 }
 0x585   :  { %v3292_v6 = vpop.f32.mrb[68].mxu1  ;;  %3304 = vmatprep.subr.bf16.mxu0 %v1802_v43 }
 0x586   :  { %v1754_v7 = vpop.f32.mrb[69].mxu1 }
 0x587   :  { %v3293_v11 = vpop.f32.mrb[70].mxu1 }
 0x588   :  { %v1804_v30 = vpack.c.bf16 %v3293_v11, %v3292_v6  ;;  %v1757_v49 = vpop.f32.mrb[71].mxu1  ;;  %3305 = vmatpush3.bf16.msra.mxu0 %v1802_v43 }
 0x589   :  { %v1803_v50 = vpack.c.bf16 %v1757_v49, %v1754_v7 }
 0x58b   :  { %3306 = vmatprep.subr.bf16.mxu0 %v1803_v50 }
 0x58c   :  { %3307 = vmatpush3.bf16.msra.mxu0 %v1803_v50 }
 0x58d   :  { %v3296_v20 = vpop.f32.mrb[72].mxu1  ;;  %3308 = vmatprep.subr.bf16.mxu0 %v1804_v30 }
 0x58e   :  { %v1770_v21 = vpop.f32.mrb[73].mxu1 }
 0x58f   :  { %v3297_v26 = vpop.f32.mrb[74].mxu1 }
 0x590   :  { %v1806_v61 = vpack.c.bf16 %v3297_v26, %v3296_v20  ;;  %v1773_v47 = vpop.f32.mrb[75].mxu1  ;;  %3309 = vmatpush3.bf16.msra.mxu0 %v1804_v30 }
 0x591   :  { %v1805_v4 = vpack.c.bf16 %v1773_v47, %v1770_v21 }
 0x593   :  { %3310 = vmatprep.subr.bf16.mxu0 %v1805_v4 }
 0x594   :  { %3311 = vmatpush3.bf16.msra.mxu0 %v1805_v4 }
 0x595   :  { %3312 = vmatprep.subr.bf16.mxu0 %v1806_v61 }
 0x596   :  { %v3300_v40 = vpop.f32.mrb[76].mxu1 }
 0x597   :  { %v1786_v9 = vpop.f32.mrb[77].mxu1 }
 0x598   :  { %v3301_v1 = vpop.f32.mrb[78].mxu1  ;;  %3313 = vmatpush3.bf16.msra.mxu0 %v1806_v61 }
 0x599   :  { %v1808_v23 = vpack.c.bf16 %v3301_v1, %v3300_v40  ;;  %v1789_v0 = vpop.f32.mrb[79].mxu1 }
 0x59a   :  { %v1807_v39 = vpack.c.bf16 %v1789_v0, %v1786_v9 }
 0x59c   :  { %3314 = vmatprep.subr.bf16.mxu0 %v1807_v39 }
 0x59d   :  { %3315 = vmatpush3.bf16.msra.mxu0 %v1807_v39 }
 0x59e   :  { %3316 = vmatprep.subr.bf16.mxu0 %v1808_v23  ;;  %v3352_v16 = vpop.f32.mrb[80].mxu1 }
 0x59f   :  { %v5399_v57 = vsub.f32 %v5306_v28, %v3352_v16  ;;  %v2092_v13 = vpop.f32.mrb[81].mxu1 }
 0x5a0   :  { %v3353_v24 = vpop.f32.mrb[82].mxu1  ;;  %v5402_v36 = vsub.f32 %v5975_v18, %v2092_v13 }
 0x5a1   :  { %3317 = vmatpush3.bf16.msra.mxu0 %v1808_v23  ;;  %v2095_v22 = vpop.f32.mrb[83].mxu1  ;;  %v2269_v60 = vmul.f32 %v5399_v57, %v5399_v57  ;;  %v5407_v46 = vsub.f32 %v5309_v12, %v3353_v24 }
 0x5a2   :  { %v2267_v28 = vmul.f32 %v5402_v36, %v5402_v36  ;;  %v5412_v27 = vsub.f32 %v5976_v38, %v2095_v22 }
 0x5a3   :  { %2287 = vadd.xlane.f32.xlu1 %v2269_v60  ;;  %v2270_v2 = vmul.f32 %v5407_v46, %v5407_v46 }
 0x5a4   :  { %3319 = vmatmul.mubr.bf16.vlgmr.msra.gmra.mrb[32].mxu0 %v3783_v53  ;;  %v2268_v5 = vmul.f32 %v5412_v27, %v5412_v27 }
 0x5a5   :  { %3322 = vmatprep.mubr.bf16.mxu0 %v3784_v14 }
 0x5a6   :  { %v3356_v32 = vpop.f32.mrb[84].mxu1 }
 0x5a7   :  { %2283 = vadd.xlane.f32.xlu1 %v2267_v28  ;;  %v2108_v10 = vpop.f32.mrb[85].mxu1  ;;  %v5417_v12 = vsub.f32 %v5325_v63, %v3356_v32 }
 0x5a8   :  { %v3357_v15 = vpop.f32.mrb[86].mxu1  ;;  %v5422_v19 = vsub.f32 %v5314_v54, %v2108_v10 }
 0x5a9   :  { %v2111_v35 = vpop.f32.mrb[87].mxu1  ;;  %v2273_v63 = vmul.f32 %v5417_v12, %v5417_v12  ;;  %v5432_v43 = vsub.f32 %v5328_v44, %v3357_v15  ;;  %v3789_v44 = vld [vmem:[#allocation15 + $0x38] sm:$0xff]  }
 0x5aa   :  { %v2271_v54 = vmul.f32 %v5422_v19, %v5422_v19  ;;  %v5439_v7 = vsub.f32 %v5317_v58, %v2111_v35 }
 0x5ab   :  { %2289 = vadd.xlane.f32.xlu1 %v2270_v2  ;;  %v2274_v30 = vmul.f32 %v5432_v43, %v5432_v43 }
 0x5ac   :  { %3323 = vmatmul.mubr.bf16.gmra.mrb[36].mxu0 %v3785_v17  ;;  %v2272_v50 = vmul.f32 %v5439_v7, %v5439_v7 }
 0x5ad   :  { %3326 = vmatprep.mubr.bf16.mxu0 %v3786_v37 }
 0x5ae   :  { %v3360_v41 = vpop.f32.mrb[88].mxu1 }
 0x5af   :  { %2285 = vadd.xlane.f32.xlu1 %v2268_v5  ;;  %v2124_v42 = vpop.f32.mrb[89].mxu1  ;;  %v5444_v49 = vsub.f32 %v5345_v62, %v3360_v41 }
 0x5b0   :  { %v3361_v25 = vpop.f32.mrb[90].mxu1  ;;  %v5449_v20 = vsub.f32 %v5335_v33, %v2124_v42 }
 0x5b1   :  { %v5425_v48 = vsub.f32 %v5348_v34, %v3361_v25  ;;  %v2127_v52 = vpop.f32.mrb[91].mxu1  ;;  %v2277_v58 = vmul.f32 %v5444_v49, %v5444_v49 }
 0x5b2   :  { %v5454_v21 = vsub.f32 %v5338_v59, %v2127_v52  ;;  %v2275_v26 = vmul.f32 %v5449_v20, %v5449_v20 }
 0x5b3   :  { %2295 = vadd.xlane.f32.xlu1 %v2273_v63  ;;  %v2278_v31 = vmul.f32 %v5425_v48, %v5425_v48 }
 0x5b4   :  { %3327 = vmatmul.mubr.bf16.gmra.mrb[40].mxu0 %v3787_v29  ;;  %v2276_v61 = vmul.f32 %v5454_v21, %v5454_v21 }
 0x5b5   :  { %2305 = vadd.xlane.f32.xlu0 %v2278_v31  ;;  %3330 = vmatprep.mubr.bf16.mxu0 %v3788_v3 }
 0x5b6   :  { %v3364_v34 = vpop.f32.mrb[92].mxu1 }
 0x5b7   :  { %2291 = vadd.xlane.f32.xlu1 %v2271_v54  ;;  %v2140_v56 = vpop.f32.mrb[93].mxu1  ;;  %v5459_v62 = vsub.f32 %v5365_v51, %v3364_v34 }
 0x5b8   :  { %v5436_v6 = vpop.f32.mrb[94].mxu1  ;;  %v5464_v33 = vsub.f32 %v5355_v8, %v2140_v56 }
 0x5b9   :  { %v2143_v11 = vpop.f32.mrb[95].mxu1  ;;  %v2281_v47 = vmul.f32 %v5459_v62, %v5459_v62 }
 0x5ba   :  { %v5469_v59 = vsub.f32 %v5358_v55, %v2143_v11  ;;  %v2279_v4 = vmul.f32 %v5464_v33, %v5464_v33 }
 0x5bb   :  { %2297 = vadd.xlane.f32.xlu1 %v2274_v30 }
 0x5bc   :  { %3331 = vmatmul.mubr.bf16.gmra.mrb[44].mxu0 %v3789_v44  ;;  %v2280_v51 = vmul.f32 %v5469_v59, %v5469_v59 }
 0x5bf   :  { %2293 = vadd.xlane.f32.xlu1 %v2272_v50 }
 0x5c3   :  { %2303 = vadd.xlane.f32.xlu1 %v2277_v58 }
 0x5c7   :  { %2299 = vadd.xlane.f32.xlu1 %v2275_v26 }
 0x5cb   :  { %2301 = vadd.xlane.f32.xlu1 %v2276_v61 }
 0x5cf   :  { %2311 = vadd.xlane.f32.xlu1 %v2281_v47 }
 0x5d3   :  { %2307 = vadd.xlane.f32.xlu1 %v2279_v4 }
 0x5d7   :  { %2309 = vadd.xlane.f32.xlu1 %v2280_v51 }
 0x630   :  { %v2288_v40 = vpop.xlane.xlu1 %2287 }
 0x631   :  { %v2317_v9 = vmax.f32 %v2288_v40, 1e-24 }
 0x633   :  { %3596 = vrsqrt.f32 %v2317_v9 }
 0x634   :  { %v2284_v8 = vpop.xlane.xlu1 %2283 }
 0x635   :  { %v2315_v1 = vmax.f32 %v2284_v8, 1e-24 }
 0x637   :  { %3598 = vrsqrt.f32 %v2315_v1 }
 0x638   :  { %v2290_v23 = vpop.xlane.xlu1 %2289 }
 0x639   :  { %v2318_v0 = vmax.f32 %v2290_v23, 1e-24 }
 0x63b   :  { %3600 = vrsqrt.f32 %v2318_v0 }
 0x63c   :  { %v2286_v39 = vpop.xlane.xlu1 %2285 }
 0x63d   :  { %v3597_v55 = vpop.eup %3596  ;;  %v2316_v16 = vmax.f32 %v2286_v39, 1e-24 }
 0x63e   :  { %v5476_v13 = vmul.f32 %v3597_v55, %v5399_v57 }
 0x63f   :  { %3602 = vrsqrt.f32 %v2316_v16 }
 0x640   :  { %v2296_v24 = vpop.xlane.xlu1 %2295 }
 0x641   :  { %v3599_v18 = vpop.eup %3598  ;;  %v2321_v22 = vmax.f32 %v2296_v24, 1e-24 }
 0x642   :  { %v5479_v60 = vmul.f32 %v3599_v18, %v5402_v36  ;;  %v2306_v53 = vpop.xlane.xlu0 %2305 }
 0x643   :  { %3604 = vrsqrt.f32 %v2321_v22  ;;  %v2326_v28 = vmax.f32 %v2306_v53, 1e-24 }
 0x644   :  { %v2292_v14 = vpop.xlane.xlu1 %2291 }
 0x645   :  { %v3601_v32 = vpop.eup %3600  ;;  %3606 = vrsqrt.f32 %v2326_v28  ;;  %v2319_v10 = vmax.f32 %v2292_v14, 1e-24 }
 0x646   :  { %v5482_v15 = vmul.f32 %v3601_v32, %v5407_v46 }
 0x647   :  { %3608 = vrsqrt.f32 %v2319_v10 }
 0x648   :  { %v2298_v57 = vpop.xlane.xlu1 %2297 }
 0x649   :  { %v3603_v38 = vpop.eup %3602  ;;  %v2322_v35 = vmax.f32 %v2298_v57, 1e-24 }
 0x64a   :  { %v5485_v2 = vmul.f32 %v3603_v38, %v5412_v27 }
 0x64b   :  { %3610 = vrsqrt.f32 %v2322_v35 }
 0x64c   :  { %v2294_v36 = vpop.xlane.xlu1 %2293 }
 0x64d   :  { %v3605_v17 = vpop.eup %3604  ;;  %v2320_v5 = vmax.f32 %v2294_v36, 1e-24 }
 0x64e   :  { %v5488_v37 = vmul.f32 %v3605_v17, %v5417_v12 }
 0x64f   :  { %v3607_v41 = vpop.eup %3606  ;;  %3612 = vrsqrt.f32 %v2320_v5 }
 0x650   :  { %v5491_v42 = vmul.f32 %v3607_v41, %v5425_v48  ;;  %v2304_v46 = vpop.xlane.xlu1 %2303 }
 0x651   :  { %v3609_v25 = vpop.eup %3608  ;;  %v2325_v52 = vmax.f32 %v2304_v46, 1e-24 }
 0x652   :  { %v5494_v63 = vmul.f32 %v3609_v25, %v5422_v19 }
 0x653   :  { %3614 = vrsqrt.f32 %v2325_v52 }
 0x654   :  { %v2300_v27 = vpop.xlane.xlu1 %2299 }
 0x655   :  { %v3611_v31 = vpop.eup %3610  ;;  %v2323_v29 = vmax.f32 %v2300_v27, 1e-24 }
 0x656   :  { %v5497_v54 = vmul.f32 %v3611_v31, %v5432_v43 }
 0x657   :  { %3616 = vrsqrt.f32 %v2323_v29 }
 0x658   :  { %v2302_v12 = vpop.xlane.xlu1 %2301 }
 0x659   :  { %v3613_v3 = vpop.eup %3612  ;;  %v2324_v34 = vmax.f32 %v2302_v12, 1e-24 }
 0x65a   :  { %v5500_v48 = vmul.f32 %v3613_v3, %v5439_v7 }
 0x65b   :  { %3618 = vrsqrt.f32 %v2324_v34 }
 0x65c   :  { %v2312_v56 = vpop.xlane.xlu1 %2311 }
 0x65d   :  { %v3615_v11 = vpop.eup %3614  ;;  %v2329_v30 = vmax.f32 %v2312_v56, 1e-24 }
 0x65e   :  { %v5503_v19 = vmul.f32 %v3615_v11, %v5444_v49 }
 0x65f   :  { %3620 = vrsqrt.f32 %v2329_v30 }
 0x660   :  { %v2308_v44 = vpop.xlane.xlu1 %2307 }
 0x661   :  { %v3617_v50 = vpop.eup %3616  ;;  %v2327_v58 = vmax.f32 %v2308_v44, 1e-24 }
 0x662   :  { %v5506_v43 = vmul.f32 %v3617_v50, %v5449_v20 }
 0x663   :  { %3622 = vrsqrt.f32 %v2327_v58 }
 0x664   :  { %v2310_v26 = vpop.xlane.xlu1 %2309 }
 0x665   :  { %v3619_v61 = vpop.eup %3618  ;;  %v2328_v47 = vmax.f32 %v2310_v26, 1e-24 }
 0x666   :  { %v5509_v7 = vmul.f32 %v3619_v61, %v5454_v21 }
 0x667   :  { %3624 = vrsqrt.f32 %v2328_v47 }
 0x669   :  { %v3621_v4 = vpop.eup %3620 }
 0x66a   :  { %v5512_v51 = vmul.f32 %v3621_v4, %v5459_v62 }
 0x66d   :  { %v3623_v49 = vpop.eup %3622 }
 0x66e   :  { %v5515_v40 = vmul.f32 %v3623_v49, %v5464_v33  ;;  %v5977_v49 = vld [vmem:[#allocation41_spill] sm:$0xff] }
 0x671   :  { %v3625_v9 = vpop.eup %3624 }
 0x672   :  { %v5518_v20 = vmul.f32 %v3625_v9, %v5469_v59 }
 0x677   :  { %v3320_v8 = vpop.f32.mrb[32].mxu0 }
 0x678   :  { %v2846_v1 = vmul.f32 -1.442695, %v3320_v8  ;;  %v1843_v23 = vpop.f32.mrb[33].mxu0 }
 0x679   :  { %v2844_v0 = vmul.f32 -1.442695, %v1843_v23  ;;  %v3321_v39 = vpop.f32.mrb[34].mxu0 }
 0x67a   :  { %3626 = vpow2.f32 %v2846_v1  ;;  %v2847_v21 = vmul.f32 -1.442695, %v3321_v39  ;;  %v1846_v55 = vpop.f32.mrb[35].mxu0 }
 0x67b   :  { %3628 = vpow2.f32 %v2844_v0  ;;  %v2845_v16 = vmul.f32 -1.442695, %v1846_v55 }
 0x67c   :  { %3630 = vpow2.f32 %v2847_v21 }
 0x67d   :  { %3632 = vpow2.f32 %v2845_v16  ;;  %v3790_v16 = vld [vmem:[#allocation4 + $0x10] sm:$0xff] }
 0x67f   :  { %v3324_v62 = vpop.f32.mrb[36].mxu0 }
 0x680   :  { %v2850_v24 = vmul.f32 -1.442695, %v3324_v62  ;;  %v1859_v33 = vpop.f32.mrb[37].mxu0 }
 0x681   :  { %v2848_v18 = vmul.f32 -1.442695, %v1859_v33  ;;  %v3325_v22 = vpop.f32.mrb[38].mxu0 }
 0x682   :  { %3634 = vpow2.f32 %v2850_v24  ;;  %v2851_v59 = vmul.f32 -1.442695, %v3325_v22  ;;  %v1862_v53 = vpop.f32.mrb[39].mxu0  ;;  %v3791_v22 = vld [vmem:[#allocation4] sm:$0xff] }
 0x683   :  { %3636 = vpow2.f32 %v2848_v18  ;;  %v2849_v38 = vmul.f32 -1.442695, %v1862_v53 }
 0x684   :  { %v3627_v28 = vpop.eup %3626  ;;  %3638 = vpow2.f32 %v2851_v59 }
 0x685   :  { %v3629_v14 = vpop.eup %3628  ;;  %v1956_v32 = vadd.f32 1.0, %v3627_v28 }
 0x686   :  { %v3631_v10 = vpop.eup %3630  ;;  %v1954_v57 = vadd.f32 1.0, %v3629_v14 }
 0x687   :  { %v3633_v35 = vpop.eup %3632  ;;  %3640 = vrcp.f32 %v1956_v32  ;;  %v1957_v36 = vadd.f32 1.0, %v3631_v10  ;;  %v3328_v17 = vpop.f32.mrb[40].mxu0 }
 0x688   :  { %3642 = vrcp.f32 %v1954_v57  ;;  %v1955_v5 = vadd.f32 1.0, %v3633_v35  ;;  %v2854_v41 = vmul.f32 -1.442695, %v3328_v17  ;;  %v1875_v46 = vpop.f32.mrb[41].mxu0  ;;  %v3792_v35 = vld [vmem:[#allocation4 + $0x18] sm:$0xff] }
 0x689   :  { %3644 = vrcp.f32 %v1957_v36  ;;  %v3329_v25 = vpop.f32.mrb[42].mxu0  ;;  %v2852_v12 = vmul.f32 -1.442695, %v1875_v46 }
 0x68a   :  { %3646 = vpow2.f32 %v2849_v38  ;;  %v1878_v52 = vpop.f32.mrb[43].mxu0  ;;  %v2855_v58 = vmul.f32 -1.442695, %v3329_v25 }
 0x68b   :  { %3648 = vrcp.f32 %v1955_v5  ;;  %v2853_v55 = vmul.f32 -1.442695, %v1878_v52 }
 0x68c   :  { %v3635_v27 = vpop.eup %3634  ;;  %3650 = vpow2.f32 %v2854_v41 }
 0x68d   :  { %v3637_v31 = vpop.eup %3636  ;;  %v1960_v29 = vadd.f32 1.0, %v3635_v27 }
 0x68e   :  { %v1958_v3 = vadd.f32 1.0, %v3637_v31  ;;  %v3639_v56 = vpop.eup %3638  ;;  %v3793_v31 = vld [vmem:[#allocation4 + $0x8] sm:$0xff] }
 0x68f   :  { %3652 = vrcp.f32 %v1960_v29  ;;  %v3332_v34 = vpop.f32.mrb[44].mxu0  ;;  %v1961_v4 = vadd.f32 1.0, %v3639_v56  ;;  %v3794_v56 = vld [vmem:[#allocation4 + $0x30] sm:$0xff] }
 0x690   :  { %v1891_v11 = vpop.f32.mrb[45].mxu0  ;;  %3654 = vpow2.f32 %v2852_v12  ;;  %v2858_v33 = vmul.f32 -1.442695, %v3332_v34 }
 0x691   :  { %v3641_v30 = vpop.eup %3640  ;;  %v3333_v44 = vpop.f32.mrb[46].mxu0  ;;  %3656 = vrcp.f32 %v1958_v3  ;;  %v2856_v41 = vmul.f32 -1.442695, %v1891_v11 }
 0x692   :  { %v3643_v50 = vpop.eup %3642  ;;  %v2004_v26 = vmul.f32 0.0, %v3641_v30  ;;  %v1894_v61 = vpop.f32.mrb[47].mxu0  ;;  %3658 = vpow2.f32 %v2855_v58  ;;  %v2859_v34 = vmul.f32 -1.442695, %v3333_v44 }
 0x693   :  { %v3645_v47 = vpop.eup %3644  ;;  %v2002_v9 = vmul.f32 %v3643_v50, %v5977_v49  ;;  %3660 = vrcp.f32 %v1961_v4 }
 0x694   :  { %v3647_v8 = vpop.eup %3646  ;;  %v2020_v1 = vmul.f32 0.5, %v2004_v26  ;;  %v2005_v23 = vmul.f32 0.0, %v3645_v47  ;;  %3662 = vpow2.f32 %v2853_v55 }
 0x695   :  { %v3649_v0 = vpop.eup %3648  ;;  %v2018_v39 = vmul.f32 0.5, %v2002_v9  ;;  %v1959_v24 = vadd.f32 1.0, %v3647_v8  ;;  %v2857_v9 = vmul.f32 -1.442695, %v1894_v61 }
 0x696   :  { %v3651_v21 = vpop.eup %3650  ;;  %v5521_v62 = vadd.f32 %v3790_v16, %v2020_v1  ;;  %v2021_v53 = vmul.f32 0.5, %v2005_v23  ;;  %v2003_v28 = vmul.f32 0.0, %v3649_v0  ;;  %v3795_v23 = vld [vmem:[#allocation4 + $0x20] sm:$0xff] }
 0x697   :  { %v5525_v59 = vadd.f32 %v3791_v22, %v2018_v39  ;;  %v1964_v32 = vadd.f32 1.0, %v3651_v21  ;;  %3664 = vrcp.f32 %v1959_v24 }
 0x698   :  { %v2173_v18 = vmul.f32 %v5521_v62, %v5521_v62  ;;  %v5529_v36 = vadd.f32 %v3792_v35, %v2021_v53  ;;  %3666 = vpow2.f32 %v2858_v33  ;;  %v2019_v17 = vmul.f32 0.5, %v2003_v28  ;;  %v3796_v33 = vld [vmem:[#allocation4 + $0x38] sm:$0xff] }
 0x699   :  { %v3653_v14 = vpop.eup %3652  ;;  %v2171_v38 = vmul.f32 %v5525_v59, %v5525_v59  ;;  %3668 = vrcp.f32 %v1964_v32 }
 0x69a   :  { %2191 = vadd.xlane.f32.xlu1 %v2173_v18  ;;  %v2008_v10 = vmul.f32 0.0, %v3653_v14  ;;  %v3655_v57 = vpop.eup %3654  ;;  %v2174_v27 = vmul.f32 %v5529_v36, %v5529_v36  ;;  %v5533_v29 = vadd.f32 %v3793_v31, %v2019_v17  ;;  %3670 = vpow2.f32 %v2856_v41 }
 0x69b   :  { %v3657_v5 = vpop.eup %3656  ;;  %v1962_v25 = vadd.f32 1.0, %v3655_v57  ;;  %v3797_v57 = vld [vmem:[#allocation4 + $0x28] sm:$0xff] }
 0x69c   :  { %v2024_v46 = vmul.f32 0.5, %v2008_v10  ;;  %v3659_v52 = vpop.eup %3658  ;;  %v2006_v12 = vmul.f32 0.0, %v3657_v5  ;;  %v2172_v58 = vmul.f32 %v5533_v29, %v5533_v29  ;;  %v3798_v5 = vld [vmem:[#allocation4 + $0x50] sm:$0xff] }
 0x69d   :  { %v3661_v3 = vpop.eup %3660  ;;  %3672 = vrcp.f32 %v1962_v25  ;;  %v1965_v50 = vadd.f32 1.0, %v3659_v52 }
 0x69e   :  { %2187 = vadd.xlane.f32.xlu1 %v2171_v38  ;;  %v5535_v30 = vadd.f32 %v3794_v56, %v2024_v46  ;;  %v3663_v11 = vpop.eup %3662  ;;  %v2022_v26 = vmul.f32 0.5, %v2006_v12  ;;  %v2009_v47 = vmul.f32 0.0, %v3661_v3  ;;  %3674 = vpow2.f32 %v2859_v34 }
 0x69f   :  { %3676 = vrcp.f32 %v1965_v50  ;;  %v1963_v1 = vadd.f32 1.0, %v3663_v11  ;;  %v3799_v50 = vld [vmem:[#allocation4 + $0x40] sm:$0xff] }
 0x6a0   :  { %v2177_v8 = vmul.f32 %v5535_v30, %v5535_v30  ;;  %v5541_v0 = vadd.f32 %v3795_v23, %v2022_v26  ;;  %v2025_v39 = vmul.f32 0.5, %v2009_v47  ;;  %3678 = vpow2.f32 %v2857_v9 }
 0x6a1   :  { %v3665_v4 = vpop.eup %3664  ;;  %3680 = vrcp.f32 %v1963_v1 }
 0x6a2   :  { %2193 = vadd.xlane.f32.xlu1 %v2174_v27  ;;  %v3667_v49 = vpop.eup %3666  ;;  %v2007_v21 = vmul.f32 0.0, %v3665_v4  ;;  %v2175_v61 = vmul.f32 %v5541_v0, %v5541_v0  ;;  %v5545_v18 = vadd.f32 %v3796_v33, %v2025_v39  ;;  %v3801_v39 = vld [vmem:[#allocation4 + $0x48] sm:$0xff] }
 0x6a3   :  { %v3669_v44 = vpop.eup %3668  ;;  %v1968_v55 = vadd.f32 1.0, %v3667_v49  ;;  %v3800_v49 = vld [vmem:[#allocation4 + $0x58] sm:$0xff] }
 0x6a4   :  { %v2012_v16 = vmul.f32 0.0, %v3669_v44  ;;  %v3671_v24 = vpop.eup %3670  ;;  %v2023_v22 = vmul.f32 0.5, %v2007_v21  ;;  %v2178_v10 = vmul.f32 %v5545_v18, %v5545_v18 }
 0x6a5   :  { %3682 = vrcp.f32 %v1968_v55  ;;  %v1966_v14 = vadd.f32 1.0, %v3671_v24  ;;  %v3802_v24 = vld [vmem:[#allocation4 + $0x70] sm:$0xff] }
 0x6a6   :  { %2189 = vadd.xlane.f32.xlu1 %v2172_v58  ;;  %v2028_v28 = vmul.f32 0.5, %v2012_v16  ;;  %v5549_v38 = vadd.f32 %v3797_v57, %v2023_v22 }
 0x6a7   :  { %v3673_v53 = vpop.eup %3672  ;;  %3684 = vrcp.f32 %v1966_v14 }
 0x6a8   :  { %v3675_v32 = vpop.eup %3674  ;;  %v2010_v35 = vmul.f32 0.0, %v3673_v53  ;;  %v5551_v41 = vadd.f32 %v3798_v5, %v2028_v28  ;;  %v2176_v52 = vmul.f32 %v5549_v38, %v5549_v38  ;;  %v3804_v5 = vld [vmem:[#allocation4 + $0x78] sm:$0xff] }
 0x6a9   :  { %v3677_v17 = vpop.eup %3676  ;;  %v1969_v46 = vadd.f32 1.0, %v3675_v32  ;;  %v3803_v32 = vld [vmem:[#allocation4 + $0x60] sm:$0xff] }
 0x6aa   :  { %2199 = vadd.xlane.f32.xlu1 %v2177_v8  ;;  %v3679_v25 = vpop.eup %3678  ;;  %v2026_v27 = vmul.f32 0.5, %v2010_v35  ;;  %v2013_v31 = vmul.f32 0.0, %v3677_v17  ;;  %v2181_v3 = vmul.f32 %v5551_v41, %v5551_v41 }
 0x6ab   :  { %v3681_v12 = vpop.eup %3680  ;;  %3686 = vrcp.f32 %v1969_v46  ;;  %v1967_v56 = vadd.f32 1.0, %v3679_v25 }
 0x6ac   :  { %v5557_v11 = vadd.f32 %v3799_v50, %v2026_v27  ;;  %v2029_v58 = vmul.f32 0.5, %v2013_v31  ;;  %v2011_v26 = vmul.f32 0.0, %v3681_v12  ;;  %v3805_v27 = vld [vmem:[#allocation4 + $0x68] sm:$0xff]  ;;  %v5585_v12 = vsub.f32 %v5368_v45, %v5436_v6 }
 0x6ad   :  { %3688 = vrcp.f32 %v1967_v56 }
 0x6ae   :  { %2195 = vadd.xlane.f32.xlu1 %v2175_v61  ;;  %v2179_v4 = vmul.f32 %v5557_v11, %v5557_v11  ;;  %v5561_v9 = vadd.f32 %v3800_v49, %v2029_v58  ;;  %v2027_v8 = vmul.f32 0.5, %v2011_v26 }
 0x6af   :  { %v3683_v34 = vpop.eup %3682 }
 0x6b0   :  { %v2016_v47 = vmul.f32 0.0, %v3683_v34  ;;  %v2182_v23 = vmul.f32 %v5561_v9, %v5561_v9  ;;  %v5565_v21 = vadd.f32 %v3801_v39, %v2027_v8  ;;  %v2282_v34 = vmul.f32 %v5585_v12, %v5585_v12 }
 0x6b1   :  { %v3685_v44 = vpop.eup %3684 }
 0x6b2   :  { %2201 = vadd.xlane.f32.xlu1 %v2178_v10  ;;  %v2032_v1 = vmul.f32 0.5, %v2016_v47  ;;  %v2014_v55 = vmul.f32 0.0, %v3685_v44  ;;  %v2180_v33 = vmul.f32 %v5565_v21, %v5565_v21 }
 0x6b4   :  { %v5567_v61 = vadd.f32 %v3802_v24, %v2032_v1  ;;  %v2030_v22 = vmul.f32 0.5, %v2014_v55 }
 0x6b5   :  { %v3687_v16 = vpop.eup %3686 }
 0x6b6   :  { %2197 = vadd.xlane.f32.xlu1 %v2176_v52  ;;  %v2017_v53 = vmul.f32 0.0, %v3687_v16  ;;  %v2185_v14 = vmul.f32 %v5567_v61, %v5567_v61  ;;  %v5573_v10 = vadd.f32 %v3803_v32, %v2030_v22 }
 0x6b7   :  { %v3689_v28 = vpop.eup %3688 }
 0x6b8   :  { %v2033_v57 = vmul.f32 0.5, %v2017_v53  ;;  %v2015_v35 = vmul.f32 0.0, %v3689_v28  ;;  %v2183_v17 = vmul.f32 %v5573_v10, %v5573_v10 }
 0x6ba   :  { %2207 = vadd.xlane.f32.xlu1 %v2181_v3  ;;  %v5577_v46 = vadd.f32 %v3804_v5, %v2033_v57  ;;  %v2031_v25 = vmul.f32 0.5, %v2015_v35 }
 0x6bc   :  { %v2186_v52 = vmul.f32 %v5577_v46, %v5577_v46  ;;  %v5581_v31 = vadd.f32 %v3805_v27, %v2031_v25 }
 0x6be   :  { %2203 = vadd.xlane.f32.xlu1 %v2179_v4  ;;  %v2184_v3 = vmul.f32 %v5581_v31, %v5581_v31 }
 0x6c2   :  { %2209 = vadd.xlane.f32.xlu1 %v2182_v23 }
 0x6c6   :  { %2205 = vadd.xlane.f32.xlu1 %v2180_v33 }
 0x6ca   :  { %2215 = vadd.xlane.f32.xlu1 %v2185_v14 }
 0x6ce   :  { %2211 = vadd.xlane.f32.xlu1 %v2183_v17 }
 0x6d2   :  { %2217 = vadd.xlane.f32.xlu1 %v2186_v52 }
 0x6d6   :  { %2213 = vadd.xlane.f32.xlu1 %v2184_v3 }
 0x6da   :  { %2313 = vadd.xlane.f32.xlu1 %v2282_v34 }
 0x6db   :  { %4033 = shalt.err (!%p4030_p2)  }
 0x6dc   :  { %s4034_s5 = scalar_lea.vmem %s135_s28, 2048  ;;  %p4039_p4 = scmp.lt.s32.totalorder %s135_s28, %s135_s28 }
 0x6dd   :  { %p4035_p3 = scmp.ne.s32.totalorder %s135_s28, %s4034_s5  ;;  %p4040_p5 = scmp.lt.s32.totalorder %s4034_s5, %s4034_s5 }
 0x6df   :  { %p4041_p6 = por %p4040_p5, %p4039_p4 }
 0x6e1   :  { %p4042_p7 = pnand %p4041_p6, %p4035_p3 }
 0x6e3   :  { %4045 = shalt.err (!%p4042_p7)  }
 0x6e4   :  { %137 = dma.hbm_to_vmem [thread:$0]  %s5781_s8, 2048, %s135_s28, [#allocation3] }
 0x727   :  { %v2192_v45 = vpop.xlane.xlu1 %2191 }
 0x728   :  { %v2221_v6 = vmax.f32 %v2192_v45, 1e-24 }
 0x72a   :  { %3690 = vrsqrt.f32 %v2221_v6 }
 0x72b   :  { %v2188_v56 = vpop.xlane.xlu1 %2187 }
 0x72c   :  { %v2219_v50 = vmax.f32 %v2188_v56, 1e-24 }
 0x72e   :  { %3692 = vrsqrt.f32 %v2219_v50 }
 0x72f   :  { %v2194_v58 = vpop.xlane.xlu1 %2193 }
 0x730   :  { %v2222_v26 = vmax.f32 %v2194_v58, 1e-24 }
 0x732   :  { %3694 = vrsqrt.f32 %v2222_v26 }
 0x733   :  { %v2190_v47 = vpop.xlane.xlu1 %2189 }
 0x734   :  { %v3691_v4 = vpop.eup %3690  ;;  %v2220_v49 = vmax.f32 %v2190_v47, 1e-24 }
 0x735   :  { %v5604_v8 = vmul.f32 %v3691_v4, %v5521_v62 }
 0x736   :  { %3696 = vrsqrt.f32 %v2220_v49 }
 0x737   :  { %v2200_v44 = vpop.xlane.xlu1 %2199 }
 0x738   :  { %v3693_v1 = vpop.eup %3692  ;;  %v2225_v23 = vmax.f32 %v2200_v44, 1e-24 }
 0x739   :  { %v5607_v39 = vmul.f32 %v3693_v1, %v5525_v59 }
 0x73a   :  { %3698 = vrsqrt.f32 %v2225_v23 }
 0x73b   :  { %v2196_v55 = vpop.xlane.xlu1 %2195 }
 0x73c   :  { %v3695_v16 = vpop.eup %3694  ;;  %v2223_v24 = vmax.f32 %v2196_v55, 1e-24 }
 0x73d   :  { %v5610_v33 = vmul.f32 %v3695_v16, %v5529_v36 }
 0x73e   :  { %3700 = vrsqrt.f32 %v2223_v24 }
 0x73f   :  { %v2202_v22 = vpop.xlane.xlu1 %2201 }
 0x740   :  { %v3697_v53 = vpop.eup %3696  ;;  %v2226_v28 = vmax.f32 %v2202_v22, 1e-24 }
 0x741   :  { %v2252_v62 = vmul.f32 %v3697_v53, %v5533_v29 }
 0x742   :  { %3702 = vrsqrt.f32 %v2226_v28 }
 0x743   :  { %v2198_v14 = vpop.xlane.xlu1 %2197 }
 0x744   :  { %v3699_v32 = vpop.eup %3698  ;;  %v2224_v57 = vmax.f32 %v2198_v14, 1e-24 }
 0x745   :  { %v5614_v59 = vmul.f32 %v3699_v32, %v5535_v30 }
 0x746   :  { %3704 = vrsqrt.f32 %v2224_v57 }
 0x747   :  { %v2208_v35 = vpop.xlane.xlu1 %2207 }
 0x748   :  { %v3701_v17 = vpop.eup %3700  ;;  %v2229_v5 = vmax.f32 %v2208_v35, 1e-24 }
 0x749   :  { %v5617_v36 = vmul.f32 %v3701_v17, %v5541_v0 }
 0x74a   :  { %3706 = vrsqrt.f32 %v2229_v5 }
 0x74b   :  { %v2204_v25 = vpop.xlane.xlu1 %2203 }
 0x74c   :  { %v3703_v52 = vpop.eup %3702  ;;  %v2227_v27 = vmax.f32 %v2204_v25, 1e-24 }
 0x74d   :  { %v5620_v29 = vmul.f32 %v3703_v52, %v5545_v18 }
 0x74e   :  { %3708 = vrsqrt.f32 %v2227_v27 }
 0x74f   :  { %v2210_v3 = vpop.xlane.xlu1 %2209 }
 0x750   :  { %v3705_v34 = vpop.eup %3704  ;;  %v2230_v45 = vmax.f32 %v2210_v3, 1e-24 }
 0x751   :  { %v5623_v30 = vmul.f32 %v3705_v34, %v5549_v38 }
 0x752   :  { %3710 = vrsqrt.f32 %v2230_v45 }
 0x753   :  { %v2206_v6 = vpop.xlane.xlu1 %2205 }
 0x754   :  { %v3707_v56 = vpop.eup %3706  ;;  %v2228_v50 = vmax.f32 %v2206_v6, 1e-24 }
 0x755   :  { %v5626_v0 = vmul.f32 %v3707_v56, %v5551_v41 }
 0x756   :  { %3712 = vrsqrt.f32 %v2228_v50 }
 0x757   :  { %v2216_v58 = vpop.xlane.xlu1 %2215 }
 0x758   :  { %v3709_v26 = vpop.eup %3708  ;;  %v2233_v47 = vmax.f32 %v2216_v58, 1e-24 }
 0x759   :  { %v5629_v18 = vmul.f32 %v3709_v26, %v5557_v11 }
 0x75a   :  { %3714 = vrsqrt.f32 %v2233_v47 }
 0x75b   :  { %v2212_v4 = vpop.xlane.xlu1 %2211 }
 0x75c   :  { %v3711_v49 = vpop.eup %3710  ;;  %v2231_v44 = vmax.f32 %v2212_v4, 1e-24 }
 0x75d   :  { %v5632_v38 = vmul.f32 %v3711_v49, %v5561_v9 }
 0x75e   :  { %3716 = vrsqrt.f32 %v2231_v44 }
 0x75f   :  { %v2218_v1 = vpop.xlane.xlu1 %2217 }
 0x760   :  { %v3713_v23 = vpop.eup %3712  ;;  %v2234_v55 = vmax.f32 %v2218_v1, 1e-24 }
 0x761   :  { %v2260_v41 = vmul.f32 %v3713_v23, %v5565_v21 }
 0x762   :  { %3718 = vrsqrt.f32 %v2234_v55 }
 0x763   :  { %v2214_v16 = vpop.xlane.xlu1 %2213 }
 0x764   :  { %v3715_v24 = vpop.eup %3714  ;;  %v2232_v22 = vmax.f32 %v2214_v16, 1e-24 }
 0x765   :  { %v5636_v11 = vmul.f32 %v3715_v24, %v5567_v61 }
 0x766   :  { %3720 = vrsqrt.f32 %v2232_v22 }
 0x767   :  { %v2314_v53 = vpop.xlane.xlu1 %2313 }
 0x768   :  { %v3717_v28 = vpop.eup %3716  ;;  %v2330_v14 = vmax.f32 %v2314_v53, 1e-24 }
 0x769   :  { %v2263_v9 = vmul.f32 %v3717_v28, %v5573_v10 }
 0x76a   :  { %3722 = vrsqrt.f32 %v2330_v14 }
 0x76c   :  { %v3719_v32 = vpop.eup %3718 }
 0x76d   :  { %v2266_v57 = vmul.f32 %v3719_v32, %v5577_v46 }
 0x770   :  { %v3721_v35 = vpop.eup %3720 }
 0x771   :  { %v2264_v21 = vmul.f32 %v3721_v35, %v5581_v31 }
 0x774   :  { %v3723_v17 = vpop.eup %3722 }
 0x775   :  { %v5642_v5 = vmul.f32 %v3723_v17, %v5585_v12 }
 0x776   :  { %4076 = dma.done.wait [#allocation3], 2048 }
 0x777   :  { %4077 = vsyncadd [#allocation3], 4294965248  ;;  %v2393_v61 = vpack.c.bf16 %v2252_v62, %v5607_v39  ;;  %v2377_v25 = vld [vmem:[#allocation2 + $0x40] sm:$0xff]  ;;  %v2378_v52 = vld [vmem:[#allocation2 + $0x48] sm:$0xff]  ;;  %v2394_v3 = vpack.c.bf16 %v5610_v33, %v5604_v8  ;;  %v2395_v34 = vpack.c.bf16 %v5623_v30, %v5617_v36  ;;  %v2396_v6 = vpack.c.bf16 %v5620_v29, %v5614_v59 }
 0x778   :  { %3366 = vmatprep.subr.bf16.mxu0 %v2377_v25  ;;  %v2379_v10 = vld [vmem:[#allocation2 + $0x50] sm:$0xff]  ;;  %v2380_v46 = vld [vmem:[#allocation2 + $0x58] sm:$0xff]  ;;  %v2381_v31 = vld [vmem:[#allocation2 + $0x60] sm:$0xff]  ;;  %v2397_v56 = vpack.c.bf16 %v2260_v41, %v5629_v18  ;;  %v2398_v8 = vpack.c.bf16 %v5632_v38, %v5626_v0  ;;  %v2399_v33 = vpack.c.bf16 %v2264_v21, %v2263_v9  ;;  %v2400_v30 = vpack.c.bf16 %v2266_v57, %v5636_v11 }
 0x779   :  { %3382 = vmatprep.mubr.bf16.mxu0 %v2393_v61  ;;  %3367 = vmatpush3.bf16.xpose.msra.mxu0 %v2377_v25  ;;  %v2382_v12 = vld [vmem:[#allocation2 + $0x68] sm:$0xff]  ;;  %v2383_v27 = vld [vmem:[#allocation2 + $0x70] sm:$0xff]  ;;  %v2384_v39 = vld [vmem:[#allocation2 + $0x78] sm:$0xff]  ;;  %v2385_v59 = vpack.c.bf16 %v5485_v2, %v5479_v60  ;;  %v2386_v47 = vpack.c.bf16 %v5482_v15, %v5476_v13  ;;  %v2387_v60 = vpack.c.bf16 %v5500_v48, %v5494_v63 }
 0x77a   :  { %3368 = vmatprep.subr.bf16.mxu0 %v2378_v52  ;;  %v2368_v62 = vld [vmem:[#allocation2] sm:$0xff]  ;;  %v2369_v45 = vld [vmem:[#allocation2 + $0x8] sm:$0xff]  ;;  %v2370_v50 = vld [vmem:[#allocation2 + $0x10] sm:$0xff]  ;;  %v2388_v2 = vpack.c.bf16 %v5497_v54, %v5488_v37  ;;  %v2389_v18 = vpack.c.bf16 %v5509_v7, %v5506_v43  ;;  %v2390_v4 = vpack.c.bf16 %v5491_v42, %v5503_v19  ;;  %v2391_v49 = vpack.c.bf16 %v5518_v20, %v5515_v40 }
 0x77b   :  { %v2371_v36 = vld [vmem:[#allocation2 + $0x18] sm:$0xff]  ;;  %v2372_v29 = vld [vmem:[#allocation2 + $0x20] sm:$0xff]  ;;  %v2373_v58 = vld [vmem:[#allocation2 + $0x28] sm:$0xff]  ;;  %v2392_v13 = vpack.c.bf16 %v5642_v5, %v5512_v51 }
 0x77c   :  { %v2374_v0 = vld [vmem:[#allocation2 + $0x30] sm:$0xff]  ;;  %v2375_v26 = vld [vmem:[#allocation2 + $0x38] sm:$0xff]  ;;  %v2860_v15 = vld [vmem:[%s5780_s7] ss:$0 sm:$0xff]  ;;  %s4093_s7 = smov [#allocation16]  }
 0x77d   :  { %s2799_s18 = sshll.u32 %s4093_s7, 4  ;;  %s2800_s18 = int_to_ptr.vmem [resolvable:$true] %s2799_s18 }
 0x77e   :  { %s4046_s19 = scalar_lea.vmem %s2800_s18, 2048  ;;  %p4051_p9 = scmp.lt.s32.totalorder %s2800_s18, %s2800_s18 }
 0x77f   :  { %p4047_p8 = scmp.ne.s32.totalorder %s2800_s18, %s4046_s19  ;;  %p4052_p10 = scmp.lt.s32.totalorder %s4046_s19, %s4046_s19 }
 0x781   :  { %3369 = vmatpush3.bf16.xpose.msra.mxu0 %v2378_v52  ;;  %p4053_p11 = por %p4052_p10, %p4051_p9 }
 0x782   :  { %3370 = vmatprep.subr.bf16.mxu0 %v2379_v10 }
 0x783   :  { %p4054_p12 = pnand %p4053_p11, %p4047_p8 }
 0x789   :  { %3371 = vmatpush3.bf16.xpose.msra.mxu0 %v2379_v10 }
 0x78a   :  { %3372 = vmatprep.subr.bf16.mxu0 %v2380_v46 }
 0x791   :  { %3373 = vmatpush3.bf16.xpose.msra.mxu0 %v2380_v46 }
 0x792   :  { %3374 = vmatprep.subr.bf16.mxu0 %v2381_v31 }
 0x799   :  { %3375 = vmatpush3.bf16.xpose.msra.mxu0 %v2381_v31 }
 0x79a   :  { %3376 = vmatprep.subr.bf16.mxu0 %v2382_v12 }
 0x7a1   :  { %3377 = vmatpush3.bf16.xpose.msra.mxu0 %v2382_v12 }
 0x7a2   :  { %3378 = vmatprep.subr.bf16.mxu0 %v2383_v27 }
 0x7a9   :  { %3379 = vmatpush3.bf16.xpose.msra.mxu0 %v2383_v27 }
 0x7aa   :  { %3380 = vmatprep.subr.bf16.mxu0 %v2384_v39 }
 0x7b1   :  { %3381 = vmatpush3.bf16.xpose.msra.mxu0 %v2384_v39 }
 0x7b2   :  { %3398 = vmatprep.subr.bf16.mxu0 %v2368_v62 }
 0x7b8   :  { %3383 = vmatmul.mubr.bf16.vlgmr.msra.gmra.mrb[48].mxu0 %v2394_v3 }
 0x7b9   :  { %3399 = vmatpush3.bf16.xpose.msra.mxu0 %v2368_v62  ;;  %3386 = vmatprep.mubr.bf16.mxu0 %v2395_v34 }
 0x7ba   :  { %3400 = vmatprep.subr.bf16.mxu0 %v2369_v45 }
 0x7c0   :  { %3387 = vmatmul.mubr.bf16.gmra.mrb[52].mxu0 %v2396_v6 }
 0x7c1   :  { %3401 = vmatpush3.bf16.xpose.msra.mxu0 %v2369_v45  ;;  %3390 = vmatprep.mubr.bf16.mxu0 %v2397_v56 }
 0x7c2   :  { %3402 = vmatprep.subr.bf16.mxu0 %v2370_v50 }
 0x7c8   :  { %3391 = vmatmul.mubr.bf16.gmra.mrb[56].mxu0 %v2398_v8 }
 0x7c9   :  { %3403 = vmatpush3.bf16.xpose.msra.mxu0 %v2370_v50  ;;  %3394 = vmatprep.mubr.bf16.mxu0 %v2399_v33 }
 0x7ca   :  { %3404 = vmatprep.subr.bf16.mxu0 %v2371_v36 }
 0x7d0   :  { %3395 = vmatmul.mubr.bf16.gmra.mrb[60].mxu0 %v2400_v30 }
 0x7d1   :  { %3405 = vmatpush3.bf16.xpose.msra.mxu0 %v2371_v36  ;;  %3414 = vmatprep.mubr.bf16.mxu0 %v2385_v59 }
 0x7d2   :  { %3406 = vmatprep.subr.bf16.mxu0 %v2372_v29 }
 0x7d9   :  { %3407 = vmatpush3.bf16.xpose.msra.mxu0 %v2372_v29 }
 0x7da   :  { %3408 = vmatprep.subr.bf16.mxu0 %v2373_v58 }
 0x7e1   :  { %3409 = vmatpush3.bf16.xpose.msra.mxu0 %v2373_v58 }
 0x7e2   :  { %3410 = vmatprep.subr.bf16.mxu0 %v2374_v0 }
 0x7e9   :  { %3411 = vmatpush3.bf16.xpose.msra.mxu0 %v2374_v0 }
 0x7ea   :  { %3412 = vmatprep.subr.bf16.mxu0 %v2375_v26 }
 0x7f1   :  { %3413 = vmatpush3.bf16.xpose.msra.mxu0 %v2375_v26 }
 0x7f8   :  { %3415 = vmatmul.mubr.bf16.vlgmr.msra.gmra.mrb[48].mxu0 %v2386_v47 }
 0x7f9   :  { %3418 = vmatprep.mubr.bf16.mxu0 %v2387_v60 }
 0x800   :  { %3419 = vmatmul.mubr.bf16.gmra.mrb[52].mxu0 %v2388_v2 }
 0x801   :  { %3422 = vmatprep.mubr.bf16.mxu0 %v2389_v18 }
 0x808   :  { %3423 = vmatmul.mubr.bf16.gmra.mrb[56].mxu0 %v2390_v4 }
 0x809   :  { %3426 = vmatprep.mubr.bf16.mxu0 %v2391_v49 }
 0x810   :  { %3427 = vmatmul.mubr.bf16.gmra.mrb[60].mxu0 %v2392_v13 }
 0x8cb   :  { %v3416_v37 = vpop.f32.mrb[48].mxu0 }
 0x8cc   :  { %v2604_v63 = vadd.f32 %v3416_v37, %v2860_v15  ;;  %v2532_v54 = vpop.f32.mrb[49].mxu0 }
 0x8cd   :  { %v2602_v48 = vadd.f32 %v2860_v15, %v2532_v54  ;;  %v3417_v43 = vpop.f32.mrb[50].mxu0 }
 0x8ce   :  { %2622 = vmax.xlane.f32.xlu1 %v2604_v63  ;;  %v2535_v42 = vpop.f32.mrb[51].mxu0  ;;  %v2605_v19 = vadd.f32 %v3417_v43, %v2860_v15 }
 0x8cf   :  { %2618 = vmax.xlane.f32.xlu0 %v2602_v48  ;;  %v2603_v7 = vadd.f32 %v2860_v15, %v2535_v42 }
 0x8d2   :  { %2624 = vmax.xlane.f32.xlu1 %v2605_v19 }
 0x8d3   :  { %2620 = vmax.xlane.f32.xlu0 %v2603_v7  ;;  %v3420_v40 = vpop.f32.mrb[52].mxu0 }
 0x8d4   :  { %v2608_v20 = vadd.f32 %v3420_v40, %v2860_v15  ;;  %v2548_v51 = vpop.f32.mrb[53].mxu0 }
 0x8d5   :  { %v3421_v44 = vpop.f32.mrb[54].mxu0  ;;  %v2606_v23 = vadd.f32 %v2860_v15, %v2548_v51 }
 0x8d6   :  { %v2609_v38 = vadd.f32 %v3421_v44, %v2860_v15  ;;  %v2551_v1 = vpop.f32.mrb[55].mxu0 }
 0x8d7   :  { %2630 = vmax.xlane.f32.xlu0 %v2608_v20  ;;  %v2607_v55 = vadd.f32 %v2860_v15, %v2551_v1 }
 0x8d8   :  { %2632 = vmax.xlane.f32.xlu1 %v2609_v38 }
 0x8db   :  { %2626 = vmax.xlane.f32.xlu0 %v2606_v23  ;;  %v3424_v41 = vpop.f32.mrb[56].mxu0 }
 0x8dc   :  { %v2612_v16 = vadd.f32 %v3424_v41, %v2860_v15  ;;  %2628 = vmax.xlane.f32.xlu1 %v2607_v55  ;;  %v2564_v24 = vpop.f32.mrb[57].mxu0 }
 0x8dd   :  { %v3425_v22 = vpop.f32.mrb[58].mxu0  ;;  %v2610_v28 = vadd.f32 %v2860_v15, %v2564_v24 }
 0x8de   :  { %v2613_v11 = vadd.f32 %v3425_v22, %v2860_v15  ;;  %v2567_v53 = vpop.f32.mrb[59].mxu0 }
 0x8df   :  { %2638 = vmax.xlane.f32.xlu0 %v2612_v16  ;;  %v5674_v14 = vadd.f32 %v2860_v15, %v2567_v53 }
 0x8e0   :  { %2640 = vmax.xlane.f32.xlu1 %v2613_v11 }
 0x8e3   :  { %2634 = vmax.xlane.f32.xlu0 %v2610_v28  ;;  %v3428_v9 = vpop.f32.mrb[60].mxu0 }
 0x8e4   :  { %2636 = vmax.xlane.f32.xlu1 %v5674_v14  ;;  %v2580_v32 = vpop.f32.mrb[61].mxu0  ;;  %v5682_v5 = vadd.f32 %v3428_v9, %v2860_v15 }
 0x8e5   :  { %v5677_v57 = vadd.f32 %v2860_v15, %v2580_v32  ;;  %v3429_v35 = vpop.f32.mrb[62].mxu0 }
 0x8e6   :  { %v2583_v21 = vpop.f32.mrb[63].mxu0  ;;  %v5685_v61 = vadd.f32 %v3429_v35, %v2860_v15 }
 0x8e7   :  { %v5679_v17 = vadd.f32 %v2860_v15, %v2583_v21  ;;  %2642 = vmax.xlane.f32.xlu0 %v5677_v57 }
 0x8e9   :  { %2644 = vmax.xlane.f32.xlu1 %v5679_v17 }
 0x8eb   :  { %2646 = vmax.xlane.f32.xlu0 %v5682_v5 }
 0x8ed   :  { %2648 = vmax.xlane.f32.xlu1 %v5685_v61 }
 0x95b   :  { %v2623_v25 = vpop.xlane.xlu1 %2622 }
 0x95c   :  { %v5689_v52 = vsub.f32 %v2604_v63, %v2623_v25  ;;  %v2619_v10 = vpop.xlane.xlu0 %2618 }
 0x95d   :  { %v5691_v46 = vsub.f32 %v2602_v48, %v2619_v10 }
 0x95e   :  { %v2670_v31 = vmul.f32 1.442695, %v5689_v52 }
 0x95f   :  { %v2666_v12 = vmul.f32 1.442695, %v5691_v46  ;;  %v2625_v27 = vpop.xlane.xlu1 %2624 }
 0x960   :  { %3806 = vpow2.f32 %v2670_v31  ;;  %v5695_v39 = vsub.f32 %v2605_v19, %v2625_v27  ;;  %v2621_v62 = vpop.xlane.xlu0 %2620 }
 0x961   :  { %v5697_v3 = vsub.f32 %v2603_v7, %v2621_v62  ;;  %3808 = vpow2.f32 %v2666_v12 }
 0x962   :  { %v2672_v34 = vmul.f32 1.442695, %v5695_v39 }
 0x963   :  { %v2668_v45 = vmul.f32 1.442695, %v5697_v3 }
 0x964   :  { %3810 = vpow2.f32 %v2672_v34  ;;  %v2631_v6 = vpop.xlane.xlu0 %2630 }
 0x965   :  { %v5701_v56 = vsub.f32 %v2608_v20, %v2631_v6  ;;  %v2633_v50 = vpop.xlane.xlu1 %2632  ;;  %3812 = vpow2.f32 %v2668_v45 }
 0x966   :  { %v5703_v8 = vsub.f32 %v2609_v38, %v2633_v50 }
 0x967   :  { %v2678_v33 = vmul.f32 1.442695, %v5701_v56 }
 0x968   :  { %v2680_v36 = vmul.f32 1.442695, %v5703_v8  ;;  %v2627_v30 = vpop.xlane.xlu0 %2626 }
 0x969   :  { %3814 = vpow2.f32 %v2678_v33  ;;  %v5707_v59 = vsub.f32 %v2606_v23, %v2627_v30  ;;  %v2629_v29 = vpop.xlane.xlu1 %2628 }
 0x96a   :  { %v3807_v58 = vpop.eup %3806  ;;  %v5709_v0 = vsub.f32 %v2607_v55, %v2629_v29  ;;  %3816 = vpow2.f32 %v2680_v36 }
 0x96b   :  { %v2674_v26 = vmul.f32 1.442695, %v5707_v59  ;;  %2702 = vadd.xlane.f32.xlu0 %v3807_v58  ;;  %v3809_v2 = vpop.eup %3808 }
 0x96c   :  { %v2676_v47 = vmul.f32 1.442695, %v5709_v0  ;;  %v2639_v60 = vpop.xlane.xlu0 %2638 }
 0x96d   :  { %3818 = vpow2.f32 %v2674_v26  ;;  %v5713_v18 = vsub.f32 %v2612_v16, %v2639_v60  ;;  %v2641_v4 = vpop.xlane.xlu1 %2640 }
 0x96e   :  { %v3811_v49 = vpop.eup %3810  ;;  %v5715_v13 = vsub.f32 %v2613_v11, %v2641_v4  ;;  %3820 = vpow2.f32 %v2676_v47 }
 0x96f   :  { %v2686_v15 = vmul.f32 1.442695, %v5713_v18  ;;  %2698 = vadd.xlane.f32.xlu0 %v3809_v2  ;;  %2704 = vadd.xlane.f32.xlu1 %v3811_v49  ;;  %v3813_v43 = vpop.eup %3812 }
 0x970   :  { %v2688_v37 = vmul.f32 1.442695, %v5715_v13  ;;  %v2635_v63 = vpop.xlane.xlu0 %2634 }
 0x971   :  { %3822 = vpow2.f32 %v2686_v15  ;;  %v5719_v54 = vsub.f32 %v2610_v28, %v2635_v63  ;;  %v2637_v48 = vpop.xlane.xlu1 %2636 }
 0x972   :  { %v5722_v42 = vsub.f32 %v5674_v14, %v2637_v48  ;;  %3824 = vpow2.f32 %v2688_v37 }
 0x973   :  { %v3815_v19 = vpop.eup %3814  ;;  %v2682_v7 = vmul.f32 1.442695, %v5719_v54  ;;  %2700 = vadd.xlane.f32.xlu1 %v3813_v43 }
 0x974   :  { %v2684_v40 = vmul.f32 1.442695, %v5722_v42  ;;  %2710 = vadd.xlane.f32.xlu0 %v3815_v19  ;;  %v2643_v20 = vpop.xlane.xlu0 %2642  ;;  %v3817_v44 = vpop.eup %3816 }
 0x975   :  { %3826 = vpow2.f32 %v2682_v7  ;;  %v5727_v51 = vsub.f32 %v5677_v57, %v2643_v20 }
 0x976   :  { %v2645_v38 = vpop.xlane.xlu1 %2644  ;;  %3828 = vpow2.f32 %v2684_v40 }
 0x977   :  { %v3819_v1 = vpop.eup %3818  ;;  %v2690_v23 = vmul.f32 1.442695, %v5727_v51  ;;  %v5731_v55 = vsub.f32 %v5679_v17, %v2645_v38  ;;  %2712 = vadd.xlane.f32.xlu1 %v3817_v44 }
 0x978   :  { %2706 = vadd.xlane.f32.xlu0 %v3819_v1  ;;  %v2647_v41 = vpop.xlane.xlu0 %2646  ;;  %v3821_v22 = vpop.eup %3820 }
 0x979   :  { %3830 = vpow2.f32 %v2690_v23  ;;  %v2692_v16 = vmul.f32 1.442695, %v5731_v55  ;;  %v5735_v24 = vsub.f32 %v5682_v5, %v2647_v41 }
 0x97a   :  { %v2649_v11 = vpop.xlane.xlu1 %2648 }
 0x97b   :  { %v3823_v53 = vpop.eup %3822  ;;  %3832 = vpow2.f32 %v2692_v16  ;;  %v2694_v28 = vmul.f32 1.442695, %v5735_v24  ;;  %v5739_v14 = vsub.f32 %v5685_v61, %v2649_v11  ;;  %2708 = vadd.xlane.f32.xlu1 %v3821_v22 }
 0x97c   :  { %2718 = vadd.xlane.f32.xlu0 %v3823_v53  ;;  %v3825_v32 = vpop.eup %3824 }
 0x97d   :  { %3834 = vpow2.f32 %v2694_v28  ;;  %v2696_v9 = vmul.f32 1.442695, %v5739_v14 }
 0x97f   :  { %v3827_v57 = vpop.eup %3826  ;;  %3836 = vpow2.f32 %v2696_v9  ;;  %2720 = vadd.xlane.f32.xlu1 %v3825_v32 }
 0x980   :  { %2714 = vadd.xlane.f32.xlu0 %v3827_v57  ;;  %v3829_v35 = vpop.eup %3828 }
 0x983   :  { %v3831_v21 = vpop.eup %3830  ;;  %2716 = vadd.xlane.f32.xlu1 %v3829_v35 }
 0x984   :  { %2722 = vadd.xlane.f32.xlu0 %v3831_v21 }
 0x985   :  { %v3833_v17 = vpop.eup %3832 }
 0x987   :  { %v3835_v5 = vpop.eup %3834  ;;  %2724 = vadd.xlane.f32.xlu1 %v3833_v17 }
 0x988   :  { %2726 = vadd.xlane.f32.xlu0 %v3835_v5 }
 0x989   :  { %v3837_v61 = vpop.eup %3836 }
 0x98b   :  { %2728 = vadd.xlane.f32.xlu1 %v3837_v61 }
 0x9f8   :  { %v2703_v25 = vpop.xlane.xlu0 %2702 }
 0x9f9   :  { %3838 = vlog2.f32 %v2703_v25 }
 0x9fc   :  { %v2699_v10 = vpop.xlane.xlu0 %2698  ;;  %v2705_v31 = vpop.xlane.xlu1 %2704 }
 0x9fd   :  { %3840 = vlog2.f32 %v2699_v10 }
 0x9fe   :  { %3842 = vlog2.f32 %v2705_v31 }
 0xa00   :  { %v2701_v12 = vpop.xlane.xlu1 %2700 }
 0xa01   :  { %3844 = vlog2.f32 %v2701_v12  ;;  %v2711_v27 = vpop.xlane.xlu0 %2710 }
 0xa02   :  { %3846 = vlog2.f32 %v2711_v27 }
 0xa03   :  { %v3839_v62 = vpop.eup %3838 }
 0xa04   :  { %v2735_v34 = vmul.f32 0.6931472, %v3839_v62  ;;  %v2713_v45 = vpop.xlane.xlu1 %2712 }
 0xa05   :  { %3848 = vlog2.f32 %v2713_v45  ;;  %v2707_v6 = vpop.xlane.xlu0 %2706 }
 0xa06   :  { %v2764_v50 = vsub.f32 %v5689_v52, %v2735_v34  ;;  %3850 = vlog2.f32 %v2707_v6 }
 0xa07   :  { %v3841_v33 = vpop.eup %3840 }
 0xa08   :  { %v3843_v36 = vpop.eup %3842  ;;  %2780 = vst [vmem:[#allocation16 + $0x10] sm:$0xff] %v2764_v50  ;;  %v2731_v30 = vmul.f32 0.6931472, %v3841_v33  ;;  %v2709_v29 = vpop.xlane.xlu1 %2708 }
 0xa09   :  { %v2737_v58 = vmul.f32 0.6931472, %v3843_v36  ;;  %3852 = vlog2.f32 %v2709_v29  ;;  %v2719_v26 = vpop.xlane.xlu0 %2718 }
 0xa0a   :  { %v2762_v47 = vsub.f32 %v5691_v46, %v2731_v30  ;;  %3854 = vlog2.f32 %v2719_v26 }
 0xa0b   :  { %v3845_v60 = vpop.eup %3844  ;;  %v2765_v2 = vsub.f32 %v5695_v39, %v2737_v58 }
 0xa0c   :  { %v3847_v4 = vpop.eup %3846  ;;  %2778 = vst [vmem:[#allocation16] sm:$0xff] %v2762_v47  ;;  %v2733_v49 = vmul.f32 0.6931472, %v3845_v60  ;;  %v2721_v15 = vpop.xlane.xlu1 %2720 }
 0xa0d   :  { %2781 = vst [vmem:[#allocation16 + $0x18] sm:$0xff] %v2765_v2  ;;  %v2743_v52 = vmul.f32 0.6931472, %v3847_v4  ;;  %3856 = vlog2.f32 %v2721_v15  ;;  %v2715_v37 = vpop.xlane.xlu0 %2714 }
 0xa0e   :  { %v2763_v63 = vsub.f32 %v5697_v3, %v2733_v49  ;;  %3858 = vlog2.f32 %v2715_v37 }
 0xa0f   :  { %v3849_v48 = vpop.eup %3848  ;;  %v2768_v43 = vsub.f32 %v5701_v56, %v2743_v52 }
 0xa10   :  { %v3851_v19 = vpop.eup %3850  ;;  %2779 = vst [vmem:[#allocation16 + $0x8] sm:$0xff] %v2763_v63  ;;  %v2745_v46 = vmul.f32 0.6931472, %v3849_v48  ;;  %v2717_v7 = vpop.xlane.xlu1 %2716 }
 0xa11   :  { %2784 = vst [vmem:[#allocation16 + $0x30] sm:$0xff] %v2768_v43  ;;  %v2739_v39 = vmul.f32 0.6931472, %v3851_v19  ;;  %3860 = vlog2.f32 %v2717_v7  ;;  %v2723_v40 = vpop.xlane.xlu0 %2722 }
 0xa12   :  { %v2769_v20 = vsub.f32 %v5703_v8, %v2745_v46  ;;  %3862 = vlog2.f32 %v2723_v40 }
 0xa13   :  { %v3853_v44 = vpop.eup %3852  ;;  %v2766_v38 = vsub.f32 %v5707_v59, %v2739_v39 }
 0xa14   :  { %v3855_v1 = vpop.eup %3854  ;;  %2785 = vst [vmem:[#allocation16 + $0x38] sm:$0xff] %v2769_v20  ;;  %v2741_v3 = vmul.f32 0.6931472, %v3853_v44  ;;  %v2725_v23 = vpop.xlane.xlu1 %2724 }
 0xa15   :  { %2782 = vst [vmem:[#allocation16 + $0x20] sm:$0xff] %v2766_v38  ;;  %v2751_v56 = vmul.f32 0.6931472, %v3855_v1  ;;  %3864 = vlog2.f32 %v2725_v23  ;;  %v2727_v41 = vpop.xlane.xlu0 %2726 }
 0xa16   :  { %v2767_v16 = vsub.f32 %v5709_v0, %v2741_v3  ;;  %3866 = vlog2.f32 %v2727_v41 }
 0xa17   :  { %v3857_v22 = vpop.eup %3856  ;;  %v2772_v11 = vsub.f32 %v5713_v18, %v2751_v56 }
 0xa18   :  { %v3859_v53 = vpop.eup %3858  ;;  %2783 = vst [vmem:[#allocation16 + $0x28] sm:$0xff] %v2767_v16  ;;  %v2753_v8 = vmul.f32 0.6931472, %v3857_v22  ;;  %v2729_v28 = vpop.xlane.xlu1 %2728 }
 0xa19   :  { %2788 = vst [vmem:[#allocation16 + $0x50] sm:$0xff] %v2772_v11  ;;  %v2747_v59 = vmul.f32 0.6931472, %v3859_v53  ;;  %3868 = vlog2.f32 %v2729_v28 }
 0xa1a   :  { %v2773_v9 = vsub.f32 %v5715_v13, %v2753_v8 }
 0xa1b   :  { %v3861_v32 = vpop.eup %3860  ;;  %v2770_v57 = vsub.f32 %v5719_v54, %v2747_v59 }
 0xa1c   :  { %v3863_v35 = vpop.eup %3862  ;;  %2789 = vst [vmem:[#allocation16 + $0x58] sm:$0xff] %v2773_v9  ;;  %v2749_v21 = vmul.f32 0.6931472, %v3861_v32 }
 0xa1d   :  { %2786 = vst [vmem:[#allocation16 + $0x40] sm:$0xff] %v2770_v57  ;;  %v2755_v0 = vmul.f32 0.6931472, %v3863_v35 }
 0xa1e   :  { %v2771_v17 = vsub.f32 %v5722_v42, %v2749_v21 }
 0xa1f   :  { %v3865_v18 = vpop.eup %3864  ;;  %v2774_v5 = vsub.f32 %v5727_v51, %v2755_v0 }
 0xa20   :  { %v3867_v61 = vpop.eup %3866  ;;  %2787 = vst [vmem:[#allocation16 + $0x48] sm:$0xff] %v2771_v17  ;;  %v2757_v25 = vmul.f32 0.6931472, %v3865_v18 }
 0xa21   :  { %2790 = vst [vmem:[#allocation16 + $0x60] sm:$0xff] %v2774_v5  ;;  %v2759_v10 = vmul.f32 0.6931472, %v3867_v61 }
 0xa22   :  { %v2775_v13 = vsub.f32 %v5731_v55, %v2757_v25 }
 0xa23   :  { %v3869_v31 = vpop.eup %3868  ;;  %v2776_v54 = vsub.f32 %v5735_v24, %v2759_v10 }
 0xa24   :  { %2791 = vst [vmem:[#allocation16 + $0x68] sm:$0xff] %v2775_v13  ;;  %v2761_v12 = vmul.f32 0.6931472, %v3869_v31 }
 0xa25   :  { %2792 = vst [vmem:[#allocation16 + $0x70] sm:$0xff] %v2776_v54 }
 0xa26   :  { %v2777_v42 = vsub.f32 %v5739_v14, %v2761_v12 }
 0xa28   :  { %2793 = vst [vmem:[#allocation16 + $0x78] sm:$0xff] %v2777_v42 }
 0xa29   :  { %4057 = shalt.err (!%p4054_p12)
}
 0xa2a   :  { %s4058_s25 = scalar_lea.hbm %s5782_s9, 2048 }
 0xa2b   :  { %p4059_p13 = scmp.ne.s32.totalorder %s5782_s9, %s4058_s25  ;;  %p4062_p0 = scmp.lt.u32.totalorder %s4058_s25, %s5782_s9 }
 0xa2d   :  { %p4064_p1 = pnand %p4062_p0, %p4059_p13 }
 0xa2f   :  { %4067 = shalt.err (!%p4064_p1)
}
 0xa30   :  { %2805 = dma.vmem_to_hbm [thread:$0]  %s2800_s18, 2048, %s5782_s9, [#allocation6], %s4082_s21, %s4082_s21, %s4083_s22  }
 0xa31   :  { %4078 = dma.done.wait [#allocation6], 2048  }
 0xa32   :  { %4079 = vsyncadd [#allocation6], 4294965248 }
 0xa33   :  { %2809 = vsyncpa [#allocation5], 1 }
 0xa34   :  { %2810 = vsyncpa [#allocation8], 1 }
 0xa35   :  { %2811 = vsyncpa [#allocation11], 1 }
 0xa36   :  { %2812 = vsyncpa [#allocation14], 1 }
 0xa37   :  { %2813 = vsyncpa [#allocation6], 1 }
 0xa38   :  { %2814 = vsyncmov [#allocation3] }
 0xa3b   :  { %s2815_s0 = vpop.sfrf %2814 }
 0xa3c   :  { %p2861_p2 = scmp.ne.s32.totalorder %s2815_s0, 0 }
 0xa3e   :  { %2819 = shalt.err (%p2861_p2)  }

</bundles_post_ra>
